<compile_context>
chip_gen: v6e
topology: v6e:2x2x1
jax: 0.10.0
libtpu: 0.0.40
codegen_flags: <defaults>
</compile_context>

<pallas_src>
from functools import partial

import jax
import jax.numpy as jnp
from jax import lax
from jax.experimental import pallas as pl
from jax.experimental.pallas import tpu as pltpu


def _gelu_exact(x):
    # matches torch.nn.GELU() default (erf-based, not tanh approximation)
    return 0.5 * x * (1.0 + lax.erf(x * jnp.float32(0.7071067811865476)))


def tmm_kernel(x_ref, wih_ref, whh_ref, bih_ref, bhh_ref,
               w1_ref, b1_ref, w2_ref, b2_ref, w3_ref, b3_ref,
               out_ref, seq_ref, *, num_layers, seq_len):
    """GRU stack + quality-score MLP for one tile of B*M sequences.

    x_ref   : (N, bm, C)    time-major input tile
    wih_ref : (L, C, 3C)    fused input->hidden weights, gate order (r, z, n)
    whh_ref : (L, C, 3C)    fused hidden->hidden weights
    bih_ref : (L, 1, 3C)    fused input biases
    bhh_ref : (L, 1, 3C)    fused hidden biases
    w1,w2   : (C, C); b1,b2 : (1, C); w3 : (C, 1); b3 : (1, 1)
    out_ref : (bm, 1)
    seq_ref : (N*bm, C)     scratch: current layer's output sequence
    """
    bm = out_ref.shape[0]
    c = w1_ref.shape[0]

    h = jnp.zeros((bm, c), jnp.float32)
    for l in range(num_layers):            # static unroll over GRU layers
        # Hoisted input-side projection: ONE wide matmul covering every
        # timestep of this layer, with the input bias folded in once.
        if l == 0:
            x_all = x_ref[...].reshape(seq_len * bm, c)   # layer 0: read x directly
        else:
            x_all = seq_ref[...]                          # previous layer's outputs
        xp = jnp.dot(x_all, wih_ref[l],
                     preferred_element_type=jnp.float32) + bih_ref[l]   # (N*bm, 3C)

        w_hh = whh_ref[l]                   # (C, 3C), held across all timesteps
        b_hh = bhh_ref[l]                   # (1, 3C)
        last_layer = l == num_layers - 1

        h = jnp.zeros((bm, c), jnp.float32)
        for t in range(seq_len):            # static unroll: N is small & known
            xp_t = xp[t * bm:(t + 1) * bm]                                  # (bm, 3C)
            hp = jnp.dot(h, w_hh,
                         preferred_element_type=jnp.float32) + b_hh        # (bm, 3C)
            r = jax.nn.sigmoid(xp_t[:, :c] + hp[:, :c])
            z = jax.nn.sigmoid(xp_t[:, c:2 * c] + hp[:, c:2 * c])
            n = jnp.tanh(xp_t[:, 2 * c:] + r * hp[:, 2 * c:])
            h = (1.0 - z) * n + z * h
            if not last_layer:              # last layer only needs the final h
                seq_ref[t * bm:(t + 1) * bm, :] = h

    # fc_quality_score: Linear -> GELU -> Linear -> GELU -> Linear(1)
    a = _gelu_exact(jnp.dot(h, w1_ref[...],
                            preferred_element_type=jnp.float32) + b1_ref[...])
    a = _gelu_exact(jnp.dot(a, w2_ref[...],
                            preferred_element_type=jnp.float32) + b2_ref[...])
    out_ref[...] = jnp.dot(a, w3_ref[...],
                           preferred_element_type=jnp.float32) + b3_ref[...]


def tmm_forward(x, params, tile_bm=None):
    B, M, N, C = x.shape
    BM = B * M
    L = params["wih"].shape[0]
    if tile_bm is None:
        tile_bm = BM                        # toy sizes fit one VMEM-resident tile
    assert BM % tile_bm == 0

    # (B, M, N, C) -> time-major (N, BM, C) so per-timestep slices are
    # contiguous sublane rows inside the kernel.
    # TODO(synk): at production sizes fold this permutation into the gridded
    # layout / manual DMA instead of a wrapper-side HBM transpose pass.
    x_tm = jnp.transpose(x.reshape(BM, N, C).astype(jnp.float32), (1, 0, 2))

    def _resident(a):                       # whole array, constant block index
        nd = a.ndim
        return pl.BlockSpec(a.shape, lambda i: (0,) * nd)

    out = pl.pallas_call(
        partial(tmm_kernel, num_layers=L, seq_len=N),
        out_shape=jax.ShapeDtypeStruct((BM, 1), jnp.float32),
        grid=(BM // tile_bm,),
        in_specs=[
            pl.BlockSpec((N, tile_bm, C), lambda i: (0, i, 0)),
            _resident(params["wih"]), _resident(params["whh"]),
            _resident(params["bih"]), _resident(params["bhh"]),
            _resident(params["w1"]), _resident(params["b1"]),
            _resident(params["w2"]), _resident(params["b2"]),
            _resident(params["w3"]), _resident(params["b3"]),
        ],
        out_specs=pl.BlockSpec((tile_bm, 1), lambda i: (i, 0)),
        scratch_shapes=[pltpu.VMEM((N * tile_bm, C), jnp.float32)],
        compiler_params=pltpu.CompilerParams(
            dimension_semantics=("parallel",)),
    )(x_tm, params["wih"], params["whh"], params["bih"], params["bhh"],
      params["w1"], params["b1"], params["w2"], params["b2"],
      params["w3"], params["b3"])
    return out.reshape(B, M)


def tmm_reference(x, params):
    """Pure-JAX reference (same math as the PyTorch module), fused gate layout."""
    B, M, N, C = x.shape
    L = params["wih"].shape[0]
    seq = x.reshape(B * M, N, C).astype(jnp.float32)
    for l in range(L):
        h = jnp.zeros((B * M, C), jnp.float32)
        outs = []
        for t in range(N):
            x_t = seq[:, t, :]
            gi = x_t @ params["wih"][l] + params["bih"][l]    # (BM, 3C) [r|z|n]
            gh = h @ params["whh"][l] + params["bhh"][l]
            r = jax.nn.sigmoid(gi[:, :C] + gh[:, :C])
            z = jax.nn.sigmoid(gi[:, C:2 * C] + gh[:, C:2 * C])
            n = jnp.tanh(gi[:, 2 * C:] + r * gh[:, 2 * C:])
            h = (1.0 - z) * n + z * h
            outs.append(h)
        seq = jnp.stack(outs, axis=1)
    h_last = seq[:, -1, :]
    a = _gelu_exact(h_last @ params["w1"] + params["b1"])
    a = _gelu_exact(a @ params["w2"] + params["b2"])
    out = a @ params["w3"] + params["b3"]
    return out.reshape(B, M)


def init_params(key, C, L, scale=0.2):
    # Fused, pre-transposed layout: columns are the three gates [r | z | n],
    # so the kernel does x @ W (f32; at production C>=128 on v6e/v7x these
    # could be stored bf16 with f32 accumulation).
    ks = jax.random.split(key, 10)
    return {
        "wih": scale * jax.random.normal(ks[0], (L, C, 3 * C), jnp.float32),
        "whh": scale * jax.random.normal(ks[1], (L, C, 3 * C), jnp.float32),
        "bih": scale * jax.random.normal(ks[2], (L, 1, 3 * C), jnp.float32),
        "bhh": scale * jax.random.normal(ks[3], (L, 1, 3 * C), jnp.float32),
        "w1": scale * jax.random.normal(ks[4], (C, C), jnp.float32),
        "b1": scale * jax.random.normal(ks[5], (1, C), jnp.float32),
        "w2": scale * jax.random.normal(ks[6], (C, C), jnp.float32),
        "b2": scale * jax.random.normal(ks[7], (1, C), jnp.float32),
        "w3": scale * jax.random.normal(ks[8], (C, 1), jnp.float32),
        "b3": scale * jax.random.normal(ks[9], (1, 1), jnp.float32),
    }


if __name__ == "__main__":
    B, M, N, C, L = 2, 4, 8, 32, 3   # (batch, views, seq_len, embed_dim), 3 GRU layers
    key = jax.random.PRNGKey(0)
    kx, kp = jax.random.split(key)
    x = jax.random.normal(kx, (B, M, N, C), jnp.float32)
    params = init_params(kp, C, L)

    out = jax.jit(tmm_forward)(x, params)
    out = jax.block_until_ready(out)

    ref = tmm_reference(x, params)
    assert out.shape == (B, M), out.shape
    assert jnp.allclose(out, ref, atol=1e-3, rtol=1e-3), (
        f"max err {jnp.max(jnp.abs(out - ref))}")
    print("KERNEL_OK")
</pallas_src>

<mosaic_0001>
module attributes {stable_mosaic.version = 11 : i64} {
  func.func @tmm_kernel(%arg0: i32, %arg1: memref<8x8x32xf32, #tpu.memory_space<vmem>>, %arg2: memref<3x32x96xf32, #tpu.memory_space<vmem>>, %arg3: memref<3x32x96xf32, #tpu.memory_space<vmem>>, %arg4: memref<3x1x96xf32, #tpu.memory_space<vmem>>, %arg5: memref<3x1x96xf32, #tpu.memory_space<vmem>>, %arg6: memref<32x32xf32, #tpu.memory_space<vmem>>, %arg7: memref<1x32xf32, #tpu.memory_space<vmem>>, %arg8: memref<32x32xf32, #tpu.memory_space<vmem>>, %arg9: memref<1x32xf32, #tpu.memory_space<vmem>>, %arg10: memref<32x1xf32, #tpu.memory_space<vmem>>, %arg11: memref<1x1xf32, #tpu.memory_space<vmem>>, %arg12: memref<8x1xf32, #tpu.memory_space<vmem>>, %arg13: memref<64x32xf32, #tpu.memory_space<vmem>>) attributes {dimension_semantics = [#tpu.dimension_semantics<parallel>], iteration_bounds = array<i64: 1>, scalar_prefetch = 0 : i64, scratch_operands = 1 : i64, tpu.core_type = #tpu.core_type<tc>, window_params = [{transform_indices = @transform_0, window_bounds = array<i64: 8, 8, 32>}, {pipeline_mode = #tpu.pipeline_mode<synchronous>, transform_indices = @transform_1, window_bounds = array<i64: 3, 32, 96>}, {pipeline_mode = #tpu.pipeline_mode<synchronous>, transform_indices = @transform_2, window_bounds = array<i64: 3, 32, 96>}, {pipeline_mode = #tpu.pipeline_mode<synchronous>, transform_indices = @transform_3, window_bounds = array<i64: 3, 1, 96>}, {pipeline_mode = #tpu.pipeline_mode<synchronous>, transform_indices = @transform_4, window_bounds = array<i64: 3, 1, 96>}, {pipeline_mode = #tpu.pipeline_mode<synchronous>, transform_indices = @transform_5, window_bounds = array<i64: 32, 32>}, {pipeline_mode = #tpu.pipeline_mode<synchronous>, transform_indices = @transform_6, window_bounds = array<i64: 1, 32>}, {pipeline_mode = #tpu.pipeline_mode<synchronous>, transform_indices = @transform_7, window_bounds = array<i64: 32, 32>}, {pipeline_mode = #tpu.pipeline_mode<synchronous>, transform_indices = @transform_8, window_bounds = array<i64: 1, 32>}, {pipeline_mode = #tpu.pipeline_mode<synchronous>, transform_indices = @transform_9, window_bounds = array<i64: 32, 1>}, {pipeline_mode = #tpu.pipeline_mode<synchronous>, transform_indices = @transform_10, window_bounds = array<i64: 1, 1>}, {transform_indices = @transform_11, window_bounds = array<i64: 8, 1>}]} {
    %c0 = arith.constant 0 : index
    %c0_0 = arith.constant 0 : index
    %c0_1 = arith.constant 0 : index
    %0 = vector.load %arg1[%c0, %c0_0, %c0_1] : memref<8x8x32xf32, #tpu.memory_space<vmem>>, vector<8x8x32xf32>
    %1 = vector.shape_cast %0 : vector<8x8x32xf32> to vector<64x32xf32>
    %c0_2 = arith.constant 0 : index
    %c0_3 = arith.constant 0 : index
    %c0_4 = arith.constant 0 : index
    %2 = vector.load %arg2[%c0_2, %c0_3, %c0_4] : memref<3x32x96xf32, #tpu.memory_space<vmem>>, vector<1x32x96xf32>
    %3 = vector.shape_cast %2 : vector<1x32x96xf32> to vector<32x96xf32>
    %cst = arith.constant dense<0.000000e+00> : vector<64x96xf32>
    %4 = tpu.matmul %1, %3, %cst {dimension_numbers = #tpu.dot_dimension_numbers<[1], [0], [0], [1], [0, 0, 1, 1], [], []>} : vector<64x32xf32>, vector<32x96xf32>, vector<64x96xf32> -> vector<64x96xf32>
    %c0_5 = arith.constant 0 : index
    %c0_6 = arith.constant 0 : index
    %c0_7 = arith.constant 0 : index
    %5 = vector.load %arg4[%c0_5, %c0_6, %c0_7] : memref<3x1x96xf32, #tpu.memory_space<vmem>>, vector<1x1x96xf32>
    %6 = vector.shape_cast %5 : vector<1x1x96xf32> to vector<1x96xf32>
    %7 = vector.broadcast %6 : vector<1x96xf32> to vector<64x96xf32>
    %8 = arith.addf %4, %7 : vector<64x96xf32>
    %c0_8 = arith.constant 0 : index
    %c0_9 = arith.constant 0 : index
    %c0_10 = arith.constant 0 : index
    %9 = vector.load %arg3[%c0_8, %c0_9, %c0_10] : memref<3x32x96xf32, #tpu.memory_space<vmem>>, vector<1x32x96xf32>
    %10 = vector.shape_cast %9 : vector<1x32x96xf32> to vector<32x96xf32>
    %c0_11 = arith.constant 0 : index
    %c0_12 = arith.constant 0 : index
    %c0_13 = arith.constant 0 : index
    %11 = vector.load %arg5[%c0_11, %c0_12, %c0_13] : memref<3x1x96xf32, #tpu.memory_space<vmem>>, vector<1x1x96xf32>
    %12 = vector.shape_cast %11 : vector<1x1x96xf32> to vector<1x96xf32>
    %cst_14 = arith.constant 0.000000e+00 : f32
    %13 = vector.broadcast %cst_14 : f32 to vector<8x32xf32>
    %14 = vector.extract_strided_slice %8 {offsets = [0, 0], sizes = [8, 96], strides = [1, 1]} : vector<64x96xf32> to vector<8x96xf32>
    %cst_15 = arith.constant dense<0.000000e+00> : vector<8x96xf32>
    %15 = tpu.matmul %13, %10, %cst_15 {dimension_numbers = #tpu.dot_dimension_numbers<[1], [0], [0], [1], [0, 0, 1, 1], [], []>} : vector<8x32xf32>, vector<32x96xf32>, vector<8x96xf32> -> vector<8x96xf32>
    %16 = vector.broadcast %12 : vector<1x96xf32> to vector<8x96xf32>
    %17 = arith.addf %15, %16 : vector<8x96xf32>
    %18 = vector.extract_strided_slice %14 {offsets = [0, 0], sizes = [8, 32], strides = [1, 1]} : vector<8x96xf32> to vector<8x32xf32>
    %19 = vector.extract_strided_slice %17 {offsets = [0, 0], sizes = [8, 32], strides = [1, 1]} : vector<8x96xf32> to vector<8x32xf32>
    %20 = arith.addf %18, %19 : vector<8x32xf32>
    %21 = arith.negf %20 : vector<8x32xf32>
    %22 = math.exp %21 : vector<8x32xf32>
    %cst_16 = arith.constant 1.000000e+00 : f32
    %23 = vector.broadcast %cst_16 : f32 to vector<8x32xf32>
    %24 = arith.addf %23, %22 : vector<8x32xf32>
    %25 = arith.divf %23, %24 : vector<8x32xf32>
    %26 = vector.extract_strided_slice %14 {offsets = [0, 32], sizes = [8, 32], strides = [1, 1]} : vector<8x96xf32> to vector<8x32xf32>
    %27 = vector.extract_strided_slice %17 {offsets = [0, 32], sizes = [8, 32], strides = [1, 1]} : vector<8x96xf32> to vector<8x32xf32>
    %28 = arith.addf %26, %27 : vector<8x32xf32>
    %29 = arith.negf %28 : vector<8x32xf32>
    %30 = math.exp %29 : vector<8x32xf32>
    %cst_17 = arith.constant 1.000000e+00 : f32
    %31 = vector.broadcast %cst_17 : f32 to vector<8x32xf32>
    %32 = arith.addf %31, %30 : vector<8x32xf32>
    %33 = arith.divf %31, %32 : vector<8x32xf32>
    %34 = vector.extract_strided_slice %14 {offsets = [0, 64], sizes = [8, 32], strides = [1, 1]} : vector<8x96xf32> to vector<8x32xf32>
    %35 = vector.extract_strided_slice %17 {offsets = [0, 64], sizes = [8, 32], strides = [1, 1]} : vector<8x96xf32> to vector<8x32xf32>
    %36 = arith.mulf %25, %35 : vector<8x32xf32>
    %37 = arith.addf %34, %36 : vector<8x32xf32>
    %38 = math.tanh %37 : vector<8x32xf32>
    %cst_18 = arith.constant 1.000000e+00 : f32
    %39 = vector.broadcast %cst_18 : f32 to vector<8x32xf32>
    %40 = arith.subf %39, %33 : vector<8x32xf32>
    %41 = arith.mulf %40, %38 : vector<8x32xf32>
    %42 = arith.mulf %33, %13 : vector<8x32xf32>
    %43 = arith.addf %41, %42 : vector<8x32xf32>
    %c0_19 = arith.constant 0 : index
    %c0_20 = arith.constant 0 : index
    %44 = vector.load %arg13[%c0_19, %c0_20] : memref<64x32xf32, #tpu.memory_space<vmem>>, vector<8x32xf32>
    tpu.vector_store %arg13[%c0_19, %c0_20], %43 {strides = array<i32>} : memref<64x32xf32, #tpu.memory_space<vmem>>, vector<8x32xf32>,
    %45 = vector.extract_strided_slice %8 {offsets = [8, 0], sizes = [8, 96], strides = [1, 1]} : vector<64x96xf32> to vector<8x96xf32>
    %cst_21 = arith.constant dense<0.000000e+00> : vector<8x96xf32>
    %46 = tpu.matmul %43, %10, %cst_21 {dimension_numbers = #tpu.dot_dimension_numbers<[1], [0], [0], [1], [0, 0, 1, 1], [], []>} : vector<8x32xf32>, vector<32x96xf32>, vector<8x96xf32> -> vector<8x96xf32>
    %47 = vector.broadcast %12 : vector<1x96xf32> to vector<8x96xf32>
    %48 = arith.addf %46, %47 : vector<8x96xf32>
    %49 = vector.extract_strided_slice %45 {offsets = [0, 0], sizes = [8, 32], strides = [1, 1]} : vector<8x96xf32> to vector<8x32xf32>
    %50 = vector.extract_strided_slice %48 {offsets = [0, 0], sizes = [8, 32], strides = [1, 1]} : vector<8x96xf32> to vector<8x32xf32>
    %51 = arith.addf %49, %50 : vector<8x32xf32>
    %52 = arith.negf %51 : vector<8x32xf32>
    %53 = math.exp %52 : vector<8x32xf32>
    %cst_22 = arith.constant 1.000000e+00 : f32
    %54 = vector.broadcast %cst_22 : f32 to vector<8x32xf32>
    %55 = arith.addf %54, %53 : vector<8x32xf32>
    %56 = arith.divf %54, %55 : vector<8x32xf32>
    %57 = vector.extract_strided_slice %45 {offsets = [0, 32], sizes = [8, 32], strides = [1, 1]} : vector<8x96xf32> to vector<8x32xf32>
    %58 = vector.extract_strided_slice %48 {offsets = [0, 32], sizes = [8, 32], strides = [1, 1]} : vector<8x96xf32> to vector<8x32xf32>
    %59 = arith.addf %57, %58 : vector<8x32xf32>
    %60 = arith.negf %59 : vector<8x32xf32>
    %61 = math.exp %60 : vector<8x32xf32>
    %cst_23 = arith.constant 1.000000e+00 : f32
    %62 = vector.broadcast %cst_23 : f32 to vector<8x32xf32>
    %63 = arith.addf %62, %61 : vector<8x32xf32>
    %64 = arith.divf %62, %63 : vector<8x32xf32>
    %65 = vector.extract_strided_slice %45 {offsets = [0, 64], sizes = [8, 32], strides = [1, 1]} : vector<8x96xf32> to vector<8x32xf32>
    %66 = vector.extract_strided_slice %48 {offsets = [0, 64], sizes = [8, 32], strides = [1, 1]} : vector<8x96xf32> to vector<8x32xf32>
    %67 = arith.mulf %56, %66 : vector<8x32xf32>
    %68 = arith.addf %65, %67 : vector<8x32xf32>
    %69 = math.tanh %68 : vector<8x32xf32>
    %cst_24 = arith.constant 1.000000e+00 : f32
    %70 = vector.broadcast %cst_24 : f32 to vector<8x32xf32>
    %71 = arith.subf %70, %64 : vector<8x32xf32>
    %72 = arith.mulf %71, %69 : vector<8x32xf32>
    %73 = arith.mulf %64, %43 : vector<8x32xf32>
    %74 = arith.addf %72, %73 : vector<8x32xf32>
    %c8 = arith.constant 8 : index
    %c0_25 = arith.constant 0 : index
    %75 = vector.load %arg13[%c8, %c0_25] : memref<64x32xf32, #tpu.memory_space<vmem>>, vector<8x32xf32>
    tpu.vector_store %arg13[%c8, %c0_25], %74 {strides = array<i32>} : memref<64x32xf32, #tpu.memory_space<vmem>>, vector<8x32xf32>,
    %76 = vector.extract_strided_slice %8 {offsets = [16, 0], sizes = [8, 96], strides = [1, 1]} : vector<64x96xf32> to vector<8x96xf32>
    %cst_26 = arith.constant dense<0.000000e+00> : vector<8x96xf32>
    %77 = tpu.matmul %74, %10, %cst_26 {dimension_numbers = #tpu.dot_dimension_numbers<[1], [0], [0], [1], [0, 0, 1, 1], [], []>} : vector<8x32xf32>, vector<32x96xf32>, vector<8x96xf32> -> vector<8x96xf32>
    %78 = vector.broadcast %12 : vector<1x96xf32> to vector<8x96xf32>
    %79 = arith.addf %77, %78 : vector<8x96xf32>
    %80 = vector.extract_strided_slice %76 {offsets = [0, 0], sizes = [8, 32], strides = [1, 1]} : vector<8x96xf32> to vector<8x32xf32>
    %81 = vector.extract_strided_slice %79 {offsets = [0, 0], sizes = [8, 32], strides = [1, 1]} : vector<8x96xf32> to vector<8x32xf32>
    %82 = arith.addf %80, %81 : vector<8x32xf32>
    %83 = arith.negf %82 : vector<8x32xf32>
    %84 = math.exp %83 : vector<8x32xf32>
    %cst_27 = arith.constant 1.000000e+00 : f32
    %85 = vector.broadcast %cst_27 : f32 to vector<8x32xf32>
    %86 = arith.addf %85, %84 : vector<8x32xf32>
    %87 = arith.divf %85, %86 : vector<8x32xf32>
    %88 = vector.extract_strided_slice %76 {offsets = [0, 32], sizes = [8, 32], strides = [1, 1]} : vector<8x96xf32> to vector<8x32xf32>
    %89 = vector.extract_strided_slice %79 {offsets = [0, 32], sizes = [8, 32], strides = [1, 1]} : vector<8x96xf32> to vector<8x32xf32>
    %90 = arith.addf %88, %89 : vector<8x32xf32>
    %91 = arith.negf %90 : vector<8x32xf32>
    %92 = math.exp %91 : vector<8x32xf32>
    %cst_28 = arith.constant 1.000000e+00 : f32
    %93 = vector.broadcast %cst_28 : f32 to vector<8x32xf32>
    %94 = arith.addf %93, %92 : vector<8x32xf32>
    %95 = arith.divf %93, %94 : vector<8x32xf32>
    %96 = vector.extract_strided_slice %76 {offsets = [0, 64], sizes = [8, 32], strides = [1, 1]} : vector<8x96xf32> to vector<8x32xf32>
    %97 = vector.extract_strided_slice %79 {offsets = [0, 64], sizes = [8, 32], strides = [1, 1]} : vector<8x96xf32> to vector<8x32xf32>
    %98 = arith.mulf %87, %97 : vector<8x32xf32>
    %99 = arith.addf %96, %98 : vector<8x32xf32>
    %100 = math.tanh %99 : vector<8x32xf32>
    %cst_29 = arith.constant 1.000000e+00 : f32
    %101 = vector.broadcast %cst_29 : f32 to vector<8x32xf32>
    %102 = arith.subf %101, %95 : vector<8x32xf32>
    %103 = arith.mulf %102, %100 : vector<8x32xf32>
    %104 = arith.mulf %95, %74 : vector<8x32xf32>
    %105 = arith.addf %103, %104 : vector<8x32xf32>
    %c16 = arith.constant 16 : index
    %c0_30 = arith.constant 0 : index
    %106 = vector.load %arg13[%c16, %c0_30] : memref<64x32xf32, #tpu.memory_space<vmem>>, vector<8x32xf32>
    tpu.vector_store %arg13[%c16, %c0_30], %105 {strides = array<i32>} : memref<64x32xf32, #tpu.memory_space<vmem>>, vector<8x32xf32>,
    %107 = vector.extract_strided_slice %8 {offsets = [24, 0], sizes = [8, 96], strides = [1, 1]} : vector<64x96xf32> to vector<8x96xf32>
    %cst_31 = arith.constant dense<0.000000e+00> : vector<8x96xf32>
    %108 = tpu.matmul %105, %10, %cst_31 {dimension_numbers = #tpu.dot_dimension_numbers<[1], [0], [0], [1], [0, 0, 1, 1], [], []>} : vector<8x32xf32>, vector<32x96xf32>, vector<8x96xf32> -> vector<8x96xf32>
    %109 = vector.broadcast %12 : vector<1x96xf32> to vector<8x96xf32>
    %110 = arith.addf %108, %109 : vector<8x96xf32>
    %111 = vector.extract_strided_slice %107 {offsets = [0, 0], sizes = [8, 32], strides = [1, 1]} : vector<8x96xf32> to vector<8x32xf32>
    %112 = vector.extract_strided_slice %110 {offsets = [0, 0], sizes = [8, 32], strides = [1, 1]} : vector<8x96xf32> to vector<8x32xf32>
    %113 = arith.addf %111, %112 : vector<8x32xf32>
    %114 = arith.negf %113 : vector<8x32xf32>
    %115 = math.exp %114 : vector<8x32xf32>
    %cst_32 = arith.constant 1.000000e+00 : f32
    %116 = vector.broadcast %cst_32 : f32 to vector<8x32xf32>
    %117 = arith.addf %116, %115 : vector<8x32xf32>
    %118 = arith.divf %116, %117 : vector<8x32xf32>
    %119 = vector.extract_strided_slice %107 {offsets = [0, 32], sizes = [8, 32], strides = [1, 1]} : vector<8x96xf32> to vector<8x32xf32>
    %120 = vector.extract_strided_slice %110 {offsets = [0, 32], sizes = [8, 32], strides = [1, 1]} : vector<8x96xf32> to vector<8x32xf32>
    %121 = arith.addf %119, %120 : vector<8x32xf32>
    %122 = arith.negf %121 : vector<8x32xf32>
    %123 = math.exp %122 : vector<8x32xf32>
    %cst_33 = arith.constant 1.000000e+00 : f32
    %124 = vector.broadcast %cst_33 : f32 to vector<8x32xf32>
    %125 = arith.addf %124, %123 : vector<8x32xf32>
    %126 = arith.divf %124, %125 : vector<8x32xf32>
    %127 = vector.extract_strided_slice %107 {offsets = [0, 64], sizes = [8, 32], strides = [1, 1]} : vector<8x96xf32> to vector<8x32xf32>
    %128 = vector.extract_strided_slice %110 {offsets = [0, 64], sizes = [8, 32], strides = [1, 1]} : vector<8x96xf32> to vector<8x32xf32>
    %129 = arith.mulf %118, %128 : vector<8x32xf32>
    %130 = arith.addf %127, %129 : vector<8x32xf32>
    %131 = math.tanh %130 : vector<8x32xf32>
    %cst_34 = arith.constant 1.000000e+00 : f32
    %132 = vector.broadcast %cst_34 : f32 to vector<8x32xf32>
    %133 = arith.subf %132, %126 : vector<8x32xf32>
    %134 = arith.mulf %133, %131 : vector<8x32xf32>
    %135 = arith.mulf %126, %105 : vector<8x32xf32>
    %136 = arith.addf %134, %135 : vector<8x32xf32>
    %c24 = arith.constant 24 : index
    %c0_35 = arith.constant 0 : index
    %137 = vector.load %arg13[%c24, %c0_35] : memref<64x32xf32, #tpu.memory_space<vmem>>, vector<8x32xf32>
    tpu.vector_store %arg13[%c24, %c0_35], %136 {strides = array<i32>} : memref<64x32xf32, #tpu.memory_space<vmem>>, vector<8x32xf32>,
    %138 = vector.extract_strided_slice %8 {offsets = [32, 0], sizes = [8, 96], strides = [1, 1]} : vector<64x96xf32> to vector<8x96xf32>
    %cst_36 = arith.constant dense<0.000000e+00> : vector<8x96xf32>
    %139 = tpu.matmul %136, %10, %cst_36 {dimension_numbers = #tpu.dot_dimension_numbers<[1], [0], [0], [1], [0, 0, 1, 1], [], []>} : vector<8x32xf32>, vector<32x96xf32>, vector<8x96xf32> -> vector<8x96xf32>
    %140 = vector.broadcast %12 : vector<1x96xf32> to vector<8x96xf32>
    %141 = arith.addf %139, %140 : vector<8x96xf32>
    %142 = vector.extract_strided_slice %138 {offsets = [0, 0], sizes = [8, 32], strides = [1, 1]} : vector<8x96xf32> to vector<8x32xf32>
    %143 = vector.extract_strided_slice %141 {offsets = [0, 0], sizes = [8, 32], strides = [1, 1]} : vector<8x96xf32> to vector<8x32xf32>
    %144 = arith.addf %142, %143 : vector<8x32xf32>
    %145 = arith.negf %144 : vector<8x32xf32>
    %146 = math.exp %145 : vector<8x32xf32>
    %cst_37 = arith.constant 1.000000e+00 : f32
    %147 = vector.broadcast %cst_37 : f32 to vector<8x32xf32>
    %148 = arith.addf %147, %146 : vector<8x32xf32>
    %149 = arith.divf %147, %148 : vector<8x32xf32>
    %150 = vector.extract_strided_slice %138 {offsets = [0, 32], sizes = [8, 32], strides = [1, 1]} : vector<8x96xf32> to vector<8x32xf32>
    %151 = vector.extract_strided_slice %141 {offsets = [0, 32], sizes = [8, 32], strides = [1, 1]} : vector<8x96xf32> to vector<8x32xf32>
    %152 = arith.addf %150, %151 : vector<8x32xf32>
    %153 = arith.negf %152 : vector<8x32xf32>
    %154 = math.exp %153 : vector<8x32xf32>
    %cst_38 = arith.constant 1.000000e+00 : f32
    %155 = vector.broadcast %cst_38 : f32 to vector<8x32xf32>
    %156 = arith.addf %155, %154 : vector<8x32xf32>
    %157 = arith.divf %155, %156 : vector<8x32xf32>
    %158 = vector.extract_strided_slice %138 {offsets = [0, 64], sizes = [8, 32], strides = [1, 1]} : vector<8x96xf32> to vector<8x32xf32>
    %159 = vector.extract_strided_slice %141 {offsets = [0, 64], sizes = [8, 32], strides = [1, 1]} : vector<8x96xf32> to vector<8x32xf32>
    %160 = arith.mulf %149, %159 : vector<8x32xf32>
    %161 = arith.addf %158, %160 : vector<8x32xf32>
    %162 = math.tanh %161 : vector<8x32xf32>
    %cst_39 = arith.constant 1.000000e+00 : f32
    %163 = vector.broadcast %cst_39 : f32 to vector<8x32xf32>
    %164 = arith.subf %163, %157 : vector<8x32xf32>
    %165 = arith.mulf %164, %162 : vector<8x32xf32>
    %166 = arith.mulf %157, %136 : vector<8x32xf32>
    %167 = arith.addf %165, %166 : vector<8x32xf32>
    %c32 = arith.constant 32 : index
    %c0_40 = arith.constant 0 : index
    %168 = vector.load %arg13[%c32, %c0_40] : memref<64x32xf32, #tpu.memory_space<vmem>>, vector<8x32xf32>
    tpu.vector_store %arg13[%c32, %c0_40], %167 {strides = array<i32>} : memref<64x32xf32, #tpu.memory_space<vmem>>, vector<8x32xf32>,
    %169 = vector.extract_strided_slice %8 {offsets = [40, 0], sizes = [8, 96], strides = [1, 1]} : vector<64x96xf32> to vector<8x96xf32>
    %cst_41 = arith.constant dense<0.000000e+00> : vector<8x96xf32>
    %170 = tpu.matmul %167, %10, %cst_41 {dimension_numbers = #tpu.dot_dimension_numbers<[1], [0], [0], [1], [0, 0, 1, 1], [], []>} : vector<8x32xf32>, vector<32x96xf32>, vector<8x96xf32> -> vector<8x96xf32>
    %171 = vector.broadcast %12 : vector<1x96xf32> to vector<8x96xf32>
    %172 = arith.addf %170, %171 : vector<8x96xf32>
    %173 = vector.extract_strided_slice %169 {offsets = [0, 0], sizes = [8, 32], strides = [1, 1]} : vector<8x96xf32> to vector<8x32xf32>
    %174 = vector.extract_strided_slice %172 {offsets = [0, 0], sizes = [8, 32], strides = [1, 1]} : vector<8x96xf32> to vector<8x32xf32>
    %175 = arith.addf %173, %174 : vector<8x32xf32>
    %176 = arith.negf %175 : vector<8x32xf32>
    %177 = math.exp %176 : vector<8x32xf32>
    %cst_42 = arith.constant 1.000000e+00 : f32
    %178 = vector.broadcast %cst_42 : f32 to vector<8x32xf32>
    %179 = arith.addf %178, %177 : vector<8x32xf32>
    %180 = arith.divf %178, %179 : vector<8x32xf32>
    %181 = vector.extract_strided_slice %169 {offsets = [0, 32], sizes = [8, 32], strides = [1, 1]} : vector<8x96xf32> to vector<8x32xf32>
    %182 = vector.extract_strided_slice %172 {offsets = [0, 32], sizes = [8, 32], strides = [1, 1]} : vector<8x96xf32> to vector<8x32xf32>
    %183 = arith.addf %181, %182 : vector<8x32xf32>
    %184 = arith.negf %183 : vector<8x32xf32>
    %185 = math.exp %184 : vector<8x32xf32>
    %cst_43 = arith.constant 1.000000e+00 : f32
    %186 = vector.broadcast %cst_43 : f32 to vector<8x32xf32>
    %187 = arith.addf %186, %185 : vector<8x32xf32>
    %188 = arith.divf %186, %187 : vector<8x32xf32>
    %189 = vector.extract_strided_slice %169 {offsets = [0, 64], sizes = [8, 32], strides = [1, 1]} : vector<8x96xf32> to vector<8x32xf32>
    %190 = vector.extract_strided_slice %172 {offsets = [0, 64], sizes = [8, 32], strides = [1, 1]} : vector<8x96xf32> to vector<8x32xf32>
    %191 = arith.mulf %180, %190 : vector<8x32xf32>
    %192 = arith.addf %189, %191 : vector<8x32xf32>
    %193 = math.tanh %192 : vector<8x32xf32>
    %cst_44 = arith.constant 1.000000e+00 : f32
    %194 = vector.broadcast %cst_44 : f32 to vector<8x32xf32>
    %195 = arith.subf %194, %188 : vector<8x32xf32>
    %196 = arith.mulf %195, %193 : vector<8x32xf32>
    %197 = arith.mulf %188, %167 : vector<8x32xf32>
    %198 = arith.addf %196, %197 : vector<8x32xf32>
    %c40 = arith.constant 40 : index
    %c0_45 = arith.constant 0 : index
    %199 = vector.load %arg13[%c40, %c0_45] : memref<64x32xf32, #tpu.memory_space<vmem>>, vector<8x32xf32>
    tpu.vector_store %arg13[%c40, %c0_45], %198 {strides = array<i32>} : memref<64x32xf32, #tpu.memory_space<vmem>>, vector<8x32xf32>,
    %200 = vector.extract_strided_slice %8 {offsets = [48, 0], sizes = [8, 96], strides = [1, 1]} : vector<64x96xf32> to vector<8x96xf32>
    %cst_46 = arith.constant dense<0.000000e+00> : vector<8x96xf32>
    %201 = tpu.matmul %198, %10, %cst_46 {dimension_numbers = #tpu.dot_dimension_numbers<[1], [0], [0], [1], [0, 0, 1, 1], [], []>} : vector<8x32xf32>, vector<32x96xf32>, vector<8x96xf32> -> vector<8x96xf32>
    %202 = vector.broadcast %12 : vector<1x96xf32> to vector<8x96xf32>
    %203 = arith.addf %201, %202 : vector<8x96xf32>
    %204 = vector.extract_strided_slice %200 {offsets = [0, 0], sizes = [8, 32], strides = [1, 1]} : vector<8x96xf32> to vector<8x32xf32>
    %205 = vector.extract_strided_slice %203 {offsets = [0, 0], sizes = [8, 32], strides = [1, 1]} : vector<8x96xf32> to vector<8x32xf32>
    %206 = arith.addf %204, %205 : vector<8x32xf32>
    %207 = arith.negf %206 : vector<8x32xf32>
    %208 = math.exp %207 : vector<8x32xf32>
    %cst_47 = arith.constant 1.000000e+00 : f32
    %209 = vector.broadcast %cst_47 : f32 to vector<8x32xf32>
    %210 = arith.addf %209, %208 : vector<8x32xf32>
    %211 = arith.divf %209, %210 : vector<8x32xf32>
    %212 = vector.extract_strided_slice %200 {offsets = [0, 32], sizes = [8, 32], strides = [1, 1]} : vector<8x96xf32> to vector<8x32xf32>
    %213 = vector.extract_strided_slice %203 {offsets = [0, 32], sizes = [8, 32], strides = [1, 1]} : vector<8x96xf32> to vector<8x32xf32>
    %214 = arith.addf %212, %213 : vector<8x32xf32>
    %215 = arith.negf %214 : vector<8x32xf32>
    %216 = math.exp %215 : vector<8x32xf32>
    %cst_48 = arith.constant 1.000000e+00 : f32
    %217 = vector.broadcast %cst_48 : f32 to vector<8x32xf32>
    %218 = arith.addf %217, %216 : vector<8x32xf32>
    %219 = arith.divf %217, %218 : vector<8x32xf32>
    %220 = vector.extract_strided_slice %200 {offsets = [0, 64], sizes = [8, 32], strides = [1, 1]} : vector<8x96xf32> to vector<8x32xf32>
    %221 = vector.extract_strided_slice %203 {offsets = [0, 64], sizes = [8, 32], strides = [1, 1]} : vector<8x96xf32> to vector<8x32xf32>
    %222 = arith.mulf %211, %221 : vector<8x32xf32>
    %223 = arith.addf %220, %222 : vector<8x32xf32>
    %224 = math.tanh %223 : vector<8x32xf32>
    %cst_49 = arith.constant 1.000000e+00 : f32
    %225 = vector.broadcast %cst_49 : f32 to vector<8x32xf32>
    %226 = arith.subf %225, %219 : vector<8x32xf32>
    %227 = arith.mulf %226, %224 : vector<8x32xf32>
    %228 = arith.mulf %219, %198 : vector<8x32xf32>
    %229 = arith.addf %227, %228 : vector<8x32xf32>
    %c48 = arith.constant 48 : index
    %c0_50 = arith.constant 0 : index
    %230 = vector.load %arg13[%c48, %c0_50] : memref<64x32xf32, #tpu.memory_space<vmem>>, vector<8x32xf32>
    tpu.vector_store %arg13[%c48, %c0_50], %229 {strides = array<i32>} : memref<64x32xf32, #tpu.memory_space<vmem>>, vector<8x32xf32>,
    %231 = vector.extract_strided_slice %8 {offsets = [56, 0], sizes = [8, 96], strides = [1, 1]} : vector<64x96xf32> to vector<8x96xf32>
    %cst_51 = arith.constant dense<0.000000e+00> : vector<8x96xf32>
    %232 = tpu.matmul %229, %10, %cst_51 {dimension_numbers = #tpu.dot_dimension_numbers<[1], [0], [0], [1], [0, 0, 1, 1], [], []>} : vector<8x32xf32>, vector<32x96xf32>, vector<8x96xf32> -> vector<8x96xf32>
    %233 = vector.broadcast %12 : vector<1x96xf32> to vector<8x96xf32>
    %234 = arith.addf %232, %233 : vector<8x96xf32>
    %235 = vector.extract_strided_slice %231 {offsets = [0, 0], sizes = [8, 32], strides = [1, 1]} : vector<8x96xf32> to vector<8x32xf32>
    %236 = vector.extract_strided_slice %234 {offsets = [0, 0], sizes = [8, 32], strides = [1, 1]} : vector<8x96xf32> to vector<8x32xf32>
    %237 = arith.addf %235, %236 : vector<8x32xf32>
    %238 = arith.negf %237 : vector<8x32xf32>
    %239 = math.exp %238 : vector<8x32xf32>
    %cst_52 = arith.constant 1.000000e+00 : f32
    %240 = vector.broadcast %cst_52 : f32 to vector<8x32xf32>
    %241 = arith.addf %240, %239 : vector<8x32xf32>
    %242 = arith.divf %240, %241 : vector<8x32xf32>
    %243 = vector.extract_strided_slice %231 {offsets = [0, 32], sizes = [8, 32], strides = [1, 1]} : vector<8x96xf32> to vector<8x32xf32>
    %244 = vector.extract_strided_slice %234 {offsets = [0, 32], sizes = [8, 32], strides = [1, 1]} : vector<8x96xf32> to vector<8x32xf32>
    %245 = arith.addf %243, %244 : vector<8x32xf32>
    %246 = arith.negf %245 : vector<8x32xf32>
    %247 = math.exp %246 : vector<8x32xf32>
    %cst_53 = arith.constant 1.000000e+00 : f32
    %248 = vector.broadcast %cst_53 : f32 to vector<8x32xf32>
    %249 = arith.addf %248, %247 : vector<8x32xf32>
    %250 = arith.divf %248, %249 : vector<8x32xf32>
    %251 = vector.extract_strided_slice %231 {offsets = [0, 64], sizes = [8, 32], strides = [1, 1]} : vector<8x96xf32> to vector<8x32xf32>
    %252 = vector.extract_strided_slice %234 {offsets = [0, 64], sizes = [8, 32], strides = [1, 1]} : vector<8x96xf32> to vector<8x32xf32>
    %253 = arith.mulf %242, %252 : vector<8x32xf32>
    %254 = arith.addf %251, %253 : vector<8x32xf32>
    %255 = math.tanh %254 : vector<8x32xf32>
    %cst_54 = arith.constant 1.000000e+00 : f32
    %256 = vector.broadcast %cst_54 : f32 to vector<8x32xf32>
    %257 = arith.subf %256, %250 : vector<8x32xf32>
    %258 = arith.mulf %257, %255 : vector<8x32xf32>
    %259 = arith.mulf %250, %229 : vector<8x32xf32>
    %260 = arith.addf %258, %259 : vector<8x32xf32>
    %c56 = arith.constant 56 : index
    %c0_55 = arith.constant 0 : index
    %261 = vector.load %arg13[%c56, %c0_55] : memref<64x32xf32, #tpu.memory_space<vmem>>, vector<8x32xf32>
    tpu.vector_store %arg13[%c56, %c0_55], %260 {strides = array<i32>} : memref<64x32xf32, #tpu.memory_space<vmem>>, vector<8x32xf32>,
    %c0_56 = arith.constant 0 : index
    %c0_57 = arith.constant 0 : index
    %262 = vector.load %arg13[%c0_56, %c0_57] : memref<64x32xf32, #tpu.memory_space<vmem>>, vector<64x32xf32>
    %c1 = arith.constant 1 : index
    %c0_58 = arith.constant 0 : index
    %c0_59 = arith.constant 0 : index
    %263 = vector.load %arg2[%c1, %c0_58, %c0_59] : memref<3x32x96xf32, #tpu.memory_space<vmem>>, vector<1x32x96xf32>
    %264 = vector.shape_cast %263 : vector<1x32x96xf32> to vector<32x96xf32>
    %cst_60 = arith.constant dense<0.000000e+00> : vector<64x96xf32>
    %265 = tpu.matmul %262, %264, %cst_60 {dimension_numbers = #tpu.dot_dimension_numbers<[1], [0], [0], [1], [0, 0, 1, 1], [], []>} : vector<64x32xf32>, vector<32x96xf32>, vector<64x96xf32> -> vector<64x96xf32>
    %c1_61 = arith.constant 1 : index
    %c0_62 = arith.constant 0 : index
    %c0_63 = arith.constant 0 : index
    %266 = vector.load %arg4[%c1_61, %c0_62, %c0_63] : memref<3x1x96xf32, #tpu.memory_space<vmem>>, vector<1x1x96xf32>
    %267 = vector.shape_cast %266 : vector<1x1x96xf32> to vector<1x96xf32>
    %268 = vector.broadcast %267 : vector<1x96xf32> to vector<64x96xf32>
    %269 = arith.addf %265, %268 : vector<64x96xf32>
    %c1_64 = arith.constant 1 : index
    %c0_65 = arith.constant 0 : index
    %c0_66 = arith.constant 0 : index
    %270 = vector.load %arg3[%c1_64, %c0_65, %c0_66] : memref<3x32x96xf32, #tpu.memory_space<vmem>>, vector<1x32x96xf32>
    %271 = vector.shape_cast %270 : vector<1x32x96xf32> to vector<32x96xf32>
    %c1_67 = arith.constant 1 : index
    %c0_68 = arith.constant 0 : index
    %c0_69 = arith.constant 0 : index
    %272 = vector.load %arg5[%c1_67, %c0_68, %c0_69] : memref<3x1x96xf32, #tpu.memory_space<vmem>>, vector<1x1x96xf32>
    %273 = vector.shape_cast %272 : vector<1x1x96xf32> to vector<1x96xf32>
    %cst_70 = arith.constant 0.000000e+00 : f32
    %274 = vector.broadcast %cst_70 : f32 to vector<8x32xf32>
    %275 = vector.extract_strided_slice %269 {offsets = [0, 0], sizes = [8, 96], strides = [1, 1]} : vector<64x96xf32> to vector<8x96xf32>
    %cst_71 = arith.constant dense<0.000000e+00> : vector<8x96xf32>
    %276 = tpu.matmul %274, %271, %cst_71 {dimension_numbers = #tpu.dot_dimension_numbers<[1], [0], [0], [1], [0, 0, 1, 1], [], []>} : vector<8x32xf32>, vector<32x96xf32>, vector<8x96xf32> -> vector<8x96xf32>
    %277 = vector.broadcast %273 : vector<1x96xf32> to vector<8x96xf32>
    %278 = arith.addf %276, %277 : vector<8x96xf32>
    %279 = vector.extract_strided_slice %275 {offsets = [0, 0], sizes = [8, 32], strides = [1, 1]} : vector<8x96xf32> to vector<8x32xf32>
    %280 = vector.extract_strided_slice %278 {offsets = [0, 0], sizes = [8, 32], strides = [1, 1]} : vector<8x96xf32> to vector<8x32xf32>
    %281 = arith.addf %279, %280 : vector<8x32xf32>
    %282 = arith.negf %281 : vector<8x32xf32>
    %283 = math.exp %282 : vector<8x32xf32>
    %cst_72 = arith.constant 1.000000e+00 : f32
    %284 = vector.broadcast %cst_72 : f32 to vector<8x32xf32>
    %285 = arith.addf %284, %283 : vector<8x32xf32>
    %286 = arith.divf %284, %285 : vector<8x32xf32>
    %287 = vector.extract_strided_slice %275 {offsets = [0, 32], sizes = [8, 32], strides = [1, 1]} : vector<8x96xf32> to vector<8x32xf32>
    %288 = vector.extract_strided_slice %278 {offsets = [0, 32], sizes = [8, 32], strides = [1, 1]} : vector<8x96xf32> to vector<8x32xf32>
    %289 = arith.addf %287, %288 : vector<8x32xf32>
    %290 = arith.negf %289 : vector<8x32xf32>
    %291 = math.exp %290 : vector<8x32xf32>
    %cst_73 = arith.constant 1.000000e+00 : f32
    %292 = vector.broadcast %cst_73 : f32 to vector<8x32xf32>
    %293 = arith.addf %292, %291 : vector<8x32xf32>
    %294 = arith.divf %292, %293 : vector<8x32xf32>
    %295 = vector.extract_strided_slice %275 {offsets = [0, 64], sizes = [8, 32], strides = [1, 1]} : vector<8x96xf32> to vector<8x32xf32>
    %296 = vector.extract_strided_slice %278 {offsets = [0, 64], sizes = [8, 32], strides = [1, 1]} : vector<8x96xf32> to vector<8x32xf32>
    %297 = arith.mulf %286, %296 : vector<8x32xf32>
    %298 = arith.addf %295, %297 : vector<8x32xf32>
    %299 = math.tanh %298 : vector<8x32xf32>
    %cst_74 = arith.constant 1.000000e+00 : f32
    %300 = vector.broadcast %cst_74 : f32 to vector<8x32xf32>
    %301 = arith.subf %300, %294 : vector<8x32xf32>
    %302 = arith.mulf %301, %299 : vector<8x32xf32>
    %303 = arith.mulf %294, %274 : vector<8x32xf32>
    %304 = arith.addf %302, %303 : vector<8x32xf32>
    %c0_75 = arith.constant 0 : index
    %c0_76 = arith.constant 0 : index
    %305 = vector.load %arg13[%c0_75, %c0_76] : memref<64x32xf32, #tpu.memory_space<vmem>>, vector<8x32xf32>
    tpu.vector_store %arg13[%c0_75, %c0_76], %304 {strides = array<i32>} : memref<64x32xf32, #tpu.memory_space<vmem>>, vector<8x32xf32>,
    %306 = vector.extract_strided_slice %269 {offsets = [8, 0], sizes = [8, 96], strides = [1, 1]} : vector<64x96xf32> to vector<8x96xf32>
    %cst_77 = arith.constant dense<0.000000e+00> : vector<8x96xf32>
    %307 = tpu.matmul %304, %271, %cst_77 {dimension_numbers = #tpu.dot_dimension_numbers<[1], [0], [0], [1], [0, 0, 1, 1], [], []>} : vector<8x32xf32>, vector<32x96xf32>, vector<8x96xf32> -> vector<8x96xf32>
    %308 = vector.broadcast %273 : vector<1x96xf32> to vector<8x96xf32>
    %309 = arith.addf %307, %308 : vector<8x96xf32>
    %310 = vector.extract_strided_slice %306 {offsets = [0, 0], sizes = [8, 32], strides = [1, 1]} : vector<8x96xf32> to vector<8x32xf32>
    %311 = vector.extract_strided_slice %309 {offsets = [0, 0], sizes = [8, 32], strides = [1, 1]} : vector<8x96xf32> to vector<8x32xf32>
    %312 = arith.addf %310, %311 : vector<8x32xf32>
    %313 = arith.negf %312 : vector<8x32xf32>
    %314 = math.exp %313 : vector<8x32xf32>
    %cst_78 = arith.constant 1.000000e+00 : f32
    %315 = vector.broadcast %cst_78 : f32 to vector<8x32xf32>
    %316 = arith.addf %315, %314 : vector<8x32xf32>
    %317 = arith.divf %315, %316 : vector<8x32xf32>
    %318 = vector.extract_strided_slice %306 {offsets = [0, 32], sizes = [8, 32], strides = [1, 1]} : vector<8x96xf32> to vector<8x32xf32>
    %319 = vector.extract_strided_slice %309 {offsets = [0, 32], sizes = [8, 32], strides = [1, 1]} : vector<8x96xf32> to vector<8x32xf32>
    %320 = arith.addf %318, %319 : vector<8x32xf32>
    %321 = arith.negf %320 : vector<8x32xf32>
    %322 = math.exp %321 : vector<8x32xf32>
    %cst_79 = arith.constant 1.000000e+00 : f32
    %323 = vector.broadcast %cst_79 : f32 to vector<8x32xf32>
    %324 = arith.addf %323, %322 : vector<8x32xf32>
    %325 = arith.divf %323, %324 : vector<8x32xf32>
    %326 = vector.extract_strided_slice %306 {offsets = [0, 64], sizes = [8, 32], strides = [1, 1]} : vector<8x96xf32> to vector<8x32xf32>
    %327 = vector.extract_strided_slice %309 {offsets = [0, 64], sizes = [8, 32], strides = [1, 1]} : vector<8x96xf32> to vector<8x32xf32>
    %328 = arith.mulf %317, %327 : vector<8x32xf32>
    %329 = arith.addf %326, %328 : vector<8x32xf32>
    %330 = math.tanh %329 : vector<8x32xf32>
    %cst_80 = arith.constant 1.000000e+00 : f32
    %331 = vector.broadcast %cst_80 : f32 to vector<8x32xf32>
    %332 = arith.subf %331, %325 : vector<8x32xf32>
    %333 = arith.mulf %332, %330 : vector<8x32xf32>
    %334 = arith.mulf %325, %304 : vector<8x32xf32>
    %335 = arith.addf %333, %334 : vector<8x32xf32>
    %c8_81 = arith.constant 8 : index
    %c0_82 = arith.constant 0 : index
    %336 = vector.load %arg13[%c8_81, %c0_82] : memref<64x32xf32, #tpu.memory_space<vmem>>, vector<8x32xf32>
    tpu.vector_store %arg13[%c8_81, %c0_82], %335 {strides = array<i32>} : memref<64x32xf32, #tpu.memory_space<vmem>>, vector<8x32xf32>,
    %337 = vector.extract_strided_slice %269 {offsets = [16, 0], sizes = [8, 96], strides = [1, 1]} : vector<64x96xf32> to vector<8x96xf32>
    %cst_83 = arith.constant dense<0.000000e+00> : vector<8x96xf32>
    %338 = tpu.matmul %335, %271, %cst_83 {dimension_numbers = #tpu.dot_dimension_numbers<[1], [0], [0], [1], [0, 0, 1, 1], [], []>} : vector<8x32xf32>, vector<32x96xf32>, vector<8x96xf32> -> vector<8x96xf32>
    %339 = vector.broadcast %273 : vector<1x96xf32> to vector<8x96xf32>
    %340 = arith.addf %338, %339 : vector<8x96xf32>
    %341 = vector.extract_strided_slice %337 {offsets = [0, 0], sizes = [8, 32], strides = [1, 1]} : vector<8x96xf32> to vector<8x32xf32>
    %342 = vector.extract_strided_slice %340 {offsets = [0, 0], sizes = [8, 32], strides = [1, 1]} : vector<8x96xf32> to vector<8x32xf32>
    %343 = arith.addf %341, %342 : vector<8x32xf32>
    %344 = arith.negf %343 : vector<8x32xf32>
    %345 = math.exp %344 : vector<8x32xf32>
    %cst_84 = arith.constant 1.000000e+00 : f32
    %346 = vector.broadcast %cst_84 : f32 to vector<8x32xf32>
    %347 = arith.addf %346, %345 : vector<8x32xf32>
    %348 = arith.divf %346, %347 : vector<8x32xf32>
    %349 = vector.extract_strided_slice %337 {offsets = [0, 32], sizes = [8, 32], strides = [1, 1]} : vector<8x96xf32> to vector<8x32xf32>
    %350 = vector.extract_strided_slice %340 {offsets = [0, 32], sizes = [8, 32], strides = [1, 1]} : vector<8x96xf32> to vector<8x32xf32>
    %351 = arith.addf %349, %350 : vector<8x32xf32>
    %352 = arith.negf %351 : vector<8x32xf32>
    %353 = math.exp %352 : vector<8x32xf32>
    %cst_85 = arith.constant 1.000000e+00 : f32
    %354 = vector.broadcast %cst_85 : f32 to vector<8x32xf32>
    %355 = arith.addf %354, %353 : vector<8x32xf32>
    %356 = arith.divf %354, %355 : vector<8x32xf32>
    %357 = vector.extract_strided_slice %337 {offsets = [0, 64], sizes = [8, 32], strides = [1, 1]} : vector<8x96xf32> to vector<8x32xf32>
    %358 = vector.extract_strided_slice %340 {offsets = [0, 64], sizes = [8, 32], strides = [1, 1]} : vector<8x96xf32> to vector<8x32xf32>
    %359 = arith.mulf %348, %358 : vector<8x32xf32>
    %360 = arith.addf %357, %359 : vector<8x32xf32>
    %361 = math.tanh %360 : vector<8x32xf32>
    %cst_86 = arith.constant 1.000000e+00 : f32
    %362 = vector.broadcast %cst_86 : f32 to vector<8x32xf32>
    %363 = arith.subf %362, %356 : vector<8x32xf32>
    %364 = arith.mulf %363, %361 : vector<8x32xf32>
    %365 = arith.mulf %356, %335 : vector<8x32xf32>
    %366 = arith.addf %364, %365 : vector<8x32xf32>
    %c16_87 = arith.constant 16 : index
    %c0_88 = arith.constant 0 : index
    %367 = vector.load %arg13[%c16_87, %c0_88] : memref<64x32xf32, #tpu.memory_space<vmem>>, vector<8x32xf32>
    tpu.vector_store %arg13[%c16_87, %c0_88], %366 {strides = array<i32>} : memref<64x32xf32, #tpu.memory_space<vmem>>, vector<8x32xf32>,
    %368 = vector.extract_strided_slice %269 {offsets = [24, 0], sizes = [8, 96], strides = [1, 1]} : vector<64x96xf32> to vector<8x96xf32>
    %cst_89 = arith.constant dense<0.000000e+00> : vector<8x96xf32>
    %369 = tpu.matmul %366, %271, %cst_89 {dimension_numbers = #tpu.dot_dimension_numbers<[1], [0], [0], [1], [0, 0, 1, 1], [], []>} : vector<8x32xf32>, vector<32x96xf32>, vector<8x96xf32> -> vector<8x96xf32>
    %370 = vector.broadcast %273 : vector<1x96xf32> to vector<8x96xf32>
    %371 = arith.addf %369, %370 : vector<8x96xf32>
    %372 = vector.extract_strided_slice %368 {offsets = [0, 0], sizes = [8, 32], strides = [1, 1]} : vector<8x96xf32> to vector<8x32xf32>
    %373 = vector.extract_strided_slice %371 {offsets = [0, 0], sizes = [8, 32], strides = [1, 1]} : vector<8x96xf32> to vector<8x32xf32>
    %374 = arith.addf %372, %373 : vector<8x32xf32>
    %375 = arith.negf %374 : vector<8x32xf32>
    %376 = math.exp %375 : vector<8x32xf32>
    %cst_90 = arith.constant 1.000000e+00 : f32
    %377 = vector.broadcast %cst_90 : f32 to vector<8x32xf32>
    %378 = arith.addf %377, %376 : vector<8x32xf32>
    %379 = arith.divf %377, %378 : vector<8x32xf32>
    %380 = vector.extract_strided_slice %368 {offsets = [0, 32], sizes = [8, 32], strides = [1, 1]} : vector<8x96xf32> to vector<8x32xf32>
    %381 = vector.extract_strided_slice %371 {offsets = [0, 32], sizes = [8, 32], strides = [1, 1]} : vector<8x96xf32> to vector<8x32xf32>
    %382 = arith.addf %380, %381 : vector<8x32xf32>
    %383 = arith.negf %382 : vector<8x32xf32>
    %384 = math.exp %383 : vector<8x32xf32>
    %cst_91 = arith.constant 1.000000e+00 : f32
    %385 = vector.broadcast %cst_91 : f32 to vector<8x32xf32>
    %386 = arith.addf %385, %384 : vector<8x32xf32>
    %387 = arith.divf %385, %386 : vector<8x32xf32>
    %388 = vector.extract_strided_slice %368 {offsets = [0, 64], sizes = [8, 32], strides = [1, 1]} : vector<8x96xf32> to vector<8x32xf32>
    %389 = vector.extract_strided_slice %371 {offsets = [0, 64], sizes = [8, 32], strides = [1, 1]} : vector<8x96xf32> to vector<8x32xf32>
    %390 = arith.mulf %379, %389 : vector<8x32xf32>
    %391 = arith.addf %388, %390 : vector<8x32xf32>
    %392 = math.tanh %391 : vector<8x32xf32>
    %cst_92 = arith.constant 1.000000e+00 : f32
    %393 = vector.broadcast %cst_92 : f32 to vector<8x32xf32>
    %394 = arith.subf %393, %387 : vector<8x32xf32>
    %395 = arith.mulf %394, %392 : vector<8x32xf32>
    %396 = arith.mulf %387, %366 : vector<8x32xf32>
    %397 = arith.addf %395, %396 : vector<8x32xf32>
    %c24_93 = arith.constant 24 : index
    %c0_94 = arith.constant 0 : index
    %398 = vector.load %arg13[%c24_93, %c0_94] : memref<64x32xf32, #tpu.memory_space<vmem>>, vector<8x32xf32>
    tpu.vector_store %arg13[%c24_93, %c0_94], %397 {strides = array<i32>} : memref<64x32xf32, #tpu.memory_space<vmem>>, vector<8x32xf32>,
    %399 = vector.extract_strided_slice %269 {offsets = [32, 0], sizes = [8, 96], strides = [1, 1]} : vector<64x96xf32> to vector<8x96xf32>
    %cst_95 = arith.constant dense<0.000000e+00> : vector<8x96xf32>
    %400 = tpu.matmul %397, %271, %cst_95 {dimension_numbers = #tpu.dot_dimension_numbers<[1], [0], [0], [1], [0, 0, 1, 1], [], []>} : vector<8x32xf32>, vector<32x96xf32>, vector<8x96xf32> -> vector<8x96xf32>
    %401 = vector.broadcast %273 : vector<1x96xf32> to vector<8x96xf32>
    %402 = arith.addf %400, %401 : vector<8x96xf32>
    %403 = vector.extract_strided_slice %399 {offsets = [0, 0], sizes = [8, 32], strides = [1, 1]} : vector<8x96xf32> to vector<8x32xf32>
    %404 = vector.extract_strided_slice %402 {offsets = [0, 0], sizes = [8, 32], strides = [1, 1]} : vector<8x96xf32> to vector<8x32xf32>
    %405 = arith.addf %403, %404 : vector<8x32xf32>
    %406 = arith.negf %405 : vector<8x32xf32>
    %407 = math.exp %406 : vector<8x32xf32>
    %cst_96 = arith.constant 1.000000e+00 : f32
    %408 = vector.broadcast %cst_96 : f32 to vector<8x32xf32>
    %409 = arith.addf %408, %407 : vector<8x32xf32>
    %410 = arith.divf %408, %409 : vector<8x32xf32>
    %411 = vector.extract_strided_slice %399 {offsets = [0, 32], sizes = [8, 32], strides = [1, 1]} : vector<8x96xf32> to vector<8x32xf32>
    %412 = vector.extract_strided_slice %402 {offsets = [0, 32], sizes = [8, 32], strides = [1, 1]} : vector<8x96xf32> to vector<8x32xf32>
    %413 = arith.addf %411, %412 : vector<8x32xf32>
    %414 = arith.negf %413 : vector<8x32xf32>
    %415 = math.exp %414 : vector<8x32xf32>
    %cst_97 = arith.constant 1.000000e+00 : f32
    %416 = vector.broadcast %cst_97 : f32 to vector<8x32xf32>
    %417 = arith.addf %416, %415 : vector<8x32xf32>
    %418 = arith.divf %416, %417 : vector<8x32xf32>
    %419 = vector.extract_strided_slice %399 {offsets = [0, 64], sizes = [8, 32], strides = [1, 1]} : vector<8x96xf32> to vector<8x32xf32>
    %420 = vector.extract_strided_slice %402 {offsets = [0, 64], sizes = [8, 32], strides = [1, 1]} : vector<8x96xf32> to vector<8x32xf32>
    %421 = arith.mulf %410, %420 : vector<8x32xf32>
    %422 = arith.addf %419, %421 : vector<8x32xf32>
    %423 = math.tanh %422 : vector<8x32xf32>
    %cst_98 = arith.constant 1.000000e+00 : f32
    %424 = vector.broadcast %cst_98 : f32 to vector<8x32xf32>
    %425 = arith.subf %424, %418 : vector<8x32xf32>
    %426 = arith.mulf %425, %423 : vector<8x32xf32>
    %427 = arith.mulf %418, %397 : vector<8x32xf32>
    %428 = arith.addf %426, %427 : vector<8x32xf32>
    %c32_99 = arith.constant 32 : index
    %c0_100 = arith.constant 0 : index
    %429 = vector.load %arg13[%c32_99, %c0_100] : memref<64x32xf32, #tpu.memory_space<vmem>>, vector<8x32xf32>
    tpu.vector_store %arg13[%c32_99, %c0_100], %428 {strides = array<i32>} : memref<64x32xf32, #tpu.memory_space<vmem>>, vector<8x32xf32>,
    %430 = vector.extract_strided_slice %269 {offsets = [40, 0], sizes = [8, 96], strides = [1, 1]} : vector<64x96xf32> to vector<8x96xf32>
    %cst_101 = arith.constant dense<0.000000e+00> : vector<8x96xf32>
    %431 = tpu.matmul %428, %271, %cst_101 {dimension_numbers = #tpu.dot_dimension_numbers<[1], [0], [0], [1], [0, 0, 1, 1], [], []>} : vector<8x32xf32>, vector<32x96xf32>, vector<8x96xf32> -> vector<8x96xf32>
    %432 = vector.broadcast %273 : vector<1x96xf32> to vector<8x96xf32>
    %433 = arith.addf %431, %432 : vector<8x96xf32>
    %434 = vector.extract_strided_slice %430 {offsets = [0, 0], sizes = [8, 32], strides = [1, 1]} : vector<8x96xf32> to vector<8x32xf32>
    %435 = vector.extract_strided_slice %433 {offsets = [0, 0], sizes = [8, 32], strides = [1, 1]} : vector<8x96xf32> to vector<8x32xf32>
    %436 = arith.addf %434, %435 : vector<8x32xf32>
    %437 = arith.negf %436 : vector<8x32xf32>
    %438 = math.exp %437 : vector<8x32xf32>
    %cst_102 = arith.constant 1.000000e+00 : f32
    %439 = vector.broadcast %cst_102 : f32 to vector<8x32xf32>
    %440 = arith.addf %439, %438 : vector<8x32xf32>
    %441 = arith.divf %439, %440 : vector<8x32xf32>
    %442 = vector.extract_strided_slice %430 {offsets = [0, 32], sizes = [8, 32], strides = [1, 1]} : vector<8x96xf32> to vector<8x32xf32>
    %443 = vector.extract_strided_slice %433 {offsets = [0, 32], sizes = [8, 32], strides = [1, 1]} : vector<8x96xf32> to vector<8x32xf32>
    %444 = arith.addf %442, %443 : vector<8x32xf32>
    %445 = arith.negf %444 : vector<8x32xf32>
    %446 = math.exp %445 : vector<8x32xf32>
    %cst_103 = arith.constant 1.000000e+00 : f32
    %447 = vector.broadcast %cst_103 : f32 to vector<8x32xf32>
    %448 = arith.addf %447, %446 : vector<8x32xf32>
    %449 = arith.divf %447, %448 : vector<8x32xf32>
    %450 = vector.extract_strided_slice %430 {offsets = [0, 64], sizes = [8, 32], strides = [1, 1]} : vector<8x96xf32> to vector<8x32xf32>
    %451 = vector.extract_strided_slice %433 {offsets = [0, 64], sizes = [8, 32], strides = [1, 1]} : vector<8x96xf32> to vector<8x32xf32>
    %452 = arith.mulf %441, %451 : vector<8x32xf32>
    %453 = arith.addf %450, %452 : vector<8x32xf32>
    %454 = math.tanh %453 : vector<8x32xf32>
    %cst_104 = arith.constant 1.000000e+00 : f32
    %455 = vector.broadcast %cst_104 : f32 to vector<8x32xf32>
    %456 = arith.subf %455, %449 : vector<8x32xf32>
    %457 = arith.mulf %456, %454 : vector<8x32xf32>
    %458 = arith.mulf %449, %428 : vector<8x32xf32>
    %459 = arith.addf %457, %458 : vector<8x32xf32>
    %c40_105 = arith.constant 40 : index
    %c0_106 = arith.constant 0 : index
    %460 = vector.load %arg13[%c40_105, %c0_106] : memref<64x32xf32, #tpu.memory_space<vmem>>, vector<8x32xf32>
    tpu.vector_store %arg13[%c40_105, %c0_106], %459 {strides = array<i32>} : memref<64x32xf32, #tpu.memory_space<vmem>>, vector<8x32xf32>,
    %461 = vector.extract_strided_slice %269 {offsets = [48, 0], sizes = [8, 96], strides = [1, 1]} : vector<64x96xf32> to vector<8x96xf32>
    %cst_107 = arith.constant dense<0.000000e+00> : vector<8x96xf32>
    %462 = tpu.matmul %459, %271, %cst_107 {dimension_numbers = #tpu.dot_dimension_numbers<[1], [0], [0], [1], [0, 0, 1, 1], [], []>} : vector<8x32xf32>, vector<32x96xf32>, vector<8x96xf32> -> vector<8x96xf32>
    %463 = vector.broadcast %273 : vector<1x96xf32> to vector<8x96xf32>
    %464 = arith.addf %462, %463 : vector<8x96xf32>
    %465 = vector.extract_strided_slice %461 {offsets = [0, 0], sizes = [8, 32], strides = [1, 1]} : vector<8x96xf32> to vector<8x32xf32>
    %466 = vector.extract_strided_slice %464 {offsets = [0, 0], sizes = [8, 32], strides = [1, 1]} : vector<8x96xf32> to vector<8x32xf32>
    %467 = arith.addf %465, %466 : vector<8x32xf32>
    %468 = arith.negf %467 : vector<8x32xf32>
    %469 = math.exp %468 : vector<8x32xf32>
    %cst_108 = arith.constant 1.000000e+00 : f32
    %470 = vector.broadcast %cst_108 : f32 to vector<8x32xf32>
    %471 = arith.addf %470, %469 : vector<8x32xf32>
    %472 = arith.divf %470, %471 : vector<8x32xf32>
    %473 = vector.extract_strided_slice %461 {offsets = [0, 32], sizes = [8, 32], strides = [1, 1]} : vector<8x96xf32> to vector<8x32xf32>
    %474 = vector.extract_strided_slice %464 {offsets = [0, 32], sizes = [8, 32], strides = [1, 1]} : vector<8x96xf32> to vector<8x32xf32>
    %475 = arith.addf %473, %474 : vector<8x32xf32>
    %476 = arith.negf %475 : vector<8x32xf32>
    %477 = math.exp %476 : vector<8x32xf32>
    %cst_109 = arith.constant 1.000000e+00 : f32
    %478 = vector.broadcast %cst_109 : f32 to vector<8x32xf32>
    %479 = arith.addf %478, %477 : vector<8x32xf32>
    %480 = arith.divf %478, %479 : vector<8x32xf32>
    %481 = vector.extract_strided_slice %461 {offsets = [0, 64], sizes = [8, 32], strides = [1, 1]} : vector<8x96xf32> to vector<8x32xf32>
    %482 = vector.extract_strided_slice %464 {offsets = [0, 64], sizes = [8, 32], strides = [1, 1]} : vector<8x96xf32> to vector<8x32xf32>
    %483 = arith.mulf %472, %482 : vector<8x32xf32>
    %484 = arith.addf %481, %483 : vector<8x32xf32>
    %485 = math.tanh %484 : vector<8x32xf32>
    %cst_110 = arith.constant 1.000000e+00 : f32
    %486 = vector.broadcast %cst_110 : f32 to vector<8x32xf32>
    %487 = arith.subf %486, %480 : vector<8x32xf32>
    %488 = arith.mulf %487, %485 : vector<8x32xf32>
    %489 = arith.mulf %480, %459 : vector<8x32xf32>
    %490 = arith.addf %488, %489 : vector<8x32xf32>
    %c48_111 = arith.constant 48 : index
    %c0_112 = arith.constant 0 : index
    %491 = vector.load %arg13[%c48_111, %c0_112] : memref<64x32xf32, #tpu.memory_space<vmem>>, vector<8x32xf32>
    tpu.vector_store %arg13[%c48_111, %c0_112], %490 {strides = array<i32>} : memref<64x32xf32, #tpu.memory_space<vmem>>, vector<8x32xf32>,
    %492 = vector.extract_strided_slice %269 {offsets = [56, 0], sizes = [8, 96], strides = [1, 1]} : vector<64x96xf32> to vector<8x96xf32>
    %cst_113 = arith.constant dense<0.000000e+00> : vector<8x96xf32>
    %493 = tpu.matmul %490, %271, %cst_113 {dimension_numbers = #tpu.dot_dimension_numbers<[1], [0], [0], [1], [0, 0, 1, 1], [], []>} : vector<8x32xf32>, vector<32x96xf32>, vector<8x96xf32> -> vector<8x96xf32>
    %494 = vector.broadcast %273 : vector<1x96xf32> to vector<8x96xf32>
    %495 = arith.addf %493, %494 : vector<8x96xf32>
    %496 = vector.extract_strided_slice %492 {offsets = [0, 0], sizes = [8, 32], strides = [1, 1]} : vector<8x96xf32> to vector<8x32xf32>
    %497 = vector.extract_strided_slice %495 {offsets = [0, 0], sizes = [8, 32], strides = [1, 1]} : vector<8x96xf32> to vector<8x32xf32>
    %498 = arith.addf %496, %497 : vector<8x32xf32>
    %499 = arith.negf %498 : vector<8x32xf32>
    %500 = math.exp %499 : vector<8x32xf32>
    %cst_114 = arith.constant 1.000000e+00 : f32
    %501 = vector.broadcast %cst_114 : f32 to vector<8x32xf32>
    %502 = arith.addf %501, %500 : vector<8x32xf32>
    %503 = arith.divf %501, %502 : vector<8x32xf32>
    %504 = vector.extract_strided_slice %492 {offsets = [0, 32], sizes = [8, 32], strides = [1, 1]} : vector<8x96xf32> to vector<8x32xf32>
    %505 = vector.extract_strided_slice %495 {offsets = [0, 32], sizes = [8, 32], strides = [1, 1]} : vector<8x96xf32> to vector<8x32xf32>
    %506 = arith.addf %504, %505 : vector<8x32xf32>
    %507 = arith.negf %506 : vector<8x32xf32>
    %508 = math.exp %507 : vector<8x32xf32>
    %cst_115 = arith.constant 1.000000e+00 : f32
    %509 = vector.broadcast %cst_115 : f32 to vector<8x32xf32>
    %510 = arith.addf %509, %508 : vector<8x32xf32>
    %511 = arith.divf %509, %510 : vector<8x32xf32>
    %512 = vector.extract_strided_slice %492 {offsets = [0, 64], sizes = [8, 32], strides = [1, 1]} : vector<8x96xf32> to vector<8x32xf32>
    %513 = vector.extract_strided_slice %495 {offsets = [0, 64], sizes = [8, 32], strides = [1, 1]} : vector<8x96xf32> to vector<8x32xf32>
    %514 = arith.mulf %503, %513 : vector<8x32xf32>
    %515 = arith.addf %512, %514 : vector<8x32xf32>
    %516 = math.tanh %515 : vector<8x32xf32>
    %cst_116 = arith.constant 1.000000e+00 : f32
    %517 = vector.broadcast %cst_116 : f32 to vector<8x32xf32>
    %518 = arith.subf %517, %511 : vector<8x32xf32>
    %519 = arith.mulf %518, %516 : vector<8x32xf32>
    %520 = arith.mulf %511, %490 : vector<8x32xf32>
    %521 = arith.addf %519, %520 : vector<8x32xf32>
    %c56_117 = arith.constant 56 : index
    %c0_118 = arith.constant 0 : index
    %522 = vector.load %arg13[%c56_117, %c0_118] : memref<64x32xf32, #tpu.memory_space<vmem>>, vector<8x32xf32>
    tpu.vector_store %arg13[%c56_117, %c0_118], %521 {strides = array<i32>} : memref<64x32xf32, #tpu.memory_space<vmem>>, vector<8x32xf32>,
    %c0_119 = arith.constant 0 : index
    %c0_120 = arith.constant 0 : index
    %523 = vector.load %arg13[%c0_119, %c0_120] : memref<64x32xf32, #tpu.memory_space<vmem>>, vector<64x32xf32>
    %c2 = arith.constant 2 : index
    %c0_121 = arith.constant 0 : index
    %c0_122 = arith.constant 0 : index
    %524 = vector.load %arg2[%c2, %c0_121, %c0_122] : memref<3x32x96xf32, #tpu.memory_space<vmem>>, vector<1x32x96xf32>
    %525 = vector.shape_cast %524 : vector<1x32x96xf32> to vector<32x96xf32>
    %cst_123 = arith.constant dense<0.000000e+00> : vector<64x96xf32>
    %526 = tpu.matmul %523, %525, %cst_123 {dimension_numbers = #tpu.dot_dimension_numbers<[1], [0], [0], [1], [0, 0, 1, 1], [], []>} : vector<64x32xf32>, vector<32x96xf32>, vector<64x96xf32> -> vector<64x96xf32>
    %c2_124 = arith.constant 2 : index
    %c0_125 = arith.constant 0 : index
    %c0_126 = arith.constant 0 : index
    %527 = vector.load %arg4[%c2_124, %c0_125, %c0_126] : memref<3x1x96xf32, #tpu.memory_space<vmem>>, vector<1x1x96xf32>
    %528 = vector.shape_cast %527 : vector<1x1x96xf32> to vector<1x96xf32>
    %529 = vector.broadcast %528 : vector<1x96xf32> to vector<64x96xf32>
    %530 = arith.addf %526, %529 : vector<64x96xf32>
    %c2_127 = arith.constant 2 : index
    %c0_128 = arith.constant 0 : index
    %c0_129 = arith.constant 0 : index
    %531 = vector.load %arg3[%c2_127, %c0_128, %c0_129] : memref<3x32x96xf32, #tpu.memory_space<vmem>>, vector<1x32x96xf32>
    %532 = vector.shape_cast %531 : vector<1x32x96xf32> to vector<32x96xf32>
    %c2_130 = arith.constant 2 : index
    %c0_131 = arith.constant 0 : index
    %c0_132 = arith.constant 0 : index
    %533 = vector.load %arg5[%c2_130, %c0_131, %c0_132] : memref<3x1x96xf32, #tpu.memory_space<vmem>>, vector<1x1x96xf32>
    %534 = vector.shape_cast %533 : vector<1x1x96xf32> to vector<1x96xf32>
    %cst_133 = arith.constant 0.000000e+00 : f32
    %535 = vector.broadcast %cst_133 : f32 to vector<8x32xf32>
    %536 = vector.extract_strided_slice %530 {offsets = [0, 0], sizes = [8, 96], strides = [1, 1]} : vector<64x96xf32> to vector<8x96xf32>
    %cst_134 = arith.constant dense<0.000000e+00> : vector<8x96xf32>
    %537 = tpu.matmul %535, %532, %cst_134 {dimension_numbers = #tpu.dot_dimension_numbers<[1], [0], [0], [1], [0, 0, 1, 1], [], []>} : vector<8x32xf32>, vector<32x96xf32>, vector<8x96xf32> -> vector<8x96xf32>
    %538 = vector.broadcast %534 : vector<1x96xf32> to vector<8x96xf32>
    %539 = arith.addf %537, %538 : vector<8x96xf32>
    %540 = vector.extract_strided_slice %536 {offsets = [0, 0], sizes = [8, 32], strides = [1, 1]} : vector<8x96xf32> to vector<8x32xf32>
    %541 = vector.extract_strided_slice %539 {offsets = [0, 0], sizes = [8, 32], strides = [1, 1]} : vector<8x96xf32> to vector<8x32xf32>
    %542 = arith.addf %540, %541 : vector<8x32xf32>
    %543 = arith.negf %542 : vector<8x32xf32>
    %544 = math.exp %543 : vector<8x32xf32>
    %cst_135 = arith.constant 1.000000e+00 : f32
    %545 = vector.broadcast %cst_135 : f32 to vector<8x32xf32>
    %546 = arith.addf %545, %544 : vector<8x32xf32>
    %547 = arith.divf %545, %546 : vector<8x32xf32>
    %548 = vector.extract_strided_slice %536 {offsets = [0, 32], sizes = [8, 32], strides = [1, 1]} : vector<8x96xf32> to vector<8x32xf32>
    %549 = vector.extract_strided_slice %539 {offsets = [0, 32], sizes = [8, 32], strides = [1, 1]} : vector<8x96xf32> to vector<8x32xf32>
    %550 = arith.addf %548, %549 : vector<8x32xf32>
    %551 = arith.negf %550 : vector<8x32xf32>
    %552 = math.exp %551 : vector<8x32xf32>
    %cst_136 = arith.constant 1.000000e+00 : f32
    %553 = vector.broadcast %cst_136 : f32 to vector<8x32xf32>
    %554 = arith.addf %553, %552 : vector<8x32xf32>
    %555 = arith.divf %553, %554 : vector<8x32xf32>
    %556 = vector.extract_strided_slice %536 {offsets = [0, 64], sizes = [8, 32], strides = [1, 1]} : vector<8x96xf32> to vector<8x32xf32>
    %557 = vector.extract_strided_slice %539 {offsets = [0, 64], sizes = [8, 32], strides = [1, 1]} : vector<8x96xf32> to vector<8x32xf32>
    %558 = arith.mulf %547, %557 : vector<8x32xf32>
    %559 = arith.addf %556, %558 : vector<8x32xf32>
    %560 = math.tanh %559 : vector<8x32xf32>
    %cst_137 = arith.constant 1.000000e+00 : f32
    %561 = vector.broadcast %cst_137 : f32 to vector<8x32xf32>
    %562 = arith.subf %561, %555 : vector<8x32xf32>
    %563 = arith.mulf %562, %560 : vector<8x32xf32>
    %564 = arith.mulf %555, %535 : vector<8x32xf32>
    %565 = arith.addf %563, %564 : vector<8x32xf32>
    %566 = vector.extract_strided_slice %530 {offsets = [8, 0], sizes = [8, 96], strides = [1, 1]} : vector<64x96xf32> to vector<8x96xf32>
    %cst_138 = arith.constant dense<0.000000e+00> : vector<8x96xf32>
    %567 = tpu.matmul %565, %532, %cst_138 {dimension_numbers = #tpu.dot_dimension_numbers<[1], [0], [0], [1], [0, 0, 1, 1], [], []>} : vector<8x32xf32>, vector<32x96xf32>, vector<8x96xf32> -> vector<8x96xf32>
    %568 = vector.broadcast %534 : vector<1x96xf32> to vector<8x96xf32>
    %569 = arith.addf %567, %568 : vector<8x96xf32>
    %570 = vector.extract_strided_slice %566 {offsets = [0, 0], sizes = [8, 32], strides = [1, 1]} : vector<8x96xf32> to vector<8x32xf32>
    %571 = vector.extract_strided_slice %569 {offsets = [0, 0], sizes = [8, 32], strides = [1, 1]} : vector<8x96xf32> to vector<8x32xf32>
    %572 = arith.addf %570, %571 : vector<8x32xf32>
    %573 = arith.negf %572 : vector<8x32xf32>
    %574 = math.exp %573 : vector<8x32xf32>
    %cst_139 = arith.constant 1.000000e+00 : f32
    %575 = vector.broadcast %cst_139 : f32 to vector<8x32xf32>
    %576 = arith.addf %575, %574 : vector<8x32xf32>
    %577 = arith.divf %575, %576 : vector<8x32xf32>
    %578 = vector.extract_strided_slice %566 {offsets = [0, 32], sizes = [8, 32], strides = [1, 1]} : vector<8x96xf32> to vector<8x32xf32>
    %579 = vector.extract_strided_slice %569 {offsets = [0, 32], sizes = [8, 32], strides = [1, 1]} : vector<8x96xf32> to vector<8x32xf32>
    %580 = arith.addf %578, %579 : vector<8x32xf32>
    %581 = arith.negf %580 : vector<8x32xf32>
    %582 = math.exp %581 : vector<8x32xf32>
    %cst_140 = arith.constant 1.000000e+00 : f32
    %583 = vector.broadcast %cst_140 : f32 to vector<8x32xf32>
    %584 = arith.addf %583, %582 : vector<8x32xf32>
    %585 = arith.divf %583, %584 : vector<8x32xf32>
    %586 = vector.extract_strided_slice %566 {offsets = [0, 64], sizes = [8, 32], strides = [1, 1]} : vector<8x96xf32> to vector<8x32xf32>
    %587 = vector.extract_strided_slice %569 {offsets = [0, 64], sizes = [8, 32], strides = [1, 1]} : vector<8x96xf32> to vector<8x32xf32>
    %588 = arith.mulf %577, %587 : vector<8x32xf32>
    %589 = arith.addf %586, %588 : vector<8x32xf32>
    %590 = math.tanh %589 : vector<8x32xf32>
    %cst_141 = arith.constant 1.000000e+00 : f32
    %591 = vector.broadcast %cst_141 : f32 to vector<8x32xf32>
    %592 = arith.subf %591, %585 : vector<8x32xf32>
    %593 = arith.mulf %592, %590 : vector<8x32xf32>
    %594 = arith.mulf %585, %565 : vector<8x32xf32>
    %595 = arith.addf %593, %594 : vector<8x32xf32>
    %596 = vector.extract_strided_slice %530 {offsets = [16, 0], sizes = [8, 96], strides = [1, 1]} : vector<64x96xf32> to vector<8x96xf32>
    %cst_142 = arith.constant dense<0.000000e+00> : vector<8x96xf32>
    %597 = tpu.matmul %595, %532, %cst_142 {dimension_numbers = #tpu.dot_dimension_numbers<[1], [0], [0], [1], [0, 0, 1, 1], [], []>} : vector<8x32xf32>, vector<32x96xf32>, vector<8x96xf32> -> vector<8x96xf32>
    %598 = vector.broadcast %534 : vector<1x96xf32> to vector<8x96xf32>
    %599 = arith.addf %597, %598 : vector<8x96xf32>
    %600 = vector.extract_strided_slice %596 {offsets = [0, 0], sizes = [8, 32], strides = [1, 1]} : vector<8x96xf32> to vector<8x32xf32>
    %601 = vector.extract_strided_slice %599 {offsets = [0, 0], sizes = [8, 32], strides = [1, 1]} : vector<8x96xf32> to vector<8x32xf32>
    %602 = arith.addf %600, %601 : vector<8x32xf32>
    %603 = arith.negf %602 : vector<8x32xf32>
    %604 = math.exp %603 : vector<8x32xf32>
    %cst_143 = arith.constant 1.000000e+00 : f32
    %605 = vector.broadcast %cst_143 : f32 to vector<8x32xf32>
    %606 = arith.addf %605, %604 : vector<8x32xf32>
    %607 = arith.divf %605, %606 : vector<8x32xf32>
    %608 = vector.extract_strided_slice %596 {offsets = [0, 32], sizes = [8, 32], strides = [1, 1]} : vector<8x96xf32> to vector<8x32xf32>
    %609 = vector.extract_strided_slice %599 {offsets = [0, 32], sizes = [8, 32], strides = [1, 1]} : vector<8x96xf32> to vector<8x32xf32>
    %610 = arith.addf %608, %609 : vector<8x32xf32>
    %611 = arith.negf %610 : vector<8x32xf32>
    %612 = math.exp %611 : vector<8x32xf32>
    %cst_144 = arith.constant 1.000000e+00 : f32
    %613 = vector.broadcast %cst_144 : f32 to vector<8x32xf32>
    %614 = arith.addf %613, %612 : vector<8x32xf32>
    %615 = arith.divf %613, %614 : vector<8x32xf32>
    %616 = vector.extract_strided_slice %596 {offsets = [0, 64], sizes = [8, 32], strides = [1, 1]} : vector<8x96xf32> to vector<8x32xf32>
    %617 = vector.extract_strided_slice %599 {offsets = [0, 64], sizes = [8, 32], strides = [1, 1]} : vector<8x96xf32> to vector<8x32xf32>
    %618 = arith.mulf %607, %617 : vector<8x32xf32>
    %619 = arith.addf %616, %618 : vector<8x32xf32>
    %620 = math.tanh %619 : vector<8x32xf32>
    %cst_145 = arith.constant 1.000000e+00 : f32
    %621 = vector.broadcast %cst_145 : f32 to vector<8x32xf32>
    %622 = arith.subf %621, %615 : vector<8x32xf32>
    %623 = arith.mulf %622, %620 : vector<8x32xf32>
    %624 = arith.mulf %615, %595 : vector<8x32xf32>
    %625 = arith.addf %623, %624 : vector<8x32xf32>
    %626 = vector.extract_strided_slice %530 {offsets = [24, 0], sizes = [8, 96], strides = [1, 1]} : vector<64x96xf32> to vector<8x96xf32>
    %cst_146 = arith.constant dense<0.000000e+00> : vector<8x96xf32>
    %627 = tpu.matmul %625, %532, %cst_146 {dimension_numbers = #tpu.dot_dimension_numbers<[1], [0], [0], [1], [0, 0, 1, 1], [], []>} : vector<8x32xf32>, vector<32x96xf32>, vector<8x96xf32> -> vector<8x96xf32>
    %628 = vector.broadcast %534 : vector<1x96xf32> to vector<8x96xf32>
    %629 = arith.addf %627, %628 : vector<8x96xf32>
    %630 = vector.extract_strided_slice %626 {offsets = [0, 0], sizes = [8, 32], strides = [1, 1]} : vector<8x96xf32> to vector<8x32xf32>
    %631 = vector.extract_strided_slice %629 {offsets = [0, 0], sizes = [8, 32], strides = [1, 1]} : vector<8x96xf32> to vector<8x32xf32>
    %632 = arith.addf %630, %631 : vector<8x32xf32>
    %633 = arith.negf %632 : vector<8x32xf32>
    %634 = math.exp %633 : vector<8x32xf32>
    %cst_147 = arith.constant 1.000000e+00 : f32
    %635 = vector.broadcast %cst_147 : f32 to vector<8x32xf32>
    %636 = arith.addf %635, %634 : vector<8x32xf32>
    %637 = arith.divf %635, %636 : vector<8x32xf32>
    %638 = vector.extract_strided_slice %626 {offsets = [0, 32], sizes = [8, 32], strides = [1, 1]} : vector<8x96xf32> to vector<8x32xf32>
    %639 = vector.extract_strided_slice %629 {offsets = [0, 32], sizes = [8, 32], strides = [1, 1]} : vector<8x96xf32> to vector<8x32xf32>
    %640 = arith.addf %638, %639 : vector<8x32xf32>
    %641 = arith.negf %640 : vector<8x32xf32>
    %642 = math.exp %641 : vector<8x32xf32>
    %cst_148 = arith.constant 1.000000e+00 : f32
    %643 = vector.broadcast %cst_148 : f32 to vector<8x32xf32>
    %644 = arith.addf %643, %642 : vector<8x32xf32>
    %645 = arith.divf %643, %644 : vector<8x32xf32>
    %646 = vector.extract_strided_slice %626 {offsets = [0, 64], sizes = [8, 32], strides = [1, 1]} : vector<8x96xf32> to vector<8x32xf32>
    %647 = vector.extract_strided_slice %629 {offsets = [0, 64], sizes = [8, 32], strides = [1, 1]} : vector<8x96xf32> to vector<8x32xf32>
    %648 = arith.mulf %637, %647 : vector<8x32xf32>
    %649 = arith.addf %646, %648 : vector<8x32xf32>
    %650 = math.tanh %649 : vector<8x32xf32>
    %cst_149 = arith.constant 1.000000e+00 : f32
    %651 = vector.broadcast %cst_149 : f32 to vector<8x32xf32>
    %652 = arith.subf %651, %645 : vector<8x32xf32>
    %653 = arith.mulf %652, %650 : vector<8x32xf32>
    %654 = arith.mulf %645, %625 : vector<8x32xf32>
    %655 = arith.addf %653, %654 : vector<8x32xf32>
    %656 = vector.extract_strided_slice %530 {offsets = [32, 0], sizes = [8, 96], strides = [1, 1]} : vector<64x96xf32> to vector<8x96xf32>
    %cst_150 = arith.constant dense<0.000000e+00> : vector<8x96xf32>
    %657 = tpu.matmul %655, %532, %cst_150 {dimension_numbers = #tpu.dot_dimension_numbers<[1], [0], [0], [1], [0, 0, 1, 1], [], []>} : vector<8x32xf32>, vector<32x96xf32>, vector<8x96xf32> -> vector<8x96xf32>
    %658 = vector.broadcast %534 : vector<1x96xf32> to vector<8x96xf32>
    %659 = arith.addf %657, %658 : vector<8x96xf32>
    %660 = vector.extract_strided_slice %656 {offsets = [0, 0], sizes = [8, 32], strides = [1, 1]} : vector<8x96xf32> to vector<8x32xf32>
    %661 = vector.extract_strided_slice %659 {offsets = [0, 0], sizes = [8, 32], strides = [1, 1]} : vector<8x96xf32> to vector<8x32xf32>
    %662 = arith.addf %660, %661 : vector<8x32xf32>
    %663 = arith.negf %662 : vector<8x32xf32>
    %664 = math.exp %663 : vector<8x32xf32>
    %cst_151 = arith.constant 1.000000e+00 : f32
    %665 = vector.broadcast %cst_151 : f32 to vector<8x32xf32>
    %666 = arith.addf %665, %664 : vector<8x32xf32>
    %667 = arith.divf %665, %666 : vector<8x32xf32>
    %668 = vector.extract_strided_slice %656 {offsets = [0, 32], sizes = [8, 32], strides = [1, 1]} : vector<8x96xf32> to vector<8x32xf32>
    %669 = vector.extract_strided_slice %659 {offsets = [0, 32], sizes = [8, 32], strides = [1, 1]} : vector<8x96xf32> to vector<8x32xf32>
    %670 = arith.addf %668, %669 : vector<8x32xf32>
    %671 = arith.negf %670 : vector<8x32xf32>
    %672 = math.exp %671 : vector<8x32xf32>
    %cst_152 = arith.constant 1.000000e+00 : f32
    %673 = vector.broadcast %cst_152 : f32 to vector<8x32xf32>
    %674 = arith.addf %673, %672 : vector<8x32xf32>
    %675 = arith.divf %673, %674 : vector<8x32xf32>
    %676 = vector.extract_strided_slice %656 {offsets = [0, 64], sizes = [8, 32], strides = [1, 1]} : vector<8x96xf32> to vector<8x32xf32>
    %677 = vector.extract_strided_slice %659 {offsets = [0, 64], sizes = [8, 32], strides = [1, 1]} : vector<8x96xf32> to vector<8x32xf32>
    %678 = arith.mulf %667, %677 : vector<8x32xf32>
    %679 = arith.addf %676, %678 : vector<8x32xf32>
    %680 = math.tanh %679 : vector<8x32xf32>
    %cst_153 = arith.constant 1.000000e+00 : f32
    %681 = vector.broadcast %cst_153 : f32 to vector<8x32xf32>
    %682 = arith.subf %681, %675 : vector<8x32xf32>
    %683 = arith.mulf %682, %680 : vector<8x32xf32>
    %684 = arith.mulf %675, %655 : vector<8x32xf32>
    %685 = arith.addf %683, %684 : vector<8x32xf32>
    %686 = vector.extract_strided_slice %530 {offsets = [40, 0], sizes = [8, 96], strides = [1, 1]} : vector<64x96xf32> to vector<8x96xf32>
    %cst_154 = arith.constant dense<0.000000e+00> : vector<8x96xf32>
    %687 = tpu.matmul %685, %532, %cst_154 {dimension_numbers = #tpu.dot_dimension_numbers<[1], [0], [0], [1], [0, 0, 1, 1], [], []>} : vector<8x32xf32>, vector<32x96xf32>, vector<8x96xf32> -> vector<8x96xf32>
    %688 = vector.broadcast %534 : vector<1x96xf32> to vector<8x96xf32>
    %689 = arith.addf %687, %688 : vector<8x96xf32>
    %690 = vector.extract_strided_slice %686 {offsets = [0, 0], sizes = [8, 32], strides = [1, 1]} : vector<8x96xf32> to vector<8x32xf32>
    %691 = vector.extract_strided_slice %689 {offsets = [0, 0], sizes = [8, 32], strides = [1, 1]} : vector<8x96xf32> to vector<8x32xf32>
    %692 = arith.addf %690, %691 : vector<8x32xf32>
    %693 = arith.negf %692 : vector<8x32xf32>
    %694 = math.exp %693 : vector<8x32xf32>
    %cst_155 = arith.constant 1.000000e+00 : f32
    %695 = vector.broadcast %cst_155 : f32 to vector<8x32xf32>
    %696 = arith.addf %695, %694 : vector<8x32xf32>
    %697 = arith.divf %695, %696 : vector<8x32xf32>
    %698 = vector.extract_strided_slice %686 {offsets = [0, 32], sizes = [8, 32], strides = [1, 1]} : vector<8x96xf32> to vector<8x32xf32>
    %699 = vector.extract_strided_slice %689 {offsets = [0, 32], sizes = [8, 32], strides = [1, 1]} : vector<8x96xf32> to vector<8x32xf32>
    %700 = arith.addf %698, %699 : vector<8x32xf32>
    %701 = arith.negf %700 : vector<8x32xf32>
    %702 = math.exp %701 : vector<8x32xf32>
    %cst_156 = arith.constant 1.000000e+00 : f32
    %703 = vector.broadcast %cst_156 : f32 to vector<8x32xf32>
    %704 = arith.addf %703, %702 : vector<8x32xf32>
    %705 = arith.divf %703, %704 : vector<8x32xf32>
    %706 = vector.extract_strided_slice %686 {offsets = [0, 64], sizes = [8, 32], strides = [1, 1]} : vector<8x96xf32> to vector<8x32xf32>
    %707 = vector.extract_strided_slice %689 {offsets = [0, 64], sizes = [8, 32], strides = [1, 1]} : vector<8x96xf32> to vector<8x32xf32>
    %708 = arith.mulf %697, %707 : vector<8x32xf32>
    %709 = arith.addf %706, %708 : vector<8x32xf32>
    %710 = math.tanh %709 : vector<8x32xf32>
    %cst_157 = arith.constant 1.000000e+00 : f32
    %711 = vector.broadcast %cst_157 : f32 to vector<8x32xf32>
    %712 = arith.subf %711, %705 : vector<8x32xf32>
    %713 = arith.mulf %712, %710 : vector<8x32xf32>
    %714 = arith.mulf %705, %685 : vector<8x32xf32>
    %715 = arith.addf %713, %714 : vector<8x32xf32>
    %716 = vector.extract_strided_slice %530 {offsets = [48, 0], sizes = [8, 96], strides = [1, 1]} : vector<64x96xf32> to vector<8x96xf32>
    %cst_158 = arith.constant dense<0.000000e+00> : vector<8x96xf32>
    %717 = tpu.matmul %715, %532, %cst_158 {dimension_numbers = #tpu.dot_dimension_numbers<[1], [0], [0], [1], [0, 0, 1, 1], [], []>} : vector<8x32xf32>, vector<32x96xf32>, vector<8x96xf32> -> vector<8x96xf32>
    %718 = vector.broadcast %534 : vector<1x96xf32> to vector<8x96xf32>
    %719 = arith.addf %717, %718 : vector<8x96xf32>
    %720 = vector.extract_strided_slice %716 {offsets = [0, 0], sizes = [8, 32], strides = [1, 1]} : vector<8x96xf32> to vector<8x32xf32>
    %721 = vector.extract_strided_slice %719 {offsets = [0, 0], sizes = [8, 32], strides = [1, 1]} : vector<8x96xf32> to vector<8x32xf32>
    %722 = arith.addf %720, %721 : vector<8x32xf32>
    %723 = arith.negf %722 : vector<8x32xf32>
    %724 = math.exp %723 : vector<8x32xf32>
    %cst_159 = arith.constant 1.000000e+00 : f32
    %725 = vector.broadcast %cst_159 : f32 to vector<8x32xf32>
    %726 = arith.addf %725, %724 : vector<8x32xf32>
    %727 = arith.divf %725, %726 : vector<8x32xf32>
    %728 = vector.extract_strided_slice %716 {offsets = [0, 32], sizes = [8, 32], strides = [1, 1]} : vector<8x96xf32> to vector<8x32xf32>
    %729 = vector.extract_strided_slice %719 {offsets = [0, 32], sizes = [8, 32], strides = [1, 1]} : vector<8x96xf32> to vector<8x32xf32>
    %730 = arith.addf %728, %729 : vector<8x32xf32>
    %731 = arith.negf %730 : vector<8x32xf32>
    %732 = math.exp %731 : vector<8x32xf32>
    %cst_160 = arith.constant 1.000000e+00 : f32
    %733 = vector.broadcast %cst_160 : f32 to vector<8x32xf32>
    %734 = arith.addf %733, %732 : vector<8x32xf32>
    %735 = arith.divf %733, %734 : vector<8x32xf32>
    %736 = vector.extract_strided_slice %716 {offsets = [0, 64], sizes = [8, 32], strides = [1, 1]} : vector<8x96xf32> to vector<8x32xf32>
    %737 = vector.extract_strided_slice %719 {offsets = [0, 64], sizes = [8, 32], strides = [1, 1]} : vector<8x96xf32> to vector<8x32xf32>
    %738 = arith.mulf %727, %737 : vector<8x32xf32>
    %739 = arith.addf %736, %738 : vector<8x32xf32>
    %740 = math.tanh %739 : vector<8x32xf32>
    %cst_161 = arith.constant 1.000000e+00 : f32
    %741 = vector.broadcast %cst_161 : f32 to vector<8x32xf32>
    %742 = arith.subf %741, %735 : vector<8x32xf32>
    %743 = arith.mulf %742, %740 : vector<8x32xf32>
    %744 = arith.mulf %735, %715 : vector<8x32xf32>
    %745 = arith.addf %743, %744 : vector<8x32xf32>
    %746 = vector.extract_strided_slice %530 {offsets = [56, 0], sizes = [8, 96], strides = [1, 1]} : vector<64x96xf32> to vector<8x96xf32>
    %cst_162 = arith.constant dense<0.000000e+00> : vector<8x96xf32>
    %747 = tpu.matmul %745, %532, %cst_162 {dimension_numbers = #tpu.dot_dimension_numbers<[1], [0], [0], [1], [0, 0, 1, 1], [], []>} : vector<8x32xf32>, vector<32x96xf32>, vector<8x96xf32> -> vector<8x96xf32>
    %748 = vector.broadcast %534 : vector<1x96xf32> to vector<8x96xf32>
    %749 = arith.addf %747, %748 : vector<8x96xf32>
    %750 = vector.extract_strided_slice %746 {offsets = [0, 0], sizes = [8, 32], strides = [1, 1]} : vector<8x96xf32> to vector<8x32xf32>
    %751 = vector.extract_strided_slice %749 {offsets = [0, 0], sizes = [8, 32], strides = [1, 1]} : vector<8x96xf32> to vector<8x32xf32>
    %752 = arith.addf %750, %751 : vector<8x32xf32>
    %753 = arith.negf %752 : vector<8x32xf32>
    %754 = math.exp %753 : vector<8x32xf32>
    %cst_163 = arith.constant 1.000000e+00 : f32
    %755 = vector.broadcast %cst_163 : f32 to vector<8x32xf32>
    %756 = arith.addf %755, %754 : vector<8x32xf32>
    %757 = arith.divf %755, %756 : vector<8x32xf32>
    %758 = vector.extract_strided_slice %746 {offsets = [0, 32], sizes = [8, 32], strides = [1, 1]} : vector<8x96xf32> to vector<8x32xf32>
    %759 = vector.extract_strided_slice %749 {offsets = [0, 32], sizes = [8, 32], strides = [1, 1]} : vector<8x96xf32> to vector<8x32xf32>
    %760 = arith.addf %758, %759 : vector<8x32xf32>
    %761 = arith.negf %760 : vector<8x32xf32>
    %762 = math.exp %761 : vector<8x32xf32>
    %cst_164 = arith.constant 1.000000e+00 : f32
    %763 = vector.broadcast %cst_164 : f32 to vector<8x32xf32>
    %764 = arith.addf %763, %762 : vector<8x32xf32>
    %765 = arith.divf %763, %764 : vector<8x32xf32>
    %766 = vector.extract_strided_slice %746 {offsets = [0, 64], sizes = [8, 32], strides = [1, 1]} : vector<8x96xf32> to vector<8x32xf32>
    %767 = vector.extract_strided_slice %749 {offsets = [0, 64], sizes = [8, 32], strides = [1, 1]} : vector<8x96xf32> to vector<8x32xf32>
    %768 = arith.mulf %757, %767 : vector<8x32xf32>
    %769 = arith.addf %766, %768 : vector<8x32xf32>
    %770 = math.tanh %769 : vector<8x32xf32>
    %cst_165 = arith.constant 1.000000e+00 : f32
    %771 = vector.broadcast %cst_165 : f32 to vector<8x32xf32>
    %772 = arith.subf %771, %765 : vector<8x32xf32>
    %773 = arith.mulf %772, %770 : vector<8x32xf32>
    %774 = arith.mulf %765, %745 : vector<8x32xf32>
    %775 = arith.addf %773, %774 : vector<8x32xf32>
    %c0_166 = arith.constant 0 : index
    %c0_167 = arith.constant 0 : index
    %776 = vector.load %arg6[%c0_166, %c0_167] : memref<32x32xf32, #tpu.memory_space<vmem>>, vector<32x32xf32>
    %cst_168 = arith.constant dense<0.000000e+00> : vector<8x32xf32>
    %777 = tpu.matmul %775, %776, %cst_168 {dimension_numbers = #tpu.dot_dimension_numbers<[1], [0], [0], [1], [0, 0, 1, 1], [], []>} : vector<8x32xf32>, vector<32x32xf32>, vector<8x32xf32> -> vector<8x32xf32>
    %c0_169 = arith.constant 0 : index
    %c0_170 = arith.constant 0 : index
    %778 = vector.load %arg7[%c0_169, %c0_170] : memref<1x32xf32, #tpu.memory_space<vmem>>, vector<1x32xf32>
    %779 = vector.broadcast %778 : vector<1x32xf32> to vector<8x32xf32>
    %780 = arith.addf %777, %779 : vector<8x32xf32>
    %cst_171 = arith.constant 5.000000e-01 : f32
    %781 = vector.broadcast %cst_171 : f32 to vector<8x32xf32>
    %782 = arith.mulf %781, %780 : vector<8x32xf32>
    %cst_172 = arith.constant 0.707106769 : f32
    %783 = vector.broadcast %cst_172 : f32 to vector<8x32xf32>
    %784 = arith.mulf %780, %783 : vector<8x32xf32>
    %785 = math.erf %784 : vector<8x32xf32>
    %cst_173 = arith.constant 1.000000e+00 : f32
    %786 = vector.broadcast %cst_173 : f32 to vector<8x32xf32>
    %787 = arith.addf %786, %785 : vector<8x32xf32>
    %788 = arith.mulf %782, %787 : vector<8x32xf32>
    %c0_174 = arith.constant 0 : index
    %c0_175 = arith.constant 0 : index
    %789 = vector.load %arg8[%c0_174, %c0_175] : memref<32x32xf32, #tpu.memory_space<vmem>>, vector<32x32xf32>
    %cst_176 = arith.constant dense<0.000000e+00> : vector<8x32xf32>
    %790 = tpu.matmul %788, %789, %cst_176 {dimension_numbers = #tpu.dot_dimension_numbers<[1], [0], [0], [1], [0, 0, 1, 1], [], []>} : vector<8x32xf32>, vector<32x32xf32>, vector<8x32xf32> -> vector<8x32xf32>
    %c0_177 = arith.constant 0 : index
    %c0_178 = arith.constant 0 : index
    %791 = vector.load %arg9[%c0_177, %c0_178] : memref<1x32xf32, #tpu.memory_space<vmem>>, vector<1x32xf32>
    %792 = vector.broadcast %791 : vector<1x32xf32> to vector<8x32xf32>
    %793 = arith.addf %790, %792 : vector<8x32xf32>
    %cst_179 = arith.constant 5.000000e-01 : f32
    %794 = vector.broadcast %cst_179 : f32 to vector<8x32xf32>
    %795 = arith.mulf %794, %793 : vector<8x32xf32>
    %cst_180 = arith.constant 0.707106769 : f32
    %796 = vector.broadcast %cst_180 : f32 to vector<8x32xf32>
    %797 = arith.mulf %793, %796 : vector<8x32xf32>
    %798 = math.erf %797 : vector<8x32xf32>
    %cst_181 = arith.constant 1.000000e+00 : f32
    %799 = vector.broadcast %cst_181 : f32 to vector<8x32xf32>
    %800 = arith.addf %799, %798 : vector<8x32xf32>
    %801 = arith.mulf %795, %800 : vector<8x32xf32>
    %c0_182 = arith.constant 0 : index
    %c0_183 = arith.constant 0 : index
    %802 = vector.load %arg10[%c0_182, %c0_183] : memref<32x1xf32, #tpu.memory_space<vmem>>, vector<32x1xf32>
    %cst_184 = arith.constant dense<0.000000e+00> : vector<8x1xf32>
    %803 = tpu.matmul %801, %802, %cst_184 {dimension_numbers = #tpu.dot_dimension_numbers<[1], [0], [0], [1], [0, 0, 1, 1], [], []>} : vector<8x32xf32>, vector<32x1xf32>, vector<8x1xf32> -> vector<8x1xf32>
    %c0_185 = arith.constant 0 : index
    %c0_186 = arith.constant 0 : index
    %804 = vector.load %arg11[%c0_185, %c0_186] : memref<1x1xf32, #tpu.memory_space<vmem>>, vector<1x1xf32>
    %805 = vector.broadcast %804 : vector<1x1xf32> to vector<8x1xf32>
    %806 = arith.addf %803, %805 : vector<8x1xf32>
    %c0_187 = arith.constant 0 : index
    %c0_188 = arith.constant 0 : index
    %807 = vector.load %arg12[%c0_187, %c0_188] : memref<8x1xf32, #tpu.memory_space<vmem>>, vector<8x1xf32>
    tpu.vector_store %arg12[%c0_187, %c0_188], %806 {strides = array<i32>} : memref<8x1xf32, #tpu.memory_space<vmem>>, vector<8x1xf32>,
    return
  }
  func.func @transform_0(%arg0: i32) -> (i32, i32, i32) {
    %c0_i32 = arith.constant 0 : i32
    %c0_i32_0 = arith.constant 0 : i32
    %c0_i32_1 = arith.constant 0 : i32
    return %c0_i32, %arg0, %c0_i32_0 : i32, i32, i32
  }
  func.func @transform_1(%arg0: i32) -> (i32, i32, i32) {
    %c0_i32 = arith.constant 0 : i32
    %c0_i32_0 = arith.constant 0 : i32
    %c0_i32_1 = arith.constant 0 : i32
    %c0_i32_2 = arith.constant 0 : i32
    return %c0_i32, %c0_i32_0, %c0_i32_1 : i32, i32, i32
  }
  func.func @transform_2(%arg0: i32) -> (i32, i32, i32) {
    %c0_i32 = arith.constant 0 : i32
    %c0_i32_0 = arith.constant 0 : i32
    %c0_i32_1 = arith.constant 0 : i32
    %c0_i32_2 = arith.constant 0 : i32
    return %c0_i32, %c0_i32_0, %c0_i32_1 : i32, i32, i32
  }
  func.func @transform_3(%arg0: i32) -> (i32, i32, i32) {
    %c0_i32 = arith.constant 0 : i32
    %c0_i32_0 = arith.constant 0 : i32
    %c0_i32_1 = arith.constant 0 : i32
    %c0_i32_2 = arith.constant 0 : i32
    return %c0_i32, %c0_i32_0, %c0_i32_1 : i32, i32, i32
  }
  func.func @transform_4(%arg0: i32) -> (i32, i32, i32) {
    %c0_i32 = arith.constant 0 : i32
    %c0_i32_0 = arith.constant 0 : i32
    %c0_i32_1 = arith.constant 0 : i32
    %c0_i32_2 = arith.constant 0 : i32
    return %c0_i32, %c0_i32_0, %c0_i32_1 : i32, i32, i32
  }
  func.func @transform_5(%arg0: i32) -> (i32, i32) {
    %c0_i32 = arith.constant 0 : i32
    %c0_i32_0 = arith.constant 0 : i32
    %c0_i32_1 = arith.constant 0 : i32
    return %c0_i32, %c0_i32_0 : i32, i32
  }
  func.func @transform_6(%arg0: i32) -> (i32, i32) {
    %c0_i32 = arith.constant 0 : i32
    %c0_i32_0 = arith.constant 0 : i32
    %c0_i32_1 = arith.constant 0 : i32
    return %c0_i32, %c0_i32_0 : i32, i32
  }
  func.func @transform_7(%arg0: i32) -> (i32, i32) {
    %c0_i32 = arith.constant 0 : i32
    %c0_i32_0 = arith.constant 0 : i32
    %c0_i32_1 = arith.constant 0 : i32
    return %c0_i32, %c0_i32_0 : i32, i32
  }
  func.func @transform_8(%arg0: i32) -> (i32, i32) {
    %c0_i32 = arith.constant 0 : i32
    %c0_i32_0 = arith.constant 0 : i32
    %c0_i32_1 = arith.constant 0 : i32
    return %c0_i32, %c0_i32_0 : i32, i32
  }
  func.func @transform_9(%arg0: i32) -> (i32, i32) {
    %c0_i32 = arith.constant 0 : i32
    %c0_i32_0 = arith.constant 0 : i32
    %c0_i32_1 = arith.constant 0 : i32
    return %c0_i32, %c0_i32_0 : i32, i32
  }
  func.func @transform_10(%arg0: i32) -> (i32, i32) {
    %c0_i32 = arith.constant 0 : i32
    %c0_i32_0 = arith.constant 0 : i32
    %c0_i32_1 = arith.constant 0 : i32
    return %c0_i32, %c0_i32_0 : i32, i32
  }
  func.func @transform_11(%arg0: i32) -> (i32, i32) {
    %c0_i32 = arith.constant 0 : i32
    %c0_i32_0 = arith.constant 0 : i32
    return %arg0, %c0_i32 : i32, i32
  }
}

</mosaic_0001>

<bundles_post_ra>
// kernel: tmm_forward.1
= control target key start
LH: loop header
LB: loop body
LE: loop exit
PB: predicated region body
PF: predicated region fallthrough
CT: control target
= control target key end

     0   :  { %s4810_s0 = inlined_call_operand.vmem [shape: f32[8,8,32], index: 0, kind: input, shape index: {}]   ;;  %s4811_s1 = inlined_call_operand.vmem [shape: f32[3,32,96], index: 1, kind: input, shape index: {}]   ;;  %s4812_s2 = inlined_call_operand.hbm [shape: f32[3,32,96], index: 2, kind: input, shape index: {}]   ;;  %s4813_s3 = inlined_call_operand.vmem [shape: f32[3,1,96], index: 3, kind: input, shape index: {}]   ;;  %s4814_s4 = inlined_call_operand.vmem [shape: f32[3,1,96], index: 4, kind: input, shape index: {}]   ;;  %s4815_s5 = inlined_call_operand.vmem [shape: f32[32,32], index: 5, kind: input, shape index: {}]   ;;  %s4816_s6 = inlined_call_operand.vmem [shape: f32[1,32], index: 6, kind: input, shape index: {}]   ;;  %s4817_s7 = inlined_call_operand.vmem [shape: f32[32,32], index: 7, kind: input, shape index: {}]   ;;  %s4818_s8 = inlined_call_operand.vmem [shape: f32[1,32], index: 8, kind: input, shape index: {}]   ;;  %s4819_s9 = inlined_call_operand.vmem [shape: f32[32,1], index: 9, kind: input, shape index: {}]   ;;  %s4820_s10 = inlined_call_operand.<no memory space> [shape: f32[1,1], index: 10, kind: input, shape index: {}]   ;;  %s4821_s11 = inlined_call_operand.vmem [shape: f32[8,1], index: 11, kind: output, shape index: {}]  }
   0x1   :  { %v16_v0 = vstv %s4820_s10 }
   0x2   :  { %17 = vst [vmem:[#allocation3] sm:$0x1] %v16_v0 }
   0x3   :  { %18 = vsyncpa [#allocation5], 0  ;;  %s4059_s19 = smov [#allocation4]  }
   0x4   :  { %s28_s20 = sshll.u32 %s4059_s19, 4  ;;  %s29_s20 = int_to_ptr.vmem [resolvable:$true] %s28_s20 }
   0x5   :  { %s4045_s21 = scalar_lea.vmem %s29_s20, 1536  ;;  %p4050_p1 = scmp.lt.s32.totalorder %s29_s20, %s29_s20 }
   0x6   :  { %p4046_p0 = scmp.ne.s32.totalorder %s29_s20, %s4045_s21  ;;  %p4051_p2 = scmp.lt.s32.totalorder %s4045_s21, %s4045_s21 }
   0x8   :  { %p4052_p3 = por %p4051_p2, %p4050_p1 }
   0xa   :  { %p4053_p4 = pnand %p4052_p3, %p4046_p0 }
   0xc   :  { %4056 = shalt.err (!%p4053_p4)
}
   0xd   :  { %s4060_s22 = smov 128   ;;  %s4061_s23 = smov 8  }
   0xe   :  { %34 = dma.hbm_to_vmem [thread:$0]  %s4812_s2, 1536, %s29_s20, [#allocation5], %s4060_s22, %s4060_s22, %s4061_s23  }
   0xf   :  { %4057 = dma.done.wait [#allocation5], 1536  }
  0x10   :  { %4058 = vsyncadd [#allocation5], 4294965760  ;;  %v4062_v1 = vmov 0.0   ;;  %vm4063_vm0 = vmmov 0   ;;  %v65_v2 = vld [vmem:[%s4811_s1 + $0x18] sm:$0xff]  ;;  %v64_v4 = vld [vmem:[%s4811_s1 + $0x10] sm:$0xff] }
  0x11   :  { %3545 = vmatprep.subr.mxu1 %v4062_v1  ;;  %3553 = vmatprep.mubr.msk.f32.mxu1 %vm4063_vm0, %v4062_v1  ;;  %v4138_v3 = vld [vmem:[#allocation4 + $0x18] sm:$0xff]  ;;  %v4144_v5 = vld [vmem:[#allocation4 + $0x10] sm:$0xff]  ;;  %v63_v6 = vld [vmem:[%s4811_s1 + $0x8] sm:$0xff]  ;;  %vm73_vm1 = vcmask 261120   ;;  %s4064_s19 = smov 64   ;;  %s4065_s22 = smov 96  }
  0x12   :  { %3525 = vmatprep.subr.mxu0 %v65_v2  ;;  %3546 = vmatpush3.msra.mxu1 %v4138_v3  ;;  %v4150_v7 = vld [vmem:[#allocation4 + $0x8] sm:$0xff]  ;;  %v62_v8 = vld [vmem:[%s4811_s1] sm:$0xff]  ;;  %v57_v50 = vld [vmem:[%s4810_s0 + $0x18] sm:$0xff]  ;;  %vm3254_vm2 = vcmask 7168  }
  0x13   :  { %3526 = vmatpush3.msra.mxu0 %v65_v2  ;;  %3547 = vmatprep.subr.mxu1 %v4062_v1  ;;  %v4157_v9 = vld [vmem:[#allocation4] sm:$0xff]  ;;  %v4194_v12 = vld [vmem:[%s4814_s4] ss:$0 sm:$0xff]  ;;  %v56_v49 = vld [vmem:[%s4810_s0 + $0x10] sm:$0xff] }
  0x14   :  { %3527 = vmatprep.subr.mxu0 %v64_v4  ;;  %3548 = vmatpush3.msra.mxu1 %v4144_v5  ;;  %v54_v10 = vld [vmem:[%s4810_s0] sm:$0xff]  ;;  %v55_v11 = vld [vmem:[%s4810_s0 + $0x8] sm:$0xff]  ;;  %v60_v53 = vld [vmem:[%s4810_s0 + $0x30] sm:$0xff] }
  0x15   :  { %3528 = vmatpush3.msra.mxu0 %v64_v4  ;;  %3549 = vmatprep.subr.mxu1 %v4062_v1  ;;  %v4201_v17 = vld [vmem:[%s4813_s3] ss:$0 sm:$0xff]  ;;  %v59_v52 = vld [vmem:[%s4810_s0 + $0x28] sm:$0xff]  ;;  %v61_v54 = vld [vmem:[%s4810_s0 + $0x38] sm:$0xff] }
  0x16   :  { %3529 = vmatprep.subr.mxu0 %v63_v6  ;;  %3550 = vmatpush3.msra.mxu1 %v4150_v7  ;;  %v58_v51 = vld [vmem:[%s4810_s0 + $0x20] sm:$0xff] }
  0x17   :  { %3530 = vmatpush3.msra.mxu0 %v63_v6  ;;  %3551 = vmatprep.subr.mxu1 %v4062_v1 }
  0x18   :  { %3531 = vmatprep.subr.mxu0 %v62_v8  ;;  %3552 = vmatpush3.msra.mxu1 %v4157_v9 }
  0x19   :  { %3532 = vmatpush3.msra.mxu0 %v62_v8  ;;  %3533 = vmatprep.mubr.msk.f32.mxu0 %vm73_vm1, %v54_v10 }
  0x1a   :  { %3554 = vmatmul.mubr.f32.vlgmr.msra.gmra.mxu1 %v4062_v1  ;;  %3534 = vmatmul.mubr.msk.f32.vlgmr.msra.gmra.mxu0 %vm73_vm1, %v55_v11 }
  0x1b   :  { %3556 = vmatprep.subr.mxu1 %v4062_v1  ;;  %3564 = vmatprep.mubr.msk.f32.mxu1 %vm4063_vm0, %v4062_v1 }
  0x1c   :  { %3557 = vmatpush3.msra.mxu1 %v4138_v3  ;;  %3567 = vmatprep.subr.mxu0 %v4062_v1 }
  0x1d   :  { %3558 = vmatprep.subr.mxu1 %v4062_v1  ;;  %3568 = vmatpush3.msra.mxu0 %v4138_v3 }
  0x1e   :  { %3559 = vmatpush3.msra.mxu1 %v4144_v5  ;;  %3569 = vmatprep.subr.mxu0 %v4062_v1 }
  0x1f   :  { %3560 = vmatprep.subr.mxu1 %v4062_v1  ;;  %3570 = vmatpush3.msra.mxu0 %v4144_v5 }
  0x20   :  { %3561 = vmatpush3.msra.mxu1 %v4150_v7  ;;  %3571 = vmatprep.subr.mxu0 %v4062_v1 }
  0x21   :  { %3562 = vmatprep.subr.mxu1 %v4062_v1  ;;  %3572 = vmatpush3.msra.mxu0 %v4150_v7 }
  0x22   :  { %3563 = vmatpush3.msra.mxu1 %v4157_v9  ;;  %3573 = vmatprep.subr.mxu0 %v4062_v1 }
  0x23   :  { %3574 = vmatpush3.msra.mxu0 %v4157_v9  ;;  %3578 = vmatprep.subr.mxu1 %v4062_v1 }
  0x24   :  { %3589 = vmatprep.subr.mxu0 %v4062_v1  ;;  %3536 = vmatprep.mubr.msk.f32.mxu0 %vm73_vm1, %v56_v49 }
  0x25   :  { %3537 = vmatmul.mubr.msk.f32.gmra.mxu0 %vm73_vm1, %v57_v50 }
  0x26   :  { %3539 = vmatprep.mubr.msk.f32.mxu0 %vm73_vm1, %v58_v51 }
  0x29   :  { %3540 = vmatmul.mubr.msk.f32.gmra.mxu0 %vm73_vm1, %v59_v52 }
  0x2a   :  { %3542 = vmatprep.mubr.msk.f32.mxu0 %vm73_vm1, %v60_v53 }
  0x2d   :  { %3543 = vmatmul.mubr.msk.f32.gmra.mxu0 %vm73_vm1, %v61_v54 }
  0x2e   :  { %3575 = vmatprep.mubr.msk.f32.mxu0 %vm4063_vm0, %v4062_v1 }
  0xda   :  { %v283_v13 = vpop.f32.mrf.mxu1  ;;  %v3535_v16 = vpop.f32.mrf.mxu0 }
  0xdb   :  { %v284_v14 = vadd.f32 %v4194_v12, %v283_v13  ;;  %v170_v39 = vadd.f32 %v3535_v16, %v4201_v17 }
  0xdc   :  { %v3555_v15 = vpop.f32.mrf.mxu1  ;;  %v164_v18 = vpop.f32.mrf.mxu0 }
  0xdd   :  { %295 = vrot.lane.b32.xlu0 %v284_v14, %s4064_s19  ;;  %v165_v19 = vadd.f32 %v4201_v17, %v164_v18 }
  0xdf   :  { %v287_v20 = vadd.f32 %v284_v14, %v165_v19 }
  0xe1   :  { %v3271_v21 = vmul.f32 -1.442695, %v287_v20 }
  0xe3   :  { %3889 = vpow2.f32 %v3271_v21 }
  0xe5   :  { %v3538_v62 = vpop.f32.mrf.mxu0 }
  0xe7   :  { %v174_v63 = vpop.f32.mrf.mxu0 }
  0xe8   :  { %v175_v13 = vadd.f32 %v4201_v17, %v174_v63 }
  0xe9   :  { %v4263_v0 = vpop.f32.mrf.mxu0 }
  0xeb   :  { %v4265_v2 = vpop.f32.mrf.mxu0 }
  0xec   :  { %v185_v54 = vadd.f32 %v4201_v17, %v4265_v2 }
  0xed   :  { %v4267_v4 = vpop.f32.mrf.mxu0 }
  0xef   :  { %v4269_v6 = vpop.f32.mrf.mxu0 }
  0xf0   :  { %v3890_v22 = vpop.eup %3889 }
  0xf1   :  { %v291_v23 = vadd.f32 1.0, %v3890_v22 }
  0xf3   :  { %3891 = vrcp.f32 %v291_v23 }
 0x100   :  { %v3892_v24 = vpop.eup %3891 }
 0x101   :  { %v305_v30 = vsub.f32 1.0, %v3892_v24  ;;  %v311_v32 = vmul.f32 0.0, %v3892_v24 }
 0x14f   :  { %v296_v25 = vpop.permute.xlu0 %295 }
 0x150   :  { %v298_v26 = vmul.f32 %v3892_v24, %v296_v25 }
 0x152   :  { %300 = vrot.lane.b32.xlu0 %v298_v26, %s4064_s19 }
 0x1c4   :  { %v301_v27 = vpop.permute.xlu0 %300 }
 0x1c5   :  { %v303_v28 = vadd.f32 %v301_v27, %v165_v19 }
 0x1c7   :  { %3893 = vtanh.f32 %v303_v28 }
 0x1d4   :  { %v3894_v29 = vpop.eup %3893 }
 0x1d5   :  { %307 = vrot.lane.b32.xlu1 %v3894_v29, %s4065_s22 }
 0x247   :  { %v308_v31 = vpop.permute.xlu1 %307 }
 0x248   :  { %v310_v33 = vmul.f32 %v308_v31, %v305_v30 }
 0x24a   :  { %v312_v34 = vadd.f32 %v311_v32, %v310_v33 }
 0x24c   :  { %314 = vrot.lane.b32.xlu1 %v312_v34, %s4065_s22 }
 0x2be   :  { %v315_v35 = vpop.permute.xlu1 %314 }
 0x2bf   :  { %317 = vst.msk [vmem:[#allocation2] sm:$0xff] %vm73_vm1, %v315_v35  ;;  %3565 = vmatmul.mubr.msk.f32.vlgmr.msra.gmra.mxu1 %vm73_vm1, %v315_v35 }
 0x2c0   :  { %3579 = vmatpush3.msra.mxu1 %v4138_v3  ;;  %3586 = vmatprep.mubr.msk.f32.mxu1 %vm4063_vm0, %v4062_v1 }
 0x2c1   :  { %3580 = vmatprep.subr.mxu1 %v4062_v1 }
 0x2c2   :  { %3581 = vmatpush3.msra.mxu1 %v4144_v5 }
 0x2c3   :  { %3582 = vmatprep.subr.mxu1 %v4062_v1 }
 0x2c4   :  { %3583 = vmatpush3.msra.mxu1 %v4150_v7 }
 0x2c5   :  { %3584 = vmatprep.subr.mxu1 %v4062_v1 }
 0x2c6   :  { %3585 = vmatpush3.msra.mxu1 %v4157_v9 }
 0x2c7   :  { %3600 = vmatprep.subr.mxu1 %v4062_v1 }
 0x37f   :  { %v386_v36 = vpop.f32.mrf.mxu1 }
 0x380   :  { %v387_v37 = vadd.f32 %v4194_v12, %v386_v36 }
 0x381   :  { %v3566_v38 = vpop.f32.mrf.mxu1 }
 0x382   :  { %398 = vrot.lane.b32.xlu0 %v387_v37, %s4064_s19  ;;  %v390_v40 = vadd.f32 %v387_v37, %v170_v39 }
 0x384   :  { %v3273_v41 = vmul.f32 -1.442695, %v390_v40 }
 0x386   :  { %3895 = vpow2.f32 %v3273_v41 }
 0x393   :  { %v3896_v42 = vpop.eup %3895 }
 0x394   :  { %v394_v43 = vadd.f32 1.0, %v3896_v42 }
 0x396   :  { %3897 = vrcp.f32 %v394_v43 }
 0x3a3   :  { %v3898_v44 = vpop.eup %3897 }
 0x3a4   :  { %v408_v56 = vsub.f32 1.0, %v3898_v44  ;;  %v414_v58 = vmul.f32 %v3898_v44, %v312_v34  ;;  %v180_v34 = vadd.f32 %v3538_v62, %v4201_v17 }
 0x3f4   :  { %v399_v45 = vpop.permute.xlu0 %398 }
 0x3f5   :  { %v401_v46 = vmul.f32 %v3898_v44, %v399_v45 }
 0x3f7   :  { %403 = vrot.lane.b32.xlu1 %v401_v46, %s4064_s19 }
 0x469   :  { %v404_v47 = vpop.permute.xlu1 %403 }
 0x46a   :  { %v406_v48 = vadd.f32 %v404_v47, %v170_v39 }
 0x46c   :  { %3899 = vtanh.f32 %v406_v48 }
 0x479   :  { %v3900_v55 = vpop.eup %3899 }
 0x47a   :  { %410 = vrot.lane.b32.xlu0 %v3900_v55, %s4065_s22 }
 0x4ec   :  { %v411_v57 = vpop.permute.xlu0 %410 }
 0x4ed   :  { %v413_v59 = vmul.f32 %v411_v57, %v408_v56 }
 0x4ef   :  { %v415_v60 = vadd.f32 %v414_v58, %v413_v59 }
 0x4f1   :  { %417 = vrot.lane.b32.xlu1 %v415_v60, %s4065_s22 }
 0x563   :  { %v418_v61 = vpop.permute.xlu1 %417 }
 0x564   :  { %420 = vst.msk [vmem:[#allocation2 + $0x8] sm:$0xff] %vm73_vm1, %v418_v61  ;;  %3576 = vmatmul.mubr.msk.f32.vlgmr.msra.gmra.mxu0 %vm73_vm1, %v418_v61 }
 0x565   :  { %3590 = vmatpush3.msra.mxu0 %v4138_v3  ;;  %3597 = vmatprep.mubr.msk.f32.mxu0 %vm4063_vm0, %v4062_v1 }
 0x566   :  { %3591 = vmatprep.subr.mxu0 %v4062_v1 }
 0x567   :  { %3592 = vmatpush3.msra.mxu0 %v4144_v5 }
 0x568   :  { %3593 = vmatprep.subr.mxu0 %v4062_v1 }
 0x569   :  { %3594 = vmatpush3.msra.mxu0 %v4150_v7 }
 0x56a   :  { %3595 = vmatprep.subr.mxu0 %v4062_v1 }
 0x56b   :  { %3596 = vmatpush3.msra.mxu0 %v4157_v9 }
 0x56c   :  { %3611 = vmatprep.subr.mxu0 %v4062_v1 }
 0x624   :  { %v489_v8 = vpop.f32.mrf.mxu0 }
 0x625   :  { %v490_v10 = vadd.f32 %v4194_v12, %v489_v8 }
 0x626   :  { %v3577_v11 = vpop.f32.mrf.mxu0 }
 0x627   :  { %501 = vrot.lane.b32.xlu0 %v490_v10, %s4064_s19  ;;  %v493_v14 = vadd.f32 %v490_v10, %v175_v13 }
 0x629   :  { %v3275_v15 = vmul.f32 -1.442695, %v493_v14 }
 0x62b   :  { %3901 = vpow2.f32 %v3275_v15 }
 0x638   :  { %v3902_v16 = vpop.eup %3901 }
 0x639   :  { %v497_v18 = vadd.f32 1.0, %v3902_v16 }
 0x63b   :  { %3903 = vrcp.f32 %v497_v18 }
 0x648   :  { %v3904_v19 = vpop.eup %3903 }
 0x649   :  { %v511_v25 = vsub.f32 1.0, %v3904_v19  ;;  %v517_v27 = vmul.f32 %v3904_v19, %v415_v60 }
 0x699   :  { %v502_v20 = vpop.permute.xlu0 %501 }
 0x69a   :  { %v504_v21 = vmul.f32 %v3904_v19, %v502_v20  ;;  %v190_v19 = vadd.f32 %v4263_v0, %v4201_v17 }
 0x69c   :  { %506 = vrot.lane.b32.xlu1 %v504_v21, %s4064_s19 }
 0x70e   :  { %v507_v22 = vpop.permute.xlu1 %506 }
 0x70f   :  { %v509_v23 = vadd.f32 %v507_v22, %v175_v13 }
 0x711   :  { %3905 = vtanh.f32 %v509_v23 }
 0x71e   :  { %v3906_v24 = vpop.eup %3905 }
 0x71f   :  { %513 = vrot.lane.b32.xlu0 %v3906_v24, %s4065_s22 }
 0x791   :  { %v514_v26 = vpop.permute.xlu0 %513 }
 0x792   :  { %v516_v28 = vmul.f32 %v514_v26, %v511_v25  ;;  %v3289_v26 = vld [vmem:[%s4811_s1 + $0x38] sm:$0xff] }
 0x794   :  { %v518_v29 = vadd.f32 %v517_v27, %v516_v28 }
 0x796   :  { %520 = vrot.lane.b32.xlu1 %v518_v29, %s4065_s22 }
 0x808   :  { %v521_v30 = vpop.permute.xlu1 %520 }
 0x809   :  { %523 = vst.msk [vmem:[#allocation2 + $0x10] sm:$0xff] %vm73_vm1, %v521_v30  ;;  %3587 = vmatmul.mubr.msk.f32.vlgmr.msra.gmra.mxu1 %vm73_vm1, %v521_v30 }
 0x80a   :  { %3601 = vmatpush3.msra.mxu1 %v4138_v3  ;;  %3608 = vmatprep.mubr.msk.f32.mxu1 %vm4063_vm0, %v4062_v1 }
 0x80b   :  { %3602 = vmatprep.subr.mxu1 %v4062_v1 }
 0x80c   :  { %3603 = vmatpush3.msra.mxu1 %v4144_v5 }
 0x80d   :  { %3604 = vmatprep.subr.mxu1 %v4062_v1 }
 0x80e   :  { %3605 = vmatpush3.msra.mxu1 %v4150_v7 }
 0x80f   :  { %3606 = vmatprep.subr.mxu1 %v4062_v1 }
 0x810   :  { %3607 = vmatpush3.msra.mxu1 %v4157_v9 }
 0x811   :  { %3622 = vmatprep.subr.mxu1 %v4062_v1 }
 0x8c9   :  { %v592_v31 = vpop.f32.mrf.mxu1 }
 0x8ca   :  { %v593_v32 = vadd.f32 %v4194_v12, %v592_v31 }
 0x8cb   :  { %v3588_v33 = vpop.f32.mrf.mxu1 }
 0x8cc   :  { %604 = vrot.lane.b32.xlu0 %v593_v32, %s4064_s19  ;;  %v596_v35 = vadd.f32 %v593_v32, %v180_v34  ;;  %v3288_v33 = vld [vmem:[%s4811_s1 + $0x30] sm:$0xff] }
 0x8ce   :  { %v3277_v36 = vmul.f32 -1.442695, %v596_v35  ;;  %v3287_v35 = vld [vmem:[%s4811_s1 + $0x28] sm:$0xff] }
 0x8d0   :  { %3907 = vpow2.f32 %v3277_v36  ;;  %v3286_v36 = vld [vmem:[%s4811_s1 + $0x20] sm:$0xff] }
 0x8dd   :  { %v3908_v37 = vpop.eup %3907 }
 0x8de   :  { %v600_v38 = vadd.f32 1.0, %v3908_v37  ;;  %v1040_v37 = vld [vmem:[#allocation2 + $0x8] sm:$0xff] }
 0x8e0   :  { %3909 = vrcp.f32 %v600_v38  ;;  %v1041_v38 = vld [vmem:[#allocation2 + $0x10] sm:$0xff] }
 0x8ed   :  { %v3910_v39 = vpop.eup %3909 }
 0x8ee   :  { %v614_v45 = vsub.f32 1.0, %v3910_v39  ;;  %v620_v47 = vmul.f32 %v3910_v39, %v518_v29 }
 0x93e   :  { %v605_v40 = vpop.permute.xlu0 %604 }
 0x93f   :  { %v607_v41 = vmul.f32 %v3910_v39, %v605_v40 }
 0x941   :  { %609 = vrot.lane.b32.xlu1 %v607_v41, %s4064_s19 }
 0x9b3   :  { %v610_v42 = vpop.permute.xlu1 %609 }
 0x9b4   :  { %v612_v43 = vadd.f32 %v610_v42, %v180_v34  ;;  %v1039_v34 = vld [vmem:[#allocation2] sm:$0xff] }
 0x9b6   :  { %3911 = vtanh.f32 %v612_v43 }
 0x9c3   :  { %v3912_v44 = vpop.eup %3911 }
 0x9c4   :  { %616 = vrot.lane.b32.xlu0 %v3912_v44, %s4065_s22 }
 0xa36   :  { %v617_v46 = vpop.permute.xlu0 %616 }
 0xa37   :  { %v619_v48 = vmul.f32 %v617_v46, %v614_v45  ;;  %v195_v45 = vadd.f32 %v4201_v17, %v4269_v6  ;;  %v4362_v6 = vld [vmem:[#allocation4 + $0x30] sm:$0xff] }
 0xa39   :  { %v621_v49 = vadd.f32 %v620_v47, %v619_v48 }
 0xa3b   :  { %623 = vrot.lane.b32.xlu1 %v621_v49, %s4065_s22 }
 0xaad   :  { %v624_v50 = vpop.permute.xlu1 %623 }
 0xaae   :  { %626 = vst.msk [vmem:[#allocation2 + $0x18] sm:$0xff] %vm73_vm1, %v624_v50  ;;  %3598 = vmatmul.mubr.msk.f32.vlgmr.msra.gmra.mxu0 %vm73_vm1, %v624_v50 }
 0xaaf   :  { %3612 = vmatpush3.msra.mxu0 %v4138_v3  ;;  %3619 = vmatprep.mubr.msk.f32.mxu0 %vm4063_vm0, %v4062_v1 }
 0xab0   :  { %3613 = vmatprep.subr.mxu0 %v4062_v1 }
 0xab1   :  { %3614 = vmatpush3.msra.mxu0 %v4144_v5 }
 0xab2   :  { %3615 = vmatprep.subr.mxu0 %v4062_v1 }
 0xab3   :  { %3616 = vmatpush3.msra.mxu0 %v4150_v7 }
 0xab4   :  { %3617 = vmatprep.subr.mxu0 %v4062_v1 }
 0xab5   :  { %3618 = vmatpush3.msra.mxu0 %v4157_v9  ;;  %v1042_v39 = vld [vmem:[#allocation2 + $0x18] sm:$0xff] }
 0xab6   :  { %3633 = vmatprep.subr.mxu0 %v3289_v26 }
 0xb6e   :  { %v695_v51 = vpop.f32.mrf.mxu0 }
 0xb6f   :  { %v696_v52 = vadd.f32 %v4194_v12, %v695_v51 }
 0xb70   :  { %v3599_v53 = vpop.f32.mrf.mxu0 }
 0xb71   :  { %707 = vrot.lane.b32.xlu0 %v696_v52, %s4064_s19  ;;  %v699_v55 = vadd.f32 %v696_v52, %v185_v54 }
 0xb73   :  { %v3279_v56 = vmul.f32 -1.442695, %v699_v55 }
 0xb75   :  { %3913 = vpow2.f32 %v3279_v56  ;;  %v4359_v56 = vld [vmem:[#allocation4 + $0x38] sm:$0xff] }
 0xb82   :  { %v3914_v57 = vpop.eup %3913 }
 0xb83   :  { %v703_v58 = vadd.f32 1.0, %v3914_v57  ;;  %v4366_v57 = vld [vmem:[#allocation4 + $0x28] sm:$0xff] }
 0xb85   :  { %3915 = vrcp.f32 %v703_v58  ;;  %v4370_v58 = vld [vmem:[#allocation4 + $0x20] sm:$0xff] }
 0xb92   :  { %v3916_v59 = vpop.eup %3915 }
 0xb93   :  { %v717_v10 = vsub.f32 1.0, %v3916_v59  ;;  %v723_v2 = vmul.f32 %v3916_v59, %v621_v49 }
 0xbe3   :  { %v708_v60 = vpop.permute.xlu0 %707 }
 0xbe4   :  { %v710_v61 = vmul.f32 %v3916_v59, %v708_v60 }
 0xbe6   :  { %712 = vrot.lane.b32.xlu1 %v710_v61, %s4064_s19 }
 0xc58   :  { %v713_v62 = vpop.permute.xlu1 %712 }
 0xc59   :  { %v715_v63 = vadd.f32 %v713_v62, %v185_v54 }
 0xc5b   :  { %3917 = vtanh.f32 %v715_v63 }
 0xc68   :  { %v3918_v8 = vpop.eup %3917 }
 0xc69   :  { %719 = vrot.lane.b32.xlu0 %v3918_v8, %s4065_s22 }
 0xcdb   :  { %v720_v11 = vpop.permute.xlu0 %719 }
 0xcdc   :  { %v722_v13 = vmul.f32 %v720_v11, %v717_v10 }
 0xcde   :  { %v724_v14 = vadd.f32 %v723_v2, %v722_v13  ;;  %v4406_v13 = vld [vmem:[%s4814_s4 + $0x1] ss:$0 sm:$0xff] }
 0xce0   :  { %726 = vrot.lane.b32.xlu1 %v724_v14, %s4065_s22 }
 0xd52   :  { %v727_v15 = vpop.permute.xlu1 %726 }
 0xd53   :  { %729 = vst.msk [vmem:[#allocation2 + $0x20] sm:$0xff] %vm73_vm1, %v727_v15  ;;  %3609 = vmatmul.mubr.msk.f32.vlgmr.msra.gmra.mxu1 %vm73_vm1, %v727_v15 }
 0xd54   :  { %3623 = vmatpush3.msra.mxu1 %v4138_v3  ;;  %3630 = vmatprep.mubr.msk.f32.mxu1 %vm4063_vm0, %v4062_v1 }
 0xd55   :  { %3624 = vmatprep.subr.mxu1 %v4062_v1 }
 0xd56   :  { %3625 = vmatpush3.msra.mxu1 %v4144_v5 }
 0xd57   :  { %3626 = vmatprep.subr.mxu1 %v4062_v1 }
 0xd58   :  { %3627 = vmatpush3.msra.mxu1 %v4150_v7 }
 0xd59   :  { %3628 = vmatprep.subr.mxu1 %v4062_v1 }
 0xd5a   :  { %3629 = vmatpush3.msra.mxu1 %v4157_v9  ;;  %v1043_v40 = vld [vmem:[#allocation2 + $0x20] sm:$0xff] }
 0xd5b   :  { %3653 = vmatprep.subr.mxu1 %v4062_v1 }
 0xe13   :  { %v798_v16 = vpop.f32.mrf.mxu1 }
 0xe14   :  { %v799_v3 = vadd.f32 %v4194_v12, %v798_v16 }
 0xe15   :  { %v3610_v18 = vpop.f32.mrf.mxu1 }
 0xe16   :  { %810 = vrot.lane.b32.xlu0 %v799_v3, %s4064_s19  ;;  %v802_v5 = vadd.f32 %v799_v3, %v190_v19 }
 0xe18   :  { %v3281_v20 = vmul.f32 -1.442695, %v802_v5 }
 0xe1a   :  { %3919 = vpow2.f32 %v3281_v20 }
 0xe27   :  { %v3920_v21 = vpop.eup %3919 }
 0xe28   :  { %v806_v7 = vadd.f32 1.0, %v3920_v21 }
 0xe2a   :  { %3921 = vrcp.f32 %v806_v7 }
 0xe37   :  { %v3922_v22 = vpop.eup %3921 }
 0xe38   :  { %v820_v27 = vsub.f32 1.0, %v3922_v22  ;;  %v826_v29 = vmul.f32 %v3922_v22, %v724_v14 }
 0xe88   :  { %v811_v23 = vpop.permute.xlu0 %810 }
 0xe89   :  { %v813_v9 = vmul.f32 %v3922_v22, %v811_v23 }
 0xe8b   :  { %815 = vrot.lane.b32.xlu1 %v813_v9, %s4064_s19 }
 0xefd   :  { %v816_v24 = vpop.permute.xlu1 %815 }
 0xefe   :  { %v818_v25 = vadd.f32 %v816_v24, %v190_v19  ;;  %v4415_v19 = vld [vmem:[%s4813_s3 + $0x1] ss:$0 sm:$0xff] }
 0xf00   :  { %3923 = vtanh.f32 %v818_v25 }
 0xf0d   :  { %v3924_v0 = vpop.eup %3923 }
 0xf0e   :  { %822 = vrot.lane.b32.xlu0 %v3924_v0, %s4065_s22 }
 0xf80   :  { %v823_v28 = vpop.permute.xlu0 %822 }
 0xf81   :  { %v825_v30 = vmul.f32 %v823_v28, %v820_v27  ;;  %v200_v28 = vadd.f32 %v4267_v4, %v4201_v17 }
 0xf83   :  { %v827_v31 = vadd.f32 %v826_v29, %v825_v30 }
 0xf85   :  { %829 = vrot.lane.b32.xlu1 %v827_v31, %s4065_s22 }
 0xff7   :  { %v830_v32 = vpop.permute.xlu1 %829 }
 0xff8   :  { %832 = vst.msk [vmem:[#allocation2 + $0x28] sm:$0xff] %vm73_vm1, %v830_v32  ;;  %3620 = vmatmul.mubr.msk.f32.vlgmr.msra.gmra.mxu0 %vm73_vm1, %v830_v32 }
 0xff9   :  { %3634 = vmatpush3.msra.mxu0 %v3289_v26  ;;  %3641 = vmatprep.mubr.msk.f32.mxu0 %vm73_vm1, %v1039_v34 }
 0xffa   :  { %3635 = vmatprep.subr.mxu0 %v3288_v33 }
 0xffb   :  { %3636 = vmatpush3.msra.mxu0 %v3288_v33 }
 0xffc   :  { %3637 = vmatprep.subr.mxu0 %v3287_v35 }
 0xffd   :  { %3638 = vmatpush3.msra.mxu0 %v3287_v35 }
 0xffe   :  { %3639 = vmatprep.subr.mxu0 %v3286_v36 }
 0xfff   :  { %3640 = vmatpush3.msra.mxu0 %v3286_v36  ;;  %v1044_v41 = vld [vmem:[#allocation2 + $0x28] sm:$0xff] }
0x1000   :  { %3642 = vmatmul.mubr.msk.f32.vlgmr.msra.gmra.mxu0 %vm73_vm1, %v1040_v37  ;;  %3675 = vmatprep.subr.mxu0 %v4062_v1 }
0x1001   :  { %3644 = vmatprep.mubr.msk.f32.mxu0 %vm73_vm1, %v1041_v38  ;;  %3676 = vmatpush3.msra.mxu0 %v4359_v56 }
0x1002   :  { %3677 = vmatprep.subr.mxu0 %v4062_v1 }
0x1003   :  { %3678 = vmatpush3.msra.mxu0 %v4362_v6 }
0x1004   :  { %3645 = vmatmul.mubr.msk.f32.gmra.mxu0 %vm73_vm1, %v1042_v39  ;;  %3679 = vmatprep.subr.mxu0 %v4062_v1 }
0x1005   :  { %3647 = vmatprep.mubr.msk.f32.mxu0 %vm73_vm1, %v1043_v40  ;;  %3680 = vmatpush3.msra.mxu0 %v4366_v57 }
0x1006   :  { %3681 = vmatprep.subr.mxu0 %v4062_v1 }
0x1007   :  { %3682 = vmatpush3.msra.mxu0 %v4370_v58 }
0x1008   :  { %3648 = vmatmul.mubr.msk.f32.gmra.mxu0 %vm73_vm1, %v1044_v41  ;;  %3697 = vmatprep.subr.mxu0 %v4062_v1 }
0x10b8   :  { %v901_v42 = vpop.f32.mrf.mxu0 }
0x10b9   :  { %v902_v43 = vadd.f32 %v4194_v12, %v901_v42 }
0x10ba   :  { %v3621_v44 = vpop.f32.mrf.mxu0 }
0x10bb   :  { %913 = vrot.lane.b32.xlu0 %v902_v43, %s4064_s19  ;;  %v905_v46 = vadd.f32 %v902_v43, %v195_v45 }
0x10bd   :  { %v3283_v47 = vmul.f32 -1.442695, %v905_v46 }
0x10bf   :  { %3925 = vpow2.f32 %v3283_v47 }
0x10c0   :  { %v4410_v3 = vpop.f32.mrf.mxu0 }
0x10c2   :  { %v1150_v18 = vpop.f32.mrf.mxu0 }
0x10c3   :  { %v1151_v5 = vadd.f32 %v4415_v19, %v1150_v18 }
0x10c4   :  { %v3646_v18 = vpop.f32.mrf.mxu0 }
0x10cc   :  { %v3926_v48 = vpop.eup %3925 }
0x10cd   :  { %v909_v49 = vadd.f32 1.0, %v3926_v48 }
0x10cf   :  { %3927 = vrcp.f32 %v909_v49 }
0x10dc   :  { %v3928_v50 = vpop.eup %3927 }
0x10dd   :  { %v923_v59 = vsub.f32 1.0, %v3928_v50  ;;  %v929_v61 = vmul.f32 %v3928_v50, %v827_v31 }
0x112d   :  { %v914_v51 = vpop.permute.xlu0 %913 }
0x112e   :  { %v916_v52 = vmul.f32 %v3928_v50, %v914_v51 }
0x1130   :  { %918 = vrot.lane.b32.xlu1 %v916_v52, %s4064_s19  ;;  %v1156_v52 = vadd.f32 %v4410_v3, %v4415_v19 }
0x11a2   :  { %v919_v53 = vpop.permute.xlu1 %918 }
0x11a3   :  { %v921_v54 = vadd.f32 %v919_v53, %v195_v45 }
0x11a5   :  { %3929 = vtanh.f32 %v921_v54 }
0x11b2   :  { %v3930_v55 = vpop.eup %3929 }
0x11b3   :  { %925 = vrot.lane.b32.xlu0 %v3930_v55, %s4065_s22 }
0x1225   :  { %v926_v60 = vpop.permute.xlu0 %925 }
0x1226   :  { %v928_v62 = vmul.f32 %v926_v60, %v923_v59 }
0x1228   :  { %v4375_v63 = vadd.f32 %v929_v61, %v928_v62 }
0x122a   :  { %932 = vrot.lane.b32.xlu1 %v4375_v63, %s4065_s22 }
0x129c   :  { %v933_v8 = vpop.permute.xlu1 %932 }
0x129d   :  { %935 = vst.msk [vmem:[#allocation2 + $0x30] sm:$0xff] %vm73_vm1, %v933_v8  ;;  %3631 = vmatmul.mubr.msk.f32.vlgmr.msra.gmra.mxu1 %vm73_vm1, %v933_v8 }
0x129e   :  { %3654 = vmatpush3.msra.mxu1 %v4359_v56  ;;  %3661 = vmatprep.mubr.msk.f32.mxu1 %vm4063_vm0, %v4062_v1 }
0x129f   :  { %3655 = vmatprep.subr.mxu1 %v4062_v1 }
0x12a0   :  { %3656 = vmatpush3.msra.mxu1 %v4362_v6 }
0x12a1   :  { %3657 = vmatprep.subr.mxu1 %v4062_v1 }
0x12a2   :  { %3658 = vmatpush3.msra.mxu1 %v4366_v57 }
0x12a3   :  { %3659 = vmatprep.subr.mxu1 %v4062_v1 }
0x12a4   :  { %3660 = vmatpush3.msra.mxu1 %v4370_v58  ;;  %v1045_v10 = vld [vmem:[#allocation2 + $0x30] sm:$0xff] }
0x12a5   :  { %3662 = vmatmul.mubr.f32.vlgmr.msra.gmra.mxu1 %v4062_v1  ;;  %3650 = vmatprep.mubr.msk.f32.mxu0 %vm73_vm1, %v1045_v10 }
0x12a6   :  { %3664 = vmatprep.subr.mxu1 %v4062_v1  ;;  %3672 = vmatprep.mubr.msk.f32.mxu1 %vm4063_vm0, %v4062_v1 }
0x12a7   :  { %3665 = vmatpush3.msra.mxu1 %v4359_v56 }
0x12a8   :  { %3666 = vmatprep.subr.mxu1 %v4062_v1 }
0x12a9   :  { %3667 = vmatpush3.msra.mxu1 %v4362_v6 }
0x12aa   :  { %3668 = vmatprep.subr.mxu1 %v4062_v1 }
0x12ab   :  { %3669 = vmatpush3.msra.mxu1 %v4366_v57 }
0x12ac   :  { %3670 = vmatprep.subr.mxu1 %v4062_v1 }
0x12ad   :  { %3671 = vmatpush3.msra.mxu1 %v4370_v58 }
0x12ae   :  { %3686 = vmatprep.subr.mxu1 %v4062_v1 }
0x135d   :  { %v1004_v11 = vpop.f32.mrf.mxu1 }
0x135e   :  { %v1005_v27 = vadd.f32 %v4194_v12, %v1004_v11 }
0x135f   :  { %v3632_v2 = vpop.f32.mrf.mxu1 }
0x1360   :  { %v1008_v29 = vadd.f32 %v1005_v27, %v200_v28 }
0x1362   :  { %v3285_v30 = vmul.f32 -1.442695, %v1008_v29 }
0x1365   :  { %v1268_v14 = vpop.f32.mrf.mxu1 }
0x1366   :  { %v1269_v15 = vadd.f32 %v4406_v13, %v1268_v14 }
0x1367   :  { %v3663_v16 = vpop.f32.mrf.mxu1 }
0x1368   :  { %1280 = vrot.lane.b32.xlu0 %v1269_v15, %s4064_s19  ;;  %v1272_v20 = vadd.f32 %v1269_v15, %v1151_v5 }
0x136a   :  { %v3302_v21 = vmul.f32 -1.442695, %v1272_v20 }
0x136c   :  { %3931 = vpow2.f32 %v3302_v21 }
0x1379   :  { %v3932_v7 = vpop.eup %3931 }
0x137a   :  { %v1276_v22 = vadd.f32 1.0, %v3932_v7 }
0x137c   :  { %3933 = vrcp.f32 %v1276_v22 }
0x1389   :  { %v3934_v23 = vpop.eup %3933 }
0x138a   :  { %v1290_v33 = vsub.f32 1.0, %v3934_v23  ;;  %v1296_v35 = vmul.f32 0.0, %v3934_v23 }
0x13da   :  { %v1281_v9 = vpop.permute.xlu0 %1280 }
0x13db   :  { %v1283_v24 = vmul.f32 %v3934_v23, %v1281_v9 }
0x13dd   :  { %1285 = vrot.lane.b32.xlu1 %v1283_v24, %s4064_s19 }
0x144f   :  { %v1286_v25 = vpop.permute.xlu1 %1285 }
0x1450   :  { %v1288_v26 = vadd.f32 %v1286_v25, %v1151_v5  ;;  %v1160_v5 = vpop.f32.mrf.mxu0 }
0x1451   :  { %v1161_v25 = vadd.f32 %v4415_v19, %v1160_v5 }
0x1452   :  { %3935 = vtanh.f32 %v1288_v26  ;;  %v4464_v20 = vpop.f32.mrf.mxu0 }
0x1453   :  { %3937 = vpow2.f32 %v3285_v30 }
0x1454   :  { %v4466_v21 = vpop.f32.mrf.mxu0 }
0x145f   :  { %v3936_v0 = vpop.eup %3935 }
0x1460   :  { %1292 = vrot.lane.b32.xlu0 %v3936_v0, %s4065_s22  ;;  %v3938_v31 = vpop.eup %3937 }
0x1461   :  { %v1012_v32 = vadd.f32 1.0, %v3938_v31 }
0x1463   :  { %3939 = vrcp.f32 %v1012_v32 }
0x1464   :  { %1016 = vrot.lane.b32.xlu0 %v1005_v27, %s4064_s19 }
0x1470   :  { %v3940_v38 = vpop.eup %3939 }
0x1471   :  { %v1026_v42 = vsub.f32 1.0, %v3940_v38  ;;  %v1032_v44 = vmul.f32 %v3940_v38, %v4375_v63 }
0x14d2   :  { %v1293_v34 = vpop.permute.xlu0 %1292 }
0x14d3   :  { %v1295_v36 = vmul.f32 %v1293_v34, %v1290_v33 }
0x14d5   :  { %v1297_v37 = vadd.f32 %v1296_v35, %v1295_v36 }
0x14d6   :  { %v1017_v39 = vpop.permute.xlu0 %1016 }
0x14d7   :  { %v1019_v40 = vmul.f32 %v3940_v38, %v1017_v39  ;;  %1299 = vrot.lane.b32.xlu1 %v1297_v37, %s4065_s22 }
0x14d9   :  { %1021 = vrot.lane.b32.xlu0 %v1019_v40, %s4064_s19 }
0x1549   :  { %v1300_v12 = vpop.permute.xlu1 %1299 }
0x154a   :  { %1302 = vst.msk [vmem:[#allocation2] sm:$0xff] %vm73_vm1, %v1300_v12  ;;  %3673 = vmatmul.mubr.msk.f32.vlgmr.msra.gmra.mxu1 %vm73_vm1, %v1300_v12 }
0x154b   :  { %v1022_v17 = vpop.permute.xlu0 %1021  ;;  %3687 = vmatpush3.msra.mxu1 %v4359_v56  ;;  %3694 = vmatprep.mubr.msk.f32.mxu1 %vm4063_vm0, %v4062_v1 }
0x154c   :  { %v1024_v4 = vadd.f32 %v1022_v17, %v200_v28  ;;  %3688 = vmatprep.subr.mxu1 %v4062_v1 }
0x154d   :  { %3689 = vmatpush3.msra.mxu1 %v4362_v6 }
0x154e   :  { %3941 = vtanh.f32 %v1024_v4  ;;  %3690 = vmatprep.subr.mxu1 %v4062_v1 }
0x154f   :  { %3691 = vmatpush3.msra.mxu1 %v4366_v57 }
0x1550   :  { %3692 = vmatprep.subr.mxu1 %v4062_v1 }
0x1551   :  { %3693 = vmatpush3.msra.mxu1 %v4370_v58 }
0x1552   :  { %3708 = vmatprep.subr.mxu1 %v4062_v1 }
0x155b   :  { %v3942_v41 = vpop.eup %3941 }
0x155c   :  { %1028 = vrot.lane.b32.xlu0 %v3942_v41, %s4065_s22  ;;  %v1166_v41 = vadd.f32 %v3646_v18, %v4415_v19 }
0x15ce   :  { %v1029_v43 = vpop.permute.xlu0 %1028 }
0x15cf   :  { %v1031_v45 = vmul.f32 %v1029_v43, %v1026_v42 }
0x15d1   :  { %v1033_v46 = vadd.f32 %v1032_v44, %v1031_v45 }
0x15d3   :  { %1035 = vrot.lane.b32.xlu0 %v1033_v46, %s4065_s22 }
0x160a   :  { %v1371_v47 = vpop.f32.mrf.mxu1 }
0x160b   :  { %v1372_v48 = vadd.f32 %v4406_v13, %v1371_v47 }
0x160c   :  { %v3674_v49 = vpop.f32.mrf.mxu1 }
0x160d   :  { %1383 = vrot.lane.b32.xlu1 %v1372_v48, %s4064_s19  ;;  %v1375_v53 = vadd.f32 %v1372_v48, %v1156_v52 }
0x160f   :  { %v3304_v54 = vmul.f32 -1.442695, %v1375_v53 }
0x1611   :  { %3943 = vpow2.f32 %v3304_v54 }
0x161e   :  { %v3944_v55 = vpop.eup %3943 }
0x161f   :  { %v1379_v59 = vadd.f32 1.0, %v3944_v55 }
0x1621   :  { %3945 = vrcp.f32 %v1379_v59 }
0x162e   :  { %v3946_v60 = vpop.eup %3945 }
0x162f   :  { %v1393_v11 = vsub.f32 1.0, %v3946_v60  ;;  %v1399_v14 = vmul.f32 %v3946_v60, %v1297_v37 }
0x1645   :  { %v1036_v50 = vpop.permute.xlu0 %1035 }
0x1646   :  { %1038 = vst.msk [vmem:[#allocation2 + $0x38] sm:$0xff] %vm73_vm1, %v1036_v50 }
0x164d   :  { %v1046_v51 = vld [vmem:[#allocation2 + $0x38] sm:$0xff] }
0x164e   :  { %3651 = vmatmul.mubr.msk.f32.gmra.mxu0 %vm73_vm1, %v1046_v51 }
0x164f   :  { %3683 = vmatprep.mubr.msk.f32.mxu0 %vm4063_vm0, %v4062_v1 }
0x167f   :  { %v1384_v61 = vpop.permute.xlu1 %1383 }
0x1680   :  { %v1386_v62 = vmul.f32 %v3946_v60, %v1384_v61 }
0x1682   :  { %1388 = vrot.lane.b32.xlu1 %v1386_v62, %s4064_s19 }
0x16f4   :  { %v1389_v63 = vpop.permute.xlu1 %1388 }
0x16f5   :  { %v1391_v8 = vadd.f32 %v1389_v63, %v1156_v52 }
0x16f7   :  { %3947 = vtanh.f32 %v1391_v8  ;;  %v1171_v8 = vadd.f32 %v4415_v19, %v4466_v21 }
0x1704   :  { %v3948_v10 = vpop.eup %3947 }
0x1705   :  { %1395 = vrot.lane.b32.xlu1 %v3948_v10, %s4065_s22 }
0x170e   :  { %v4468_v7 = vpop.f32.mrf.mxu0 }
0x1710   :  { %v4470_v22 = vpop.f32.mrf.mxu0 }
0x1777   :  { %v1396_v2 = vpop.permute.xlu1 %1395 }
0x1778   :  { %v1398_v15 = vmul.f32 %v1396_v2, %v1393_v11 }
0x177a   :  { %v1400_v16 = vadd.f32 %v1399_v14, %v1398_v15 }
0x177c   :  { %1402 = vrot.lane.b32.xlu1 %v1400_v16, %s4065_s22 }
0x17ee   :  { %v1403_v3 = vpop.permute.xlu1 %1402 }
0x17ef   :  { %1405 = vst.msk [vmem:[#allocation2 + $0x8] sm:$0xff] %vm73_vm1, %v1403_v3  ;;  %3684 = vmatmul.mubr.msk.f32.vlgmr.msra.gmra.mxu0 %vm73_vm1, %v1403_v3 }
0x17f0   :  { %3698 = vmatpush3.msra.mxu0 %v4359_v56  ;;  %3705 = vmatprep.mubr.msk.f32.mxu0 %vm4063_vm0, %v4062_v1 }
0x17f1   :  { %3699 = vmatprep.subr.mxu0 %v4062_v1 }
0x17f2   :  { %3700 = vmatpush3.msra.mxu0 %v4362_v6 }
0x17f3   :  { %3701 = vmatprep.subr.mxu0 %v4062_v1 }
0x17f4   :  { %3702 = vmatpush3.msra.mxu0 %v4366_v57 }
0x17f5   :  { %3703 = vmatprep.subr.mxu0 %v4062_v1 }
0x17f6   :  { %3704 = vmatpush3.msra.mxu0 %v4370_v58 }
0x17f7   :  { %3719 = vmatprep.subr.mxu0 %v4062_v1 }
0x18af   :  { %v1474_v23 = vpop.f32.mrf.mxu0 }
0x18b0   :  { %v1475_v9 = vadd.f32 %v4406_v13, %v1474_v23 }
0x18b1   :  { %v3685_v24 = vpop.f32.mrf.mxu0 }
0x18b2   :  { %1486 = vrot.lane.b32.xlu0 %v1475_v9, %s4064_s19  ;;  %v1478_v26 = vadd.f32 %v1475_v9, %v1161_v25 }
0x18b4   :  { %v3306_v0 = vmul.f32 -1.442695, %v1478_v26 }
0x18b6   :  { %3949 = vpow2.f32 %v3306_v0 }
0x18c3   :  { %v3950_v27 = vpop.eup %3949 }
0x18c4   :  { %v1482_v28 = vadd.f32 1.0, %v3950_v27 }
0x18c6   :  { %3951 = vrcp.f32 %v1482_v28 }
0x18d3   :  { %v3952_v29 = vpop.eup %3951 }
0x18d4   :  { %v1496_v35 = vsub.f32 1.0, %v3952_v29  ;;  %v1502_v37 = vmul.f32 %v3952_v29, %v1400_v16 }
0x1924   :  { %v1487_v30 = vpop.permute.xlu0 %1486 }
0x1925   :  { %v1489_v31 = vmul.f32 %v3952_v29, %v1487_v30  ;;  %v1176_v29 = vadd.f32 %v4464_v20, %v4415_v19 }
0x1927   :  { %1491 = vrot.lane.b32.xlu1 %v1489_v31, %s4064_s19 }
0x1999   :  { %v1492_v32 = vpop.permute.xlu1 %1491 }
0x199a   :  { %v1494_v33 = vadd.f32 %v1492_v32, %v1161_v25 }
0x199c   :  { %3953 = vtanh.f32 %v1494_v33 }
0x19a9   :  { %v3954_v34 = vpop.eup %3953 }
0x19aa   :  { %1498 = vrot.lane.b32.xlu0 %v3954_v34, %s4065_s22 }
0x1a1c   :  { %v1499_v36 = vpop.permute.xlu0 %1498 }
0x1a1d   :  { %v1501_v38 = vmul.f32 %v1499_v36, %v1496_v35  ;;  %v3320_v36 = vld [vmem:[%s4811_s1 + $0x58] sm:$0xff] }
0x1a1f   :  { %v1503_v39 = vadd.f32 %v1502_v37, %v1501_v38 }
0x1a21   :  { %1505 = vrot.lane.b32.xlu1 %v1503_v39, %s4065_s22 }
0x1a93   :  { %v1506_v40 = vpop.permute.xlu1 %1505 }
0x1a94   :  { %1508 = vst.msk [vmem:[#allocation2 + $0x10] sm:$0xff] %vm73_vm1, %v1506_v40  ;;  %3695 = vmatmul.mubr.msk.f32.vlgmr.msra.gmra.mxu1 %vm73_vm1, %v1506_v40 }
0x1a95   :  { %3709 = vmatpush3.msra.mxu1 %v4359_v56  ;;  %3716 = vmatprep.mubr.msk.f32.mxu1 %vm4063_vm0, %v4062_v1 }
0x1a96   :  { %3710 = vmatprep.subr.mxu1 %v4062_v1 }
0x1a97   :  { %3711 = vmatpush3.msra.mxu1 %v4362_v6 }
0x1a98   :  { %3712 = vmatprep.subr.mxu1 %v4062_v1 }
0x1a99   :  { %3713 = vmatpush3.msra.mxu1 %v4366_v57 }
0x1a9a   :  { %3714 = vmatprep.subr.mxu1 %v4062_v1 }
0x1a9b   :  { %3715 = vmatpush3.msra.mxu1 %v4370_v58 }
0x1a9c   :  { %3730 = vmatprep.subr.mxu1 %v4062_v1 }
0x1b54   :  { %v1577_v12 = vpop.f32.mrf.mxu1 }
0x1b55   :  { %v1578_v17 = vadd.f32 %v4406_v13, %v1577_v12 }
0x1b56   :  { %v3696_v4 = vpop.f32.mrf.mxu1 }
0x1b57   :  { %1589 = vrot.lane.b32.xlu0 %v1578_v17, %s4064_s19  ;;  %v1581_v42 = vadd.f32 %v1578_v17, %v1166_v41  ;;  %v3319_v4 = vld [vmem:[%s4811_s1 + $0x50] sm:$0xff] }
0x1b59   :  { %v3308_v43 = vmul.f32 -1.442695, %v1581_v42  ;;  %v3318_v42 = vld [vmem:[%s4811_s1 + $0x48] sm:$0xff] }
0x1b5b   :  { %3955 = vpow2.f32 %v3308_v43  ;;  %v3317_v43 = vld [vmem:[%s4811_s1 + $0x40] sm:$0xff] }
0x1b68   :  { %v3956_v44 = vpop.eup %3955 }
0x1b69   :  { %v1585_v45 = vadd.f32 1.0, %v3956_v44  ;;  %v2025_v44 = vld [vmem:[#allocation2 + $0x8] sm:$0xff] }
0x1b6b   :  { %3957 = vrcp.f32 %v1585_v45  ;;  %v2026_v45 = vld [vmem:[#allocation2 + $0x10] sm:$0xff] }
0x1b78   :  { %v3958_v46 = vpop.eup %3957 }
0x1b79   :  { %v1599_v52 = vsub.f32 1.0, %v3958_v46  ;;  %v1605_v54 = vmul.f32 %v3958_v46, %v1503_v39 }
0x1bc9   :  { %v1590_v47 = vpop.permute.xlu0 %1589 }
0x1bca   :  { %v1592_v48 = vmul.f32 %v3958_v46, %v1590_v47 }
0x1bcc   :  { %1594 = vrot.lane.b32.xlu1 %v1592_v48, %s4064_s19 }
0x1c3e   :  { %v1595_v49 = vpop.permute.xlu1 %1594 }
0x1c3f   :  { %v1597_v50 = vadd.f32 %v1595_v49, %v1166_v41  ;;  %v2024_v41 = vld [vmem:[#allocation2] sm:$0xff] }
0x1c41   :  { %3959 = vtanh.f32 %v1597_v50 }
0x1c4e   :  { %v3960_v51 = vpop.eup %3959 }
0x1c4f   :  { %1601 = vrot.lane.b32.xlu0 %v3960_v51, %s4065_s22 }
0x1cc1   :  { %v1602_v53 = vpop.permute.xlu0 %1601 }
0x1cc2   :  { %v1604_v55 = vmul.f32 %v1602_v53, %v1599_v52  ;;  %v1181_v52 = vadd.f32 %v4415_v19, %v4470_v22  ;;  %v4563_v22 = vld [vmem:[#allocation4 + $0x50] sm:$0xff] }
0x1cc4   :  { %v1606_v59 = vadd.f32 %v1605_v54, %v1604_v55 }
0x1cc6   :  { %1608 = vrot.lane.b32.xlu1 %v1606_v59, %s4065_s22 }
0x1d38   :  { %v1609_v60 = vpop.permute.xlu1 %1608 }
0x1d39   :  { %1611 = vst.msk [vmem:[#allocation2 + $0x18] sm:$0xff] %vm73_vm1, %v1609_v60  ;;  %3706 = vmatmul.mubr.msk.f32.vlgmr.msra.gmra.mxu0 %vm73_vm1, %v1609_v60 }
0x1d3a   :  { %3720 = vmatpush3.msra.mxu0 %v4359_v56  ;;  %3727 = vmatprep.mubr.msk.f32.mxu0 %vm4063_vm0, %v4062_v1 }
0x1d3b   :  { %3721 = vmatprep.subr.mxu0 %v4062_v1 }
0x1d3c   :  { %3722 = vmatpush3.msra.mxu0 %v4362_v6 }
0x1d3d   :  { %3723 = vmatprep.subr.mxu0 %v4062_v1 }
0x1d3e   :  { %3724 = vmatpush3.msra.mxu0 %v4366_v57 }
0x1d3f   :  { %3725 = vmatprep.subr.mxu0 %v4062_v1 }
0x1d40   :  { %3726 = vmatpush3.msra.mxu0 %v4370_v58  ;;  %v2027_v46 = vld [vmem:[#allocation2 + $0x18] sm:$0xff] }
0x1d41   :  { %3741 = vmatprep.subr.mxu0 %v3320_v36 }
0x1df9   :  { %v1680_v61 = vpop.f32.mrf.mxu0 }
0x1dfa   :  { %v1681_v62 = vadd.f32 %v4406_v13, %v1680_v61 }
0x1dfb   :  { %v3707_v63 = vpop.f32.mrf.mxu0 }
0x1dfc   :  { %1692 = vrot.lane.b32.xlu0 %v1681_v62, %s4064_s19  ;;  %v1684_v10 = vadd.f32 %v1681_v62, %v1171_v8 }
0x1dfe   :  { %v3310_v11 = vmul.f32 -1.442695, %v1684_v10 }
0x1e00   :  { %3961 = vpow2.f32 %v3310_v11  ;;  %v4560_v11 = vld [vmem:[#allocation4 + $0x58] sm:$0xff] }
0x1e0d   :  { %v3962_v2 = vpop.eup %3961 }
0x1e0e   :  { %v1688_v14 = vadd.f32 1.0, %v3962_v2  ;;  %v4567_v2 = vld [vmem:[#allocation4 + $0x48] sm:$0xff] }
0x1e10   :  { %3963 = vrcp.f32 %v1688_v14  ;;  %v4571_v14 = vld [vmem:[#allocation4 + $0x40] sm:$0xff] }
0x1e1d   :  { %v3964_v15 = vpop.eup %3963 }
0x1e1e   :  { %v1702_v9 = vsub.f32 1.0, %v3964_v15  ;;  %v1708_v21 = vmul.f32 %v3964_v15, %v1606_v59 }
0x1e6e   :  { %v1693_v16 = vpop.permute.xlu0 %1692 }
0x1e6f   :  { %v1695_v3 = vmul.f32 %v3964_v15, %v1693_v16 }
0x1e71   :  { %1697 = vrot.lane.b32.xlu1 %v1695_v3, %s4064_s19 }
0x1ee3   :  { %v1698_v18 = vpop.permute.xlu1 %1697 }
0x1ee4   :  { %v1700_v5 = vadd.f32 %v1698_v18, %v1171_v8 }
0x1ee6   :  { %3965 = vtanh.f32 %v1700_v5 }
0x1ef3   :  { %v3966_v23 = vpop.eup %3965 }
0x1ef4   :  { %1704 = vrot.lane.b32.xlu0 %v3966_v23, %s4065_s22 }
0x1f66   :  { %v1705_v24 = vpop.permute.xlu0 %1704 }
0x1f67   :  { %v1707_v25 = vmul.f32 %v1705_v24, %v1702_v9 }
0x1f69   :  { %v1709_v26 = vadd.f32 %v1708_v21, %v1707_v25  ;;  %v4607_v25 = vld [vmem:[%s4814_s4 + $0x2] ss:$0 sm:$0xff] }
0x1f6b   :  { %1711 = vrot.lane.b32.xlu1 %v1709_v26, %s4065_s22 }
0x1fdd   :  { %v1712_v0 = vpop.permute.xlu1 %1711 }
0x1fde   :  { %1714 = vst.msk [vmem:[#allocation2 + $0x20] sm:$0xff] %vm73_vm1, %v1712_v0  ;;  %3717 = vmatmul.mubr.msk.f32.vlgmr.msra.gmra.mxu1 %vm73_vm1, %v1712_v0 }
0x1fdf   :  { %3731 = vmatpush3.msra.mxu1 %v4359_v56  ;;  %3738 = vmatprep.mubr.msk.f32.mxu1 %vm4063_vm0, %v4062_v1 }
0x1fe0   :  { %3732 = vmatprep.subr.mxu1 %v4062_v1 }
0x1fe1   :  { %3733 = vmatpush3.msra.mxu1 %v4362_v6 }
0x1fe2   :  { %3734 = vmatprep.subr.mxu1 %v4062_v1 }
0x1fe3   :  { %3735 = vmatpush3.msra.mxu1 %v4366_v57 }
0x1fe4   :  { %3736 = vmatprep.subr.mxu1 %v4062_v1 }
0x1fe5   :  { %3737 = vmatpush3.msra.mxu1 %v4370_v58  ;;  %v2028_v47 = vld [vmem:[#allocation2 + $0x20] sm:$0xff] }
0x1fe6   :  { %3761 = vmatprep.subr.mxu1 %v4062_v1 }
0x209e   :  { %v1783_v27 = vpop.f32.mrf.mxu1 }
0x209f   :  { %v1784_v56 = vadd.f32 %v4406_v13, %v1783_v27 }
0x20a0   :  { %v3718_v28 = vpop.f32.mrf.mxu1 }
0x20a1   :  { %1795 = vrot.lane.b32.xlu0 %v1784_v56, %s4064_s19  ;;  %v1787_v6 = vadd.f32 %v1784_v56, %v1176_v29 }
0x20a3   :  { %v3312_v30 = vmul.f32 -1.442695, %v1787_v6 }
0x20a5   :  { %3967 = vpow2.f32 %v3312_v30 }
0x20b2   :  { %v3968_v31 = vpop.eup %3967 }
0x20b3   :  { %v1791_v57 = vadd.f32 1.0, %v3968_v31 }
0x20b5   :  { %3969 = vrcp.f32 %v1791_v57 }
0x20c2   :  { %v3970_v32 = vpop.eup %3969 }
0x20c3   :  { %v1805_v37 = vsub.f32 1.0, %v3970_v32  ;;  %v1811_v39 = vmul.f32 %v3970_v32, %v1709_v26 }
0x2113   :  { %v1796_v33 = vpop.permute.xlu0 %1795 }
0x2114   :  { %v1798_v58 = vmul.f32 %v3970_v32, %v1796_v33 }
0x2116   :  { %1800 = vrot.lane.b32.xlu1 %v1798_v58, %s4064_s19 }
0x2188   :  { %v1801_v34 = vpop.permute.xlu1 %1800 }
0x2189   :  { %v1803_v35 = vadd.f32 %v1801_v34, %v1176_v29  ;;  %v4616_v29 = vld [vmem:[%s4813_s3 + $0x2] ss:$0 sm:$0xff] }
0x218b   :  { %3971 = vtanh.f32 %v1803_v35 }
0x2198   :  { %v3972_v20 = vpop.eup %3971 }
0x2199   :  { %1807 = vrot.lane.b32.xlu0 %v3972_v20, %s4065_s22 }
0x220b   :  { %v1808_v38 = vpop.permute.xlu0 %1807 }
0x220c   :  { %v1810_v40 = vmul.f32 %v1808_v38, %v1805_v37  ;;  %v1186_v38 = vadd.f32 %v4468_v7, %v4415_v19 }
0x220e   :  { %v1812_v12 = vadd.f32 %v1811_v39, %v1810_v40 }
0x2210   :  { %1814 = vrot.lane.b32.xlu1 %v1812_v12, %s4065_s22 }
0x2282   :  { %v1815_v17 = vpop.permute.xlu1 %1814 }
0x2283   :  { %1817 = vst.msk [vmem:[#allocation2 + $0x28] sm:$0xff] %vm73_vm1, %v1815_v17  ;;  %3728 = vmatmul.mubr.msk.f32.vlgmr.msra.gmra.mxu0 %vm73_vm1, %v1815_v17 }
0x2284   :  { %3742 = vmatpush3.msra.mxu0 %v3320_v36  ;;  %3749 = vmatprep.mubr.msk.f32.mxu0 %vm73_vm1, %v2024_v41 }
0x2285   :  { %3743 = vmatprep.subr.mxu0 %v3319_v4 }
0x2286   :  { %3744 = vmatpush3.msra.mxu0 %v3319_v4 }
0x2287   :  { %3745 = vmatprep.subr.mxu0 %v3318_v42 }
0x2288   :  { %3746 = vmatpush3.msra.mxu0 %v3318_v42 }
0x2289   :  { %3747 = vmatprep.subr.mxu0 %v3317_v43 }
0x228a   :  { %3748 = vmatpush3.msra.mxu0 %v3317_v43  ;;  %v2029_v48 = vld [vmem:[#allocation2 + $0x28] sm:$0xff] }
0x228b   :  { %3750 = vmatmul.mubr.msk.f32.vlgmr.msra.gmra.mxu0 %vm73_vm1, %v2025_v44  ;;  %3783 = vmatprep.subr.mxu0 %v4062_v1 }
0x228c   :  { %3752 = vmatprep.mubr.msk.f32.mxu0 %vm73_vm1, %v2026_v45  ;;  %3784 = vmatpush3.msra.mxu0 %v4560_v11 }
0x228d   :  { %3785 = vmatprep.subr.mxu0 %v4062_v1 }
0x228e   :  { %3786 = vmatpush3.msra.mxu0 %v4563_v22 }
0x228f   :  { %3753 = vmatmul.mubr.msk.f32.gmra.mxu0 %vm73_vm1, %v2027_v46  ;;  %3787 = vmatprep.subr.mxu0 %v4062_v1 }
0x2290   :  { %3755 = vmatprep.mubr.msk.f32.mxu0 %vm73_vm1, %v2028_v47  ;;  %3788 = vmatpush3.msra.mxu0 %v4567_v2 }
0x2291   :  { %3789 = vmatprep.subr.mxu0 %v4062_v1 }
0x2292   :  { %3790 = vmatpush3.msra.mxu0 %v4571_v14 }
0x2293   :  { %3756 = vmatmul.mubr.msk.f32.gmra.mxu0 %vm73_vm1, %v2029_v48  ;;  %3805 = vmatprep.subr.mxu0 %v4062_v1 }
0x2343   :  { %v1886_v49 = vpop.f32.mrf.mxu0 }
0x2344   :  { %v1887_v50 = vadd.f32 %v4406_v13, %v1886_v49 }
0x2345   :  { %v3729_v51 = vpop.f32.mrf.mxu0 }
0x2346   :  { %1898 = vrot.lane.b32.xlu0 %v1887_v50, %s4064_s19  ;;  %v1890_v53 = vadd.f32 %v1887_v50, %v1181_v52 }
0x2348   :  { %v3314_v54 = vmul.f32 -1.442695, %v1890_v53 }
0x234a   :  { %3973 = vpow2.f32 %v3314_v54 }
0x234b   :  { %v4611_v56 = vpop.f32.mrf.mxu0 }
0x234d   :  { %v2135_v28 = vpop.f32.mrf.mxu0 }
0x234e   :  { %v2136_v6 = vadd.f32 %v4616_v29, %v2135_v28 }
0x234f   :  { %v3754_v28 = vpop.f32.mrf.mxu0 }
0x2357   :  { %v3974_v55 = vpop.eup %3973 }
0x2358   :  { %v1894_v59 = vadd.f32 1.0, %v3974_v55 }
0x235a   :  { %3975 = vrcp.f32 %v1894_v59 }
0x2367   :  { %v3976_v60 = vpop.eup %3975 }
0x2368   :  { %v1908_v15 = vsub.f32 1.0, %v3976_v60  ;;  %v1914_v3 = vmul.f32 %v3976_v60, %v1812_v12 }
0x23b8   :  { %v1899_v61 = vpop.permute.xlu0 %1898 }
0x23b9   :  { %v1901_v62 = vmul.f32 %v3976_v60, %v1899_v61 }
0x23bb   :  { %1903 = vrot.lane.b32.xlu1 %v1901_v62, %s4064_s19  ;;  %v2141_v62 = vadd.f32 %v4611_v56, %v4616_v29 }
0x242d   :  { %v1904_v63 = vpop.permute.xlu1 %1903 }
0x242e   :  { %v1906_v8 = vadd.f32 %v1904_v63, %v1181_v52 }
0x2430   :  { %3977 = vtanh.f32 %v1906_v8 }
0x243d   :  { %v3978_v10 = vpop.eup %3977 }
0x243e   :  { %1910 = vrot.lane.b32.xlu0 %v3978_v10, %s4065_s22 }
0x24b0   :  { %v1911_v16 = vpop.permute.xlu0 %1910 }
0x24b1   :  { %v1913_v18 = vmul.f32 %v1911_v16, %v1908_v15 }
0x24b3   :  { %v4576_v5 = vadd.f32 %v1914_v3, %v1913_v18 }
0x24b5   :  { %1917 = vrot.lane.b32.xlu1 %v4576_v5, %s4065_s22 }
0x2527   :  { %v1918_v23 = vpop.permute.xlu1 %1917 }
0x2528   :  { %1920 = vst.msk [vmem:[#allocation2 + $0x30] sm:$0xff] %vm73_vm1, %v1918_v23  ;;  %3739 = vmatmul.mubr.msk.f32.vlgmr.msra.gmra.mxu1 %vm73_vm1, %v1918_v23 }
0x2529   :  { %3762 = vmatpush3.msra.mxu1 %v4560_v11  ;;  %3769 = vmatprep.mubr.msk.f32.mxu1 %vm4063_vm0, %v4062_v1 }
0x252a   :  { %3763 = vmatprep.subr.mxu1 %v4062_v1 }
0x252b   :  { %3764 = vmatpush3.msra.mxu1 %v4563_v22 }
0x252c   :  { %3765 = vmatprep.subr.mxu1 %v4062_v1 }
0x252d   :  { %3766 = vmatpush3.msra.mxu1 %v4567_v2 }
0x252e   :  { %3767 = vmatprep.subr.mxu1 %v4062_v1 }
0x252f   :  { %3768 = vmatpush3.msra.mxu1 %v4571_v14  ;;  %v2030_v9 = vld [vmem:[#allocation2 + $0x30] sm:$0xff] }
0x2530   :  { %3770 = vmatmul.mubr.f32.vlgmr.msra.gmra.mxu1 %v4062_v1  ;;  %3758 = vmatprep.mubr.msk.f32.mxu0 %vm73_vm1, %v2030_v9 }
0x2531   :  { %3772 = vmatprep.subr.mxu1 %v4062_v1  ;;  %3780 = vmatprep.mubr.msk.f32.mxu1 %vm4063_vm0, %v4062_v1 }
0x2532   :  { %3773 = vmatpush3.msra.mxu1 %v4560_v11 }
0x2533   :  { %3774 = vmatprep.subr.mxu1 %v4062_v1 }
0x2534   :  { %3775 = vmatpush3.msra.mxu1 %v4563_v22 }
0x2535   :  { %3776 = vmatprep.subr.mxu1 %v4062_v1 }
0x2536   :  { %3777 = vmatpush3.msra.mxu1 %v4567_v2 }
0x2537   :  { %3778 = vmatprep.subr.mxu1 %v4062_v1 }
0x2538   :  { %3779 = vmatpush3.msra.mxu1 %v4571_v14 }
0x2539   :  { %3794 = vmatprep.subr.mxu1 %v4062_v1 }
0x25e8   :  { %v1989_v24 = vpop.f32.mrf.mxu1 }
0x25e9   :  { %v1990_v37 = vadd.f32 %v4406_v13, %v1989_v24 }
0x25ea   :  { %v3740_v21 = vpop.f32.mrf.mxu1 }
0x25eb   :  { %v1993_v39 = vadd.f32 %v1990_v37, %v1186_v38 }
0x25ed   :  { %v3316_v40 = vmul.f32 -1.442695, %v1993_v39 }
0x25f0   :  { %v2253_v26 = vpop.f32.mrf.mxu1 }
0x25f1   :  { %v2254_v0 = vadd.f32 %v4607_v25, %v2253_v26 }
0x25f2   :  { %v3771_v27 = vpop.f32.mrf.mxu1 }
0x25f3   :  { %2265 = vrot.lane.b32.xlu0 %v2254_v0, %s4064_s19  ;;  %v2257_v30 = vadd.f32 %v2254_v0, %v2136_v6 }
0x25f5   :  { %v3333_v31 = vmul.f32 -1.442695, %v2257_v30 }
0x25f7   :  { %3979 = vpow2.f32 %v3333_v31 }
0x2604   :  { %v3980_v57 = vpop.eup %3979 }
0x2605   :  { %v2261_v32 = vadd.f32 1.0, %v3980_v57 }
0x2607   :  { %3981 = vrcp.f32 %v2261_v32 }
0x2614   :  { %v3982_v33 = vpop.eup %3981 }
0x2615   :  { %v2275_v4 = vsub.f32 1.0, %v3982_v33  ;;  %v2281_v42 = vmul.f32 0.0, %v3982_v33 }
0x2665   :  { %v2266_v58 = vpop.permute.xlu0 %2265 }
0x2666   :  { %v2268_v34 = vmul.f32 %v3982_v33, %v2266_v58 }
0x2668   :  { %2270 = vrot.lane.b32.xlu1 %v2268_v34, %s4064_s19 }
0x26da   :  { %v2271_v35 = vpop.permute.xlu1 %2270 }
0x26db   :  { %v2273_v36 = vadd.f32 %v2271_v35, %v2136_v6  ;;  %v2145_v6 = vpop.f32.mrf.mxu0 }
0x26dc   :  { %v2146_v35 = vadd.f32 %v4616_v29, %v2145_v6 }
0x26dd   :  { %3983 = vtanh.f32 %v2273_v36  ;;  %v4663_v30 = vpop.f32.mrf.mxu0 }
0x26de   :  { %3985 = vpow2.f32 %v3316_v40 }
0x26df   :  { %v4665_v31 = vpop.f32.mrf.mxu0 }
0x26ea   :  { %v3984_v20 = vpop.eup %3983 }
0x26eb   :  { %2277 = vrot.lane.b32.xlu0 %v3984_v20, %s4065_s22  ;;  %v3986_v12 = vpop.eup %3985 }
0x26ec   :  { %v1997_v17 = vadd.f32 1.0, %v3986_v12 }
0x26ee   :  { %3987 = vrcp.f32 %v1997_v17 }
0x26ef   :  { %2001 = vrot.lane.b32.xlu0 %v1990_v37, %s4064_s19 }
0x26fb   :  { %v3988_v45 = vpop.eup %3987 }
0x26fc   :  { %v2011_v49 = vsub.f32 1.0, %v3988_v45  ;;  %v2017_v51 = vmul.f32 %v3988_v45, %v4576_v5 }
0x275d   :  { %v2278_v41 = vpop.permute.xlu0 %2277 }
0x275e   :  { %v2280_v43 = vmul.f32 %v2278_v41, %v2275_v4 }
0x2760   :  { %v2282_v44 = vadd.f32 %v2281_v42, %v2280_v43 }
0x2761   :  { %v2002_v46 = vpop.permute.xlu0 %2001 }
0x2762   :  { %v2004_v47 = vmul.f32 %v3988_v45, %v2002_v46  ;;  %2284 = vrot.lane.b32.xlu1 %v2282_v44, %s4065_s22 }
0x2764   :  { %2006 = vrot.lane.b32.xlu0 %v2004_v47, %s4064_s19 }
0x27d4   :  { %v2285_v13 = vpop.permute.xlu1 %2284 }
0x27d5   :  { %3781 = vmatmul.mubr.msk.f32.vlgmr.msra.gmra.mxu1 %vm73_vm1, %v2285_v13 }
0x27d6   :  { %v2007_v19 = vpop.permute.xlu0 %2006  ;;  %3795 = vmatpush3.msra.mxu1 %v4560_v11  ;;  %3802 = vmatprep.mubr.msk.f32.mxu1 %vm4063_vm0, %v4062_v1 }
0x27d7   :  { %v2009_v7 = vadd.f32 %v2007_v19, %v1186_v38  ;;  %3796 = vmatprep.subr.mxu1 %v4062_v1 }
0x27d8   :  { %3797 = vmatpush3.msra.mxu1 %v4563_v22 }
0x27d9   :  { %3989 = vtanh.f32 %v2009_v7  ;;  %3798 = vmatprep.subr.mxu1 %v4062_v1 }
0x27da   :  { %3799 = vmatpush3.msra.mxu1 %v4567_v2 }
0x27db   :  { %3800 = vmatprep.subr.mxu1 %v4062_v1 }
0x27dc   :  { %3801 = vmatpush3.msra.mxu1 %v4571_v14 }
0x27dd   :  { %3816 = vmatprep.subr.mxu1 %v4062_v1 }
0x27e6   :  { %v3990_v48 = vpop.eup %3989 }
0x27e7   :  { %2013 = vrot.lane.b32.xlu0 %v3990_v48, %s4065_s22  ;;  %v2151_v48 = vadd.f32 %v3754_v28, %v4616_v29 }
0x2859   :  { %v2014_v50 = vpop.permute.xlu0 %2013 }
0x285a   :  { %v2016_v52 = vmul.f32 %v2014_v50, %v2011_v49 }
0x285c   :  { %v2018_v53 = vadd.f32 %v2017_v51, %v2016_v52 }
0x285e   :  { %2020 = vrot.lane.b32.xlu0 %v2018_v53, %s4065_s22 }
0x2895   :  { %v2354_v54 = vpop.f32.mrf.mxu1 }
0x2896   :  { %v2355_v55 = vadd.f32 %v4607_v25, %v2354_v54 }
0x2897   :  { %v3782_v59 = vpop.f32.mrf.mxu1 }
0x2898   :  { %2366 = vrot.lane.b32.xlu1 %v2355_v55, %s4064_s19  ;;  %v2358_v63 = vadd.f32 %v2355_v55, %v2141_v62 }
0x289a   :  { %v3335_v8 = vmul.f32 -1.442695, %v2358_v63 }
0x289c   :  { %3991 = vpow2.f32 %v3335_v8 }
0x28a9   :  { %v3992_v10 = vpop.eup %3991 }
0x28aa   :  { %v2362_v15 = vadd.f32 1.0, %v3992_v10 }
0x28ac   :  { %3993 = vrcp.f32 %v2362_v15 }
0x28b9   :  { %v3994_v16 = vpop.eup %3993 }
0x28ba   :  { %v2376_v24 = vsub.f32 1.0, %v3994_v16  ;;  %v2382_v26 = vmul.f32 %v3994_v16, %v2282_v44 }
0x28d0   :  { %v2021_v60 = vpop.permute.xlu0 %2020 }
0x28d1   :  { %2023 = vst.msk [vmem:[#allocation2 + $0x38] sm:$0xff] %vm73_vm1, %v2021_v60 }
0x28d8   :  { %v2031_v61 = vld [vmem:[#allocation2 + $0x38] sm:$0xff] }
0x28d9   :  { %3759 = vmatmul.mubr.msk.f32.gmra.mxu0 %vm73_vm1, %v2031_v61 }
0x28da   :  { %3791 = vmatprep.mubr.msk.f32.mxu0 %vm4063_vm0, %v4062_v1 }
0x290a   :  { %v2367_v3 = vpop.permute.xlu1 %2366 }
0x290b   :  { %v2369_v18 = vmul.f32 %v3994_v16, %v2367_v3 }
0x290d   :  { %2371 = vrot.lane.b32.xlu1 %v2369_v18, %s4064_s19 }
0x297f   :  { %v2372_v5 = vpop.permute.xlu1 %2371 }
0x2980   :  { %v2374_v23 = vadd.f32 %v2372_v5, %v2141_v62 }
0x2982   :  { %3995 = vtanh.f32 %v2374_v23  ;;  %v2156_v23 = vadd.f32 %v4616_v29, %v4665_v31 }
0x298f   :  { %v3996_v9 = vpop.eup %3995 }
0x2990   :  { %2378 = vrot.lane.b32.xlu1 %v3996_v9, %s4065_s22 }
0x2999   :  { %v4667_v57 = vpop.f32.mrf.mxu0 }
0x299b   :  { %v4669_v32 = vpop.f32.mrf.mxu0 }
0x2a02   :  { %v2379_v21 = vpop.permute.xlu1 %2378 }
0x2a03   :  { %v2381_v0 = vmul.f32 %v2379_v21, %v2376_v24 }
0x2a05   :  { %v2383_v27 = vadd.f32 %v2382_v26, %v2381_v0 }
0x2a07   :  { %2385 = vrot.lane.b32.xlu1 %v2383_v27, %s4065_s22 }
0x2a79   :  { %v2386_v56 = vpop.permute.xlu1 %2385 }
0x2a7a   :  { %3792 = vmatmul.mubr.msk.f32.vlgmr.msra.gmra.mxu0 %vm73_vm1, %v2386_v56 }
0x2a7b   :  { %3806 = vmatpush3.msra.mxu0 %v4560_v11  ;;  %3813 = vmatprep.mubr.msk.f32.mxu0 %vm4063_vm0, %v4062_v1 }
0x2a7c   :  { %3807 = vmatprep.subr.mxu0 %v4062_v1 }
0x2a7d   :  { %3808 = vmatpush3.msra.mxu0 %v4563_v22 }
0x2a7e   :  { %3809 = vmatprep.subr.mxu0 %v4062_v1 }
0x2a7f   :  { %3810 = vmatpush3.msra.mxu0 %v4567_v2 }
0x2a80   :  { %3811 = vmatprep.subr.mxu0 %v4062_v1 }
0x2a81   :  { %3812 = vmatpush3.msra.mxu0 %v4571_v14 }
0x2a82   :  { %3827 = vmatprep.subr.mxu0 %v4062_v1 }
0x2b3a   :  { %v2455_v33 = vpop.f32.mrf.mxu0 }
0x2b3b   :  { %v2456_v58 = vadd.f32 %v4607_v25, %v2455_v33 }
0x2b3c   :  { %v3793_v34 = vpop.f32.mrf.mxu0 }
0x2b3d   :  { %2467 = vrot.lane.b32.xlu0 %v2456_v58, %s4064_s19  ;;  %v2459_v36 = vadd.f32 %v2456_v58, %v2146_v35 }
0x2b3f   :  { %v3337_v20 = vmul.f32 -1.442695, %v2459_v36 }
0x2b41   :  { %3997 = vpow2.f32 %v3337_v20 }
0x2b4e   :  { %v3998_v37 = vpop.eup %3997 }
0x2b4f   :  { %v2463_v38 = vadd.f32 1.0, %v3998_v37 }
0x2b51   :  { %3999 = vrcp.f32 %v2463_v38 }
0x2b5e   :  { %v4000_v39 = vpop.eup %3999 }
0x2b5f   :  { %v2477_v42 = vsub.f32 1.0, %v4000_v39  ;;  %v2483_v44 = vmul.f32 %v4000_v39, %v2383_v27 }
0x2baf   :  { %v2468_v40 = vpop.permute.xlu0 %2467 }
0x2bb0   :  { %v2470_v12 = vmul.f32 %v4000_v39, %v2468_v40  ;;  %v2161_v39 = vadd.f32 %v4663_v30, %v4616_v29 }
0x2bb2   :  { %2472 = vrot.lane.b32.xlu1 %v2470_v12, %s4064_s19 }
0x2c24   :  { %v2473_v17 = vpop.permute.xlu1 %2472 }
0x2c25   :  { %v2475_v4 = vadd.f32 %v2473_v17, %v2146_v35 }
0x2c27   :  { %4001 = vtanh.f32 %v2475_v4 }
0x2c34   :  { %v4002_v41 = vpop.eup %4001 }
0x2c35   :  { %2479 = vrot.lane.b32.xlu0 %v4002_v41, %s4065_s22 }
0x2ca7   :  { %v2480_v43 = vpop.permute.xlu0 %2479 }
0x2ca8   :  { %v2482_v45 = vmul.f32 %v2480_v43, %v2477_v42 }
0x2caa   :  { %v2484_v46 = vadd.f32 %v2483_v44, %v2482_v45 }
0x2cac   :  { %2486 = vrot.lane.b32.xlu1 %v2484_v46, %s4065_s22 }
0x2d1e   :  { %v2487_v47 = vpop.permute.xlu1 %2486 }
0x2d1f   :  { %3803 = vmatmul.mubr.msk.f32.vlgmr.msra.gmra.mxu1 %vm73_vm1, %v2487_v47 }
0x2d20   :  { %3817 = vmatpush3.msra.mxu1 %v4560_v11  ;;  %3824 = vmatprep.mubr.msk.f32.mxu1 %vm4063_vm0, %v4062_v1 }
0x2d21   :  { %3818 = vmatprep.subr.mxu1 %v4062_v1 }
0x2d22   :  { %3819 = vmatpush3.msra.mxu1 %v4563_v22 }
0x2d23   :  { %3820 = vmatprep.subr.mxu1 %v4062_v1 }
0x2d24   :  { %3821 = vmatpush3.msra.mxu1 %v4567_v2 }
0x2d25   :  { %3822 = vmatprep.subr.mxu1 %v4062_v1 }
0x2d26   :  { %3823 = vmatpush3.msra.mxu1 %v4571_v14 }
0x2d27   :  { %3838 = vmatprep.subr.mxu1 %v4062_v1 }
0x2ddf   :  { %v2556_v13 = vpop.f32.mrf.mxu1 }
0x2de0   :  { %v2557_v19 = vadd.f32 %v4607_v25, %v2556_v13 }
0x2de1   :  { %v3804_v7 = vpop.f32.mrf.mxu1 }
0x2de2   :  { %2568 = vrot.lane.b32.xlu0 %v2557_v19, %s4064_s19  ;;  %v2560_v49 = vadd.f32 %v2557_v19, %v2151_v48 }
0x2de4   :  { %v3339_v50 = vmul.f32 -1.442695, %v2560_v49  ;;  %v2166_v49 = vadd.f32 %v4616_v29, %v4669_v32 }
0x2de6   :  { %4003 = vpow2.f32 %v3339_v50 }
0x2df3   :  { %v4004_v51 = vpop.eup %4003 }
0x2df4   :  { %v2564_v52 = vadd.f32 1.0, %v4004_v51 }
0x2df6   :  { %4005 = vrcp.f32 %v2564_v52 }
0x2e03   :  { %v4006_v53 = vpop.eup %4005 }
0x2e04   :  { %v2578_v62 = vsub.f32 1.0, %v4006_v53  ;;  %v2584_v8 = vmul.f32 %v4006_v53, %v2484_v46 }
0x2e54   :  { %v2569_v54 = vpop.permute.xlu0 %2568 }
0x2e55   :  { %v2571_v55 = vmul.f32 %v4006_v53, %v2569_v54 }
0x2e57   :  { %2573 = vrot.lane.b32.xlu1 %v2571_v55, %s4064_s19 }
0x2ec9   :  { %v2574_v59 = vpop.permute.xlu1 %2573 }
0x2eca   :  { %v2576_v60 = vadd.f32 %v2574_v59, %v2151_v48 }
0x2ecc   :  { %4007 = vtanh.f32 %v2576_v60 }
0x2ed9   :  { %v4008_v61 = vpop.eup %4007 }
0x2eda   :  { %2580 = vrot.lane.b32.xlu0 %v4008_v61, %s4065_s22 }
0x2f4c   :  { %v2581_v63 = vpop.permute.xlu0 %2580 }
0x2f4d   :  { %v2583_v10 = vmul.f32 %v2581_v63, %v2578_v62 }
0x2f4f   :  { %v2585_v15 = vadd.f32 %v2584_v8, %v2583_v10 }
0x2f51   :  { %2587 = vrot.lane.b32.xlu1 %v2585_v15, %s4065_s22 }
0x2fc3   :  { %v2588_v16 = vpop.permute.xlu1 %2587 }
0x2fc4   :  { %3814 = vmatmul.mubr.msk.f32.vlgmr.msra.gmra.mxu0 %vm73_vm1, %v2588_v16 }
0x2fc5   :  { %3828 = vmatpush3.msra.mxu0 %v4560_v11  ;;  %3835 = vmatprep.mubr.msk.f32.mxu0 %vm4063_vm0, %v4062_v1 }
0x2fc6   :  { %3829 = vmatprep.subr.mxu0 %v4062_v1 }
0x2fc7   :  { %3830 = vmatpush3.msra.mxu0 %v4563_v22 }
0x2fc8   :  { %3831 = vmatprep.subr.mxu0 %v4062_v1 }
0x2fc9   :  { %3832 = vmatpush3.msra.mxu0 %v4567_v2 }
0x2fca   :  { %3833 = vmatprep.subr.mxu0 %v4062_v1 }
0x2fcb   :  { %3834 = vmatpush3.msra.mxu0 %v4571_v14 }
0x2fcc   :  { %3849 = vmatprep.subr.mxu0 %v4062_v1 }
0x3084   :  { %v2657_v3 = vpop.f32.mrf.mxu0 }
0x3085   :  { %v2658_v18 = vadd.f32 %v4607_v25, %v2657_v3 }
0x3086   :  { %v3815_v5 = vpop.f32.mrf.mxu0 }
0x3087   :  { %2669 = vrot.lane.b32.xlu0 %v2658_v18, %s4064_s19  ;;  %v2661_v9 = vadd.f32 %v2658_v18, %v2156_v23 }
0x3089   :  { %v3341_v24 = vmul.f32 -1.442695, %v2661_v9 }
0x308b   :  { %4009 = vpow2.f32 %v3341_v24 }
0x3098   :  { %v4010_v21 = vpop.eup %4009 }
0x3099   :  { %v2665_v26 = vadd.f32 1.0, %v4010_v21 }
0x309b   :  { %4011 = vrcp.f32 %v2665_v26 }
0x30a8   :  { %v4012_v0 = vpop.eup %4011 }
0x30a9   :  { %v2679_v58 = vsub.f32 1.0, %v4012_v0  ;;  %v2685_v31 = vmul.f32 %v4012_v0, %v2585_v15 }
0x30f9   :  { %v2670_v27 = vpop.permute.xlu0 %2669 }
0x30fa   :  { %v2672_v56 = vmul.f32 %v4012_v0, %v2670_v27 }
0x30fc   :  { %2674 = vrot.lane.b32.xlu1 %v2672_v56, %s4064_s19 }
0x316e   :  { %v2675_v28 = vpop.permute.xlu1 %2674 }
0x316f   :  { %v2677_v6 = vadd.f32 %v2675_v28, %v2156_v23  ;;  %v2171_v23 = vadd.f32 %v4667_v57, %v4616_v29  ;;  %v2992_v29 = vld [vmem:[%s4815_s5 + $0x10] sm:$0xff]  ;;  %v2991_v57 = vld [vmem:[%s4815_s5 + $0x8] sm:$0xff] }
0x3171   :  { %4013 = vtanh.f32 %v2677_v6 }
0x317e   :  { %v4014_v33 = vpop.eup %4013 }
0x317f   :  { %2681 = vrot.lane.b32.xlu0 %v4014_v33, %s4065_s22  ;;  %v2990_v33 = vld [vmem:[%s4815_s5] sm:$0xff] }
0x31f1   :  { %v2682_v34 = vpop.permute.xlu0 %2681 }
0x31f2   :  { %v2684_v35 = vmul.f32 %v2682_v34, %v2679_v58 }
0x31f4   :  { %v2686_v36 = vadd.f32 %v2685_v31, %v2684_v35 }
0x31f6   :  { %2688 = vrot.lane.b32.xlu1 %v2686_v36, %s4065_s22 }
0x3268   :  { %v2689_v20 = vpop.permute.xlu1 %2688 }
0x3269   :  { %3825 = vmatmul.mubr.msk.f32.vlgmr.msra.gmra.mxu1 %vm73_vm1, %v2689_v20 }
0x326a   :  { %3839 = vmatpush3.msra.mxu1 %v4560_v11  ;;  %3846 = vmatprep.mubr.msk.f32.mxu1 %vm4063_vm0, %v4062_v1 }
0x326b   :  { %3840 = vmatprep.subr.mxu1 %v4062_v1 }
0x326c   :  { %3841 = vmatpush3.msra.mxu1 %v4563_v22 }
0x326d   :  { %3842 = vmatprep.subr.mxu1 %v4062_v1 }
0x326e   :  { %3843 = vmatpush3.msra.mxu1 %v4567_v2 }
0x326f   :  { %3844 = vmatprep.subr.mxu1 %v4062_v1 }
0x3270   :  { %3845 = vmatpush3.msra.mxu1 %v4571_v14 }
0x3271   :  { %3860 = vmatprep.subr.mxu1 %v4062_v1 }
0x3329   :  { %v2758_v37 = vpop.f32.mrf.mxu1 }
0x332a   :  { %v2759_v11 = vadd.f32 %v4607_v25, %v2758_v37 }
0x332b   :  { %v3826_v38 = vpop.f32.mrf.mxu1 }
0x332c   :  { %2770 = vrot.lane.b32.xlu0 %v2759_v11, %s4064_s19  ;;  %v2762_v22 = vadd.f32 %v2759_v11, %v2161_v39  ;;  %v3084_v11 = vld [vmem:[%s4817_s7 + $0x18] sm:$0xff]  ;;  %v3083_v38 = vld [vmem:[%s4817_s7 + $0x10] sm:$0xff] }
0x332e   :  { %v3343_v40 = vmul.f32 -1.442695, %v2762_v22  ;;  %v3081_v22 = vld [vmem:[%s4817_s7] sm:$0xff] }
0x3330   :  { %4015 = vpow2.f32 %v3343_v40  ;;  %v3348_v40 = vld [vmem:[%s4816_s6] ss:$0 sm:$0xff] }
0x333d   :  { %v4016_v12 = vpop.eup %4015 }
0x333e   :  { %v2766_v2 = vadd.f32 1.0, %v4016_v12 }
0x3340   :  { %4017 = vrcp.f32 %v2766_v2 }
0x334d   :  { %v4018_v17 = vpop.eup %4017 }
0x334e   :  { %v2780_v44 = vsub.f32 1.0, %v4018_v17  ;;  %v2786_v30 = vmul.f32 %v4018_v17, %v2686_v36 }
0x339e   :  { %v2771_v4 = vpop.permute.xlu0 %2770 }
0x339f   :  { %v2773_v14 = vmul.f32 %v4018_v17, %v2771_v4 }
0x33a1   :  { %2775 = vrot.lane.b32.xlu1 %v2773_v14, %s4064_s19 }
0x3413   :  { %v2776_v41 = vpop.permute.xlu1 %2775 }
0x3414   :  { %v2778_v42 = vadd.f32 %v2776_v41, %v2161_v39  ;;  %v3082_v39 = vld [vmem:[%s4817_s7 + $0x8] sm:$0xff] }
0x3416   :  { %4019 = vtanh.f32 %v2778_v42 }
0x3423   :  { %v4020_v43 = vpop.eup %4019 }
0x3424   :  { %2782 = vrot.lane.b32.xlu0 %v4020_v43, %s4065_s22 }
0x3496   :  { %v2783_v45 = vpop.permute.xlu0 %2782 }
0x3497   :  { %v2785_v46 = vmul.f32 %v2783_v45, %v2780_v44  ;;  %v3173_v44 = vld [vmem:[%s4819_s9 + $0x18] sm:$0xff]  ;;  %v3172_v45 = vld [vmem:[%s4819_s9 + $0x10] sm:$0xff] }
0x3499   :  { %v2787_v47 = vadd.f32 %v2786_v30, %v2785_v46  ;;  %v3171_v30 = vld [vmem:[%s4819_s9 + $0x8] sm:$0xff]  ;;  %v3170_v46 = vld [vmem:[%s4819_s9] sm:$0xff] }
0x349b   :  { %2789 = vrot.lane.b32.xlu1 %v2787_v47, %s4065_s22 }
0x350d   :  { %v2790_v13 = vpop.permute.xlu1 %2789 }
0x350e   :  { %3836 = vmatmul.mubr.msk.f32.vlgmr.msra.gmra.mxu0 %vm73_vm1, %v2790_v13 }
0x350f   :  { %3857 = vmatprep.mubr.msk.f32.mxu0 %vm4063_vm0, %v4062_v1 }
0x35ce   :  { %v2859_v19 = vpop.f32.mrf.mxu0 }
0x35cf   :  { %v2860_v7 = vadd.f32 %v4607_v25, %v2859_v19 }
0x35d0   :  { %v3837_v48 = vpop.f32.mrf.mxu0 }
0x35d1   :  { %2871 = vrot.lane.b32.xlu0 %v2860_v7, %s4064_s19  ;;  %v2863_v50 = vadd.f32 %v2860_v7, %v2166_v49 }
0x35d3   :  { %v3345_v51 = vmul.f32 -1.442695, %v2863_v50 }
0x35d5   :  { %4021 = vpow2.f32 %v3345_v51 }
0x35e2   :  { %v4022_v52 = vpop.eup %4021 }
0x35e3   :  { %v2867_v53 = vadd.f32 1.0, %v4022_v52 }
0x35e5   :  { %4023 = vrcp.f32 %v2867_v53 }
0x35f2   :  { %v4024_v54 = vpop.eup %4023 }
0x35f3   :  { %v2881_v63 = vsub.f32 1.0, %v4024_v54  ;;  %v2887_v32 = vmul.f32 %v4024_v54, %v2787_v47  ;;  %v3350_v47 = vld [vmem:[%s4818_s8] ss:$0 sm:$0xff] }
0x3643   :  { %v2872_v55 = vpop.permute.xlu0 %2871 }
0x3644   :  { %v2874_v59 = vmul.f32 %v4024_v54, %v2872_v55 }
0x3646   :  { %2876 = vrot.lane.b32.xlu1 %v2874_v59, %s4064_s19 }
0x36b8   :  { %v2877_v60 = vpop.permute.xlu1 %2876 }
0x36b9   :  { %v2879_v61 = vadd.f32 %v2877_v60, %v2166_v49 }
0x36bb   :  { %4025 = vtanh.f32 %v2879_v61 }
0x36c8   :  { %v4026_v62 = vpop.eup %4025 }
0x36c9   :  { %2883 = vrot.lane.b32.xlu0 %v4026_v62, %s4065_s22 }
0x373b   :  { %v2884_v8 = vpop.permute.xlu0 %2883 }
0x373c   :  { %v2886_v10 = vmul.f32 %v2884_v8, %v2881_v63 }
0x373e   :  { %v2888_v15 = vadd.f32 %v2887_v32, %v2886_v10 }
0x3740   :  { %2890 = vrot.lane.b32.xlu1 %v2888_v15, %s4065_s22 }
0x37b2   :  { %v2891_v16 = vpop.permute.xlu1 %2890 }
0x37b3   :  { %3847 = vmatmul.mubr.msk.f32.vlgmr.msra.gmra.mxu1 %vm73_vm1, %v2891_v16 }
0x37b4   :  { %3868 = vmatprep.mubr.msk.f32.mxu1 %vm4063_vm0, %v4062_v1  ;;  %3861 = vmatpush3.msra.mxu1 %v3084_v11 }
0x37b5   :  { %3862 = vmatprep.subr.mxu1 %v4062_v1 }
0x37b6   :  { %3863 = vmatpush3.msra.mxu1 %v3083_v38 }
0x37b7   :  { %3864 = vmatprep.subr.mxu1 %v4062_v1 }
0x37b8   :  { %3865 = vmatpush3.msra.mxu1 %v3082_v39 }
0x37b9   :  { %3866 = vmatprep.subr.mxu1 %v4062_v1 }
0x37ba   :  { %3867 = vmatpush3.msra.mxu1 %v3081_v22 }
0x3873   :  { %v2960_v3 = vpop.f32.mrf.mxu1 }
0x3874   :  { %v2961_v18 = vadd.f32 %v4607_v25, %v2960_v3  ;;  %v2993_v25 = vld [vmem:[%s4815_s5 + $0x18] sm:$0xff] }
0x3875   :  { %v3848_v5 = vpop.f32.mrf.mxu1  ;;  %3850 = vmatpush3.msra.mxu0 %v2993_v25 }
0x3876   :  { %2972 = vrot.lane.b32.xlu0 %v2961_v18, %s4064_s19  ;;  %v2964_v9 = vadd.f32 %v2961_v18, %v2171_v23  ;;  %3851 = vmatprep.subr.mxu0 %v4062_v1 }
0x3877   :  { %3852 = vmatpush3.msra.mxu0 %v2992_v29 }
0x3878   :  { %v3347_v24 = vmul.f32 -1.442695, %v2964_v9  ;;  %3853 = vmatprep.subr.mxu0 %v4062_v1 }
0x3879   :  { %3854 = vmatpush3.msra.mxu0 %v2991_v57 }
0x387a   :  { %4027 = vpow2.f32 %v3347_v24  ;;  %3855 = vmatprep.subr.mxu0 %v4062_v1 }
0x387b   :  { %3856 = vmatpush3.msra.mxu0 %v2990_v33 }
0x387c   :  { %3871 = vmatprep.subr.mxu0 %v4062_v1 }
0x3887   :  { %v4028_v21 = vpop.eup %4027 }
0x3888   :  { %v2968_v26 = vadd.f32 1.0, %v4028_v21 }
0x388a   :  { %4029 = vrcp.f32 %v2968_v26 }
0x3897   :  { %v4030_v0 = vpop.eup %4029 }
0x3898   :  { %v2982_v34 = vsub.f32 1.0, %v4030_v0  ;;  %v2988_v35 = vmul.f32 %v4030_v0, %v2888_v15 }
0x38e8   :  { %v2973_v27 = vpop.permute.xlu0 %2972 }
0x38e9   :  { %v2975_v56 = vmul.f32 %v4030_v0, %v2973_v27 }
0x38eb   :  { %2977 = vrot.lane.b32.xlu1 %v2975_v56, %s4064_s19 }
0x395d   :  { %v2978_v28 = vpop.permute.xlu1 %2977 }
0x395e   :  { %v2980_v6 = vadd.f32 %v2978_v28, %v2171_v23 }
0x3960   :  { %4031 = vtanh.f32 %v2980_v6 }
0x396d   :  { %v4032_v58 = vpop.eup %4031 }
0x396e   :  { %2984 = vrot.lane.b32.xlu0 %v4032_v58, %s4065_s22 }
0x39e0   :  { %v2985_v31 = vpop.permute.xlu0 %2984 }
0x39e1   :  { %v2987_v36 = vmul.f32 %v2985_v31, %v2982_v34 }
0x39e3   :  { %v2989_v20 = vadd.f32 %v2988_v35, %v2987_v36 }
0x39e5   :  { %3002 = vrot.lane.b32.xlu1 %v2989_v20, %s4065_s22 }
0x3a57   :  { %v3003_v37 = vpop.permute.xlu1 %3002 }
0x3a58   :  { %3858 = vmatmul.mubr.msk.f32.vlgmr.msra.gmra.mxu0 %vm73_vm1, %v3003_v37 }
0x3a59   :  { %3879 = vmatprep.mubr.msk.f32.mxu0 %vm4063_vm0, %v4062_v1  ;;  %3872 = vmatpush3.msra.mxu0 %v3173_v44 }
0x3a5a   :  { %3873 = vmatprep.subr.mxu0 %v4062_v1 }
0x3a5b   :  { %3874 = vmatpush3.msra.mxu0 %v3172_v45 }
0x3a5c   :  { %3875 = vmatprep.subr.mxu0 %v4062_v1 }
0x3a5d   :  { %3876 = vmatpush3.msra.mxu0 %v3171_v30 }
0x3a5e   :  { %3877 = vmatprep.subr.mxu0 %v4062_v1  ;;  %v3352_v1 = vld [vmem:[#allocation3] ss:$0 sm:$0xff] }
0x3a5f   :  { %3878 = vmatpush3.msra.mxu0 %v3170_v46 }
0x3b18   :  { %v3072_v12 = vpop.f32.mrf.mxu0 }
0x3b19   :  { %v3073_v2 = vadd.f32 %v3348_v40, %v3072_v12 }
0x3b1a   :  { %v3859_v17 = vpop.f32.mrf.mxu0 }
0x3b1b   :  { %v3077_v4 = vmul.f32 0.70710677, %v3073_v2  ;;  %v3076_v41 = vmul.f32 0.5, %v3073_v2 }
0x3b1d   :  { %4033 = verf.f32 %v3077_v4 }
0x3b2a   :  { %v4034_v14 = vpop.eup %4033 }
0x3b2b   :  { %v3079_v42 = vadd.f32 1.0, %v4034_v14 }
0x3b2d   :  { %v3080_v43 = vmul.f32 %v3079_v42, %v3076_v41 }
0x3b2f   :  { %3869 = vmatmul.mubr.msk.f32.vlgmr.msra.gmra.mxu1 %vm73_vm1, %v3080_v43 }
0x3bef   :  { %v3161_v13 = vpop.f32.mrf.mxu1 }
0x3bf0   :  { %v3162_v19 = vadd.f32 %v3350_v47, %v3161_v13 }
0x3bf1   :  { %v3870_v7 = vpop.f32.mrf.mxu1 }
0x3bf2   :  { %v3166_v48 = vmul.f32 0.70710677, %v3162_v19  ;;  %v3165_v50 = vmul.f32 0.5, %v3162_v19 }
0x3bf4   :  { %4035 = verf.f32 %v3166_v48 }
0x3c01   :  { %v4036_v49 = vpop.eup %4035 }
0x3c02   :  { %v3168_v51 = vadd.f32 1.0, %v4036_v49 }
0x3c04   :  { %v3169_v52 = vmul.f32 %v3168_v51, %v3165_v50 }
0x3c06   :  { %3880 = vmatmul.mubr.msk.f32.vlgmr.msra.gmra.mxu0 %vm73_vm1, %v3169_v52 }
0x3cc6   :  { %v3250_v53 = vpop.f32.mrf.mxu0 }
0x3cc7   :  { %v3251_v54 = vadd.f32 %v3352_v1, %v3250_v53 }
0x3cc8   :  { %v3881_v55 = vpop.f32.mrf.mxu0 }
0x3cc9   :  { %3255 = vst.msk [vmem:[%s4821_s11] sm:$0xff] %vm3254_vm2, %v3251_v54 }
0x3cca   :  { %3260 = vsyncpa [#allocation5], 1 }

</bundles_post_ra>
